<compile_context>
chip_gen: v6e
topology: v6e:2x2x1
jax: 0.10.0
libtpu: 0.0.40
codegen_flags: <defaults>
</compile_context>

<pallas_src>
import functools
import math

import jax
import jax.numpy as jnp
from jax.experimental import pallas as pl
from jax.experimental.pallas import tpu as pltpu


def _encoder_layer_kernel(x_ref, wq_ref, bq_ref, wk_ref, bk_ref, wv_ref, bv_ref,
                          wo_ref, bo_ref, g1_ref, be1_ref, g2_ref, be2_ref,
                          w1_ref, b1_ref, w2_ref, b2_ref, o_ref,
                          *, n_heads, activation, eps, matmul_dtype):
    # x_ref: (L, Bt, E) block -> folded to (Bt*L, E) rows (l-major, bt-minor).
    L, Bt, E = x_ref.shape
    M = L * Bt
    dh = E // n_heads

    x = x_ref[...].astype(jnp.float32).reshape(M, E)      # leading-dim merge (free)

    def layer_norm(v, gamma, beta):
        mu = jnp.mean(v, axis=-1, keepdims=True)
        var = jnp.mean(jnp.square(v - mu), axis=-1, keepdims=True)
        return (v - mu) * jax.lax.rsqrt(var + eps) * gamma + beta

    cast = lambda a: a.astype(matmul_dtype)

    def mm(a, b):                                          # a @ b, f32 accumulation
        return jnp.dot(cast(a), cast(b), preferred_element_type=jnp.float32)

    def mm_nt(a, b):                                       # a @ b.T without transpose
        return jax.lax.dot_general(
            cast(a), cast(b),
            dimension_numbers=(((1,), (1,)), ((), ())),
            preferred_element_type=jnp.float32)

    # ---------------- pre-norm self-attention ----------------
    xn = layer_norm(x, g1_ref[0], be1_ref[0])
    q = mm(xn, wq_ref[...]) + bq_ref[0]                    # 1/sqrt(dh) pre-folded
    k = mm(xn, wk_ref[...]) + bk_ref[0]
    v = mm(xn, wv_ref[...]) + bv_ref[0]

    # Block-diagonal mask: row r belongs to batch element (r % Bt); only
    # same-batch attention is allowed (softmax is then per batch element).
    row_b = jax.lax.broadcasted_iota(jnp.int32, (M, 1), 0) % Bt
    col_b = jax.lax.broadcasted_iota(jnp.int32, (1, M), 1) % Bt
    same_batch = row_b == col_b                            # (M, M)

    attn = jnp.zeros((M, E), jnp.float32)
    for h in range(n_heads):                               # static unroll, small H
        lo = h * dh
        qh = q[:, lo:lo + dh]
        kh = k[:, lo:lo + dh]
        vh = v[:, lo:lo + dh]
        s = mm_nt(qh, kh)                                  # (M, M) scores
        s = jnp.where(same_batch, s, -jnp.inf)
        s = s - jnp.max(s, axis=-1, keepdims=True)
        p = jnp.exp(s)
        p = p * pl.reciprocal(jnp.sum(p, axis=-1, keepdims=True), approx=True)
        oh = mm(p, vh)                                     # (M, dh)
        attn = attn + mm(oh, wo_ref[h])                    # per-head out-proj accum
    y = x + attn + bo_ref[0]                               # residual (dropout = id)

    # ---------------- pre-norm feed-forward ----------------
    yn = layer_norm(y, g2_ref[0], be2_ref[0])
    h1 = mm(yn, w1_ref[...]) + b1_ref[0]
    if activation == "relu":
        h1 = jnp.maximum(h1, 0.0)
    elif activation == "gelu":
        h1 = jax.nn.gelu(h1, approximate=False)
    else:
        raise ValueError(f"Unsupported activation: {activation}")
    out = y + mm(h1, w2_ref[...]) + b2_ref[0]              # residual (dropout = id)

    # Single full-tile store.  At real dims (E >= 128) this batch-folded block
    # is already lane-dense; at this toy E=32 a fully lane-dense slab would
    # require the (N, L*E) layout, i.e. re-introducing the HBM transpose the
    # perf review asked to remove, so the (L, Bt, E) store is kept.
    o_ref[...] = out.reshape(L, Bt, E).astype(o_ref.dtype)


def transformer_prenorm_encoder_layer(x, params, *, n_heads, activation="relu",
                                      eps=1e-5, batch_block=None,
                                      matmul_dtype=jnp.bfloat16):
    """x: (L, N, E) seq-first (PyTorch nn.MultiheadAttention default layout)."""
    L, N, E = x.shape
    ff_dim = params["linear1_w"].shape[0]
    dh = E // n_heads
    scale = 1.0 / math.sqrt(dh)

    if batch_block is None:
        batch_block = N
    assert N % batch_block == 0, "batch must divide evenly into batch_block"
    # (8,128) layout rule for the (L, Bt, E) block's second-to-last dim.
    assert batch_block == N or batch_block % 8 == 0, \
        "batch_block must be a multiple of 8 or the full batch"
    n_blocks = N // batch_block

    wdt = matmul_dtype
    w_in, b_in = params["in_proj_w"], params["in_proj_b"]   # (3E, E), (3E,)
    # Separate Q/K/V weights (no fused 3E-wide qkv), pre-transposed for x @ W,
    # with the 1/sqrt(dh) scale folded into the Q projection (one-time).
    wq = (w_in[0:E].T * scale).astype(wdt)                   # (E, E)
    wk = w_in[E:2 * E].T.astype(wdt)
    wv = w_in[2 * E:3 * E].T.astype(wdt)
    bq = (b_in[0:E] * scale).reshape(1, E)
    bk = b_in[E:2 * E].reshape(1, E)
    bv = b_in[2 * E:3 * E].reshape(1, E)
    # Out-projection pre-split per head: out = sum_h attn_h @ wo[h].
    wo = params["out_proj_w"].T.reshape(n_heads, dh, E).astype(wdt)  # (H, dh, E)
    bo = params["out_proj_b"].reshape(1, E)
    w1 = params["linear1_w"].T.astype(wdt)                   # (E, FF)
    b1 = params["linear1_b"].reshape(1, ff_dim)
    w2 = params["linear2_w"].T.astype(wdt)                   # (FF, E)
    b2 = params["linear2_b"].reshape(1, E)
    g1 = params["ln1_g"].reshape(1, E)
    be1 = params["ln1_b"].reshape(1, E)
    g2 = params["ln2_g"].reshape(1, E)
    be2 = params["ln2_b"].reshape(1, E)

    kernel = functools.partial(_encoder_layer_kernel, n_heads=n_heads,
                               activation=activation, eps=eps,
                               matmul_dtype=matmul_dtype)

    c2 = lambda b: (0, 0)          # weights resident across the grid
    c3 = lambda b: (0, 0, 0)
    # TODO(synk): at real sizes on v7x, add pipeline_mode=pl.Buffered(1) to the
    # constant-index weight specs and KV/FFN tiling to stay inside 64 MiB VMEM.

    out = pl.pallas_call(
        kernel,
        out_shape=jax.ShapeDtypeStruct((L, N, E), x.dtype),
        grid_spec=pltpu.PrefetchScalarGridSpec(
            num_scalar_prefetch=0,
            grid=(n_blocks,),
            in_specs=[
                pl.BlockSpec((L, batch_block, E), lambda b: (0, b, 0)),  # x in place
                pl.BlockSpec((E, E), c2), pl.BlockSpec((1, E), c2),      # Wq, bq
                pl.BlockSpec((E, E), c2), pl.BlockSpec((1, E), c2),      # Wk, bk
                pl.BlockSpec((E, E), c2), pl.BlockSpec((1, E), c2),      # Wv, bv
                pl.BlockSpec((n_heads, dh, E), c3),                      # Wo (H,dh,E)
                pl.BlockSpec((1, E), c2),                                # bo
                pl.BlockSpec((1, E), c2), pl.BlockSpec((1, E), c2),      # ln1 g, b
                pl.BlockSpec((1, E), c2), pl.BlockSpec((1, E), c2),      # ln2 g, b
                pl.BlockSpec((E, ff_dim), c2), pl.BlockSpec((1, ff_dim), c2),  # W1, b1
                pl.BlockSpec((ff_dim, E), c2), pl.BlockSpec((1, E), c2),       # W2, b2
            ],
            out_specs=pl.BlockSpec((L, batch_block, E), lambda b: (0, b, 0)),
        ),
        compiler_params=pltpu.CompilerParams(
            dimension_semantics=("parallel",),          # independent batch tiles
            vmem_limit_bytes=32 * 1024 * 1024,          # explicit scoped-VMEM budget
        ),
    )(x, wq, bq, wk, bk, wv, bv, wo, bo, g1, be1, g2, be2, w1, b1, w2, b2)

    return out                                          # (L, N, E), no transposes


def _ref_forward(x, params, n_heads, activation="relu", eps=1e-5):
    """Pure-JAX reference mirroring the PyTorch module (eval mode)."""
    L, N, E = x.shape
    dh = E // n_heads

    def ln(v, g, b):
        mu = v.mean(-1, keepdims=True)
        var = ((v - mu) ** 2).mean(-1, keepdims=True)
        return (v - mu) / jnp.sqrt(var + eps) * g + b

    residual = x
    xn = ln(x, params["ln1_g"], params["ln1_b"])
    qkv = xn @ params["in_proj_w"].T + params["in_proj_b"]          # (L, N, 3E)
    q, k, v = jnp.split(qkv, 3, axis=-1)

    def heads(t):
        return t.reshape(L, N, n_heads, dh).transpose(1, 2, 0, 3)   # (N, H, L, dh)

    qh, kh, vh = heads(q), heads(k), heads(v)
    s = jnp.einsum("nhld,nhmd->nhlm", qh * (dh ** -0.5), kh)
    p = jax.nn.softmax(s, axis=-1)
    o = jnp.einsum("nhlm,nhmd->nhld", p, vh)
    o = o.transpose(2, 0, 1, 3).reshape(L, N, E)
    o = o @ params["out_proj_w"].T + params["out_proj_b"]
    x1 = residual + o

    yn = ln(x1, params["ln2_g"], params["ln2_b"])
    h = yn @ params["linear1_w"].T + params["linear1_b"]
    if activation == "relu":
        h = jnp.maximum(h, 0.0)
    else:
        h = jax.nn.gelu(h, approximate=False)
    h = h @ params["linear2_w"].T + params["linear2_b"]
    return x1 + h


if __name__ == "__main__":
    DIM = 32
    N_HEADS = 4
    FF_DIM = 64
    SEQ = 8
    BATCH = 16          # folded 8 per grid step -> grid=(2,), both v7x TCs busy
    BATCH_BLOCK = 8
    ACTIVATION = "relu"

    key = jax.random.PRNGKey(0)
    ks = jax.random.split(key, 12)

    def init(k, shape, scale=0.1):
        return jax.random.normal(k, shape, dtype=jnp.float32) * scale

    params = {
        "in_proj_w":  init(ks[0], (3 * DIM, DIM)),
        "in_proj_b":  init(ks[1], (3 * DIM,)),
        "out_proj_w": init(ks[2], (DIM, DIM)),
        "out_proj_b": init(ks[3], (DIM,)),
        "ln1_g":      jnp.ones((DIM,), jnp.float32),
        "ln1_b":      jnp.zeros((DIM,), jnp.float32),
        "ln2_g":      jnp.ones((DIM,), jnp.float32),
        "ln2_b":      jnp.zeros((DIM,), jnp.float32),
        "linear1_w":  init(ks[4], (FF_DIM, DIM)),
        "linear1_b":  init(ks[5], (FF_DIM,)),
        "linear2_w":  init(ks[6], (DIM, FF_DIM)),
        "linear2_b":  init(ks[7], (DIM,)),
    }

    # seq-first input (L, N, E), matching nn.MultiheadAttention's default layout
    x = jax.random.normal(ks[8], (SEQ, BATCH, DIM), dtype=jnp.float32)
    ref = _ref_forward(x, params, N_HEADS, ACTIVATION)

    # bf16 MXU operands (v6e/v7x recommendation), f32 accumulation + f32 LN/softmax.
    out_bf16 = transformer_prenorm_encoder_layer(
        x, params, n_heads=N_HEADS, activation=ACTIVATION,
        batch_block=BATCH_BLOCK, matmul_dtype=jnp.bfloat16)
    out_bf16 = jax.block_until_ready(out_bf16)
    assert out_bf16.shape == (SEQ, BATCH, DIM)
    assert jnp.allclose(out_bf16, ref, atol=3e-2, rtol=3e-2), "bf16 path mismatch"

    # Full-f32 matmul path for a tighter numerical check (v5e-style).
    out_f32 = transformer_prenorm_encoder_layer(
        x, params, n_heads=N_HEADS, activation=ACTIVATION,
        batch_block=BATCH_BLOCK, matmul_dtype=jnp.float32)
    out_f32 = jax.block_until_ready(out_f32)
    assert jnp.allclose(out_f32, ref, atol=5e-3, rtol=5e-3), "f32 path mismatch"

    print("KERNEL_OK")
</pallas_src>

<mosaic_0001>
module attributes {stable_mosaic.version = 11 : i64} {
  func.func @_encoder_layer_kernel(%arg0: i32, %arg1: memref<8x8x32xf32, #tpu.memory_space<vmem>>, %arg2: memref<32x32xbf16, #tpu.memory_space<vmem>>, %arg3: memref<1x32xf32, #tpu.memory_space<vmem>>, %arg4: memref<32x32xbf16, #tpu.memory_space<vmem>>, %arg5: memref<1x32xf32, #tpu.memory_space<vmem>>, %arg6: memref<32x32xbf16, #tpu.memory_space<vmem>>, %arg7: memref<1x32xf32, #tpu.memory_space<vmem>>, %arg8: memref<4x8x32xbf16, #tpu.memory_space<vmem>>, %arg9: memref<1x32xf32, #tpu.memory_space<vmem>>, %arg10: memref<1x32xf32, #tpu.memory_space<vmem>>, %arg11: memref<1x32xf32, #tpu.memory_space<vmem>>, %arg12: memref<1x32xf32, #tpu.memory_space<vmem>>, %arg13: memref<1x32xf32, #tpu.memory_space<vmem>>, %arg14: memref<32x64xbf16, #tpu.memory_space<vmem>>, %arg15: memref<1x64xf32, #tpu.memory_space<vmem>>, %arg16: memref<64x32xbf16, #tpu.memory_space<vmem>>, %arg17: memref<1x32xf32, #tpu.memory_space<vmem>>, %arg18: memref<8x8x32xf32, #tpu.memory_space<vmem>>) attributes {dimension_semantics = [#tpu.dimension_semantics<parallel>], iteration_bounds = array<i64: 2>, scalar_prefetch = 0 : i64, scratch_operands = 0 : i64, tpu.core_type = #tpu.core_type<tc>, window_params = [{transform_indices = @transform_0, window_bounds = array<i64: 8, 8, 32>}, {pipeline_mode = #tpu.pipeline_mode<synchronous>, transform_indices = @transform_1, window_bounds = array<i64: 32, 32>}, {pipeline_mode = #tpu.pipeline_mode<synchronous>, transform_indices = @transform_2, window_bounds = array<i64: 1, 32>}, {pipeline_mode = #tpu.pipeline_mode<synchronous>, transform_indices = @transform_3, window_bounds = array<i64: 32, 32>}, {pipeline_mode = #tpu.pipeline_mode<synchronous>, transform_indices = @transform_4, window_bounds = array<i64: 1, 32>}, {pipeline_mode = #tpu.pipeline_mode<synchronous>, transform_indices = @transform_5, window_bounds = array<i64: 32, 32>}, {pipeline_mode = #tpu.pipeline_mode<synchronous>, transform_indices = @transform_6, window_bounds = array<i64: 1, 32>}, {pipeline_mode = #tpu.pipeline_mode<synchronous>, transform_indices = @transform_7, window_bounds = array<i64: 4, 8, 32>}, {pipeline_mode = #tpu.pipeline_mode<synchronous>, transform_indices = @transform_8, window_bounds = array<i64: 1, 32>}, {pipeline_mode = #tpu.pipeline_mode<synchronous>, transform_indices = @transform_9, window_bounds = array<i64: 1, 32>}, {pipeline_mode = #tpu.pipeline_mode<synchronous>, transform_indices = @transform_10, window_bounds = array<i64: 1, 32>}, {pipeline_mode = #tpu.pipeline_mode<synchronous>, transform_indices = @transform_11, window_bounds = array<i64: 1, 32>}, {pipeline_mode = #tpu.pipeline_mode<synchronous>, transform_indices = @transform_12, window_bounds = array<i64: 1, 32>}, {pipeline_mode = #tpu.pipeline_mode<synchronous>, transform_indices = @transform_13, window_bounds = array<i64: 32, 64>}, {pipeline_mode = #tpu.pipeline_mode<synchronous>, transform_indices = @transform_14, window_bounds = array<i64: 1, 64>}, {pipeline_mode = #tpu.pipeline_mode<synchronous>, transform_indices = @transform_15, window_bounds = array<i64: 64, 32>}, {pipeline_mode = #tpu.pipeline_mode<synchronous>, transform_indices = @transform_16, window_bounds = array<i64: 1, 32>}, {transform_indices = @transform_17, window_bounds = array<i64: 8, 8, 32>}]} {
    %c0 = arith.constant 0 : index
    %c0_0 = arith.constant 0 : index
    %c0_1 = arith.constant 0 : index
    %0 = vector.load %arg1[%c0, %c0_0, %c0_1] : memref<8x8x32xf32, #tpu.memory_space<vmem>>, vector<8x8x32xf32>
    %1 = vector.shape_cast %0 : vector<8x8x32xf32> to vector<64x32xf32>
    %c0_2 = arith.constant 0 : index
    %c0_3 = arith.constant 0 : index
    %2 = vector.load %arg10[%c0_2, %c0_3] : memref<1x32xf32, #tpu.memory_space<vmem>>, vector<1x32xf32>
    %3 = vector.shape_cast %2 : vector<1x32xf32> to vector<32xf32>
    %c0_4 = arith.constant 0 : index
    %c0_5 = arith.constant 0 : index
    %4 = vector.load %arg11[%c0_4, %c0_5] : memref<1x32xf32, #tpu.memory_space<vmem>>, vector<1x32xf32>
    %5 = vector.shape_cast %4 : vector<1x32xf32> to vector<32xf32>
    %cst = arith.constant dense<0.000000e+00> : vector<64xf32>
    %6 = vector.multi_reduction <add>, %1, %cst [1] : vector<64x32xf32> to vector<64xf32>
    %7 = vector.shape_cast %6 : vector<64xf32> to vector<64x1xf32>
    %cst_6 = arith.constant 3.200000e+01 : f32
    %8 = vector.broadcast %cst_6 : f32 to vector<64x1xf32>
    %9 = arith.divf %7, %8 : vector<64x1xf32>
    %10 = vector.broadcast %9 : vector<64x1xf32> to vector<64x32xf32>
    %11 = arith.subf %1, %10 : vector<64x32xf32>
    %12 = arith.mulf %11, %11 : vector<64x32xf32>
    %cst_7 = arith.constant dense<0.000000e+00> : vector<64xf32>
    %13 = vector.multi_reduction <add>, %12, %cst_7 [1] : vector<64x32xf32> to vector<64xf32>
    %14 = vector.shape_cast %13 : vector<64xf32> to vector<64x1xf32>
    %cst_8 = arith.constant 3.200000e+01 : f32
    %15 = vector.broadcast %cst_8 : f32 to vector<64x1xf32>
    %16 = arith.divf %14, %15 : vector<64x1xf32>
    %17 = vector.broadcast %9 : vector<64x1xf32> to vector<64x32xf32>
    %18 = arith.subf %1, %17 : vector<64x32xf32>
    %cst_9 = arith.constant 9.99999974E-6 : f32
    %19 = vector.broadcast %cst_9 : f32 to vector<64x1xf32>
    %20 = arith.addf %16, %19 : vector<64x1xf32>
    %21 = math.rsqrt %20 : vector<64x1xf32>
    %22 = vector.broadcast %21 : vector<64x1xf32> to vector<64x32xf32>
    %23 = arith.mulf %18, %22 : vector<64x32xf32>
    %24 = vector.shape_cast %3 : vector<32xf32> to vector<1x32xf32>
    %25 = vector.broadcast %24 : vector<1x32xf32> to vector<64x32xf32>
    %26 = arith.mulf %23, %25 : vector<64x32xf32>
    %27 = vector.shape_cast %5 : vector<32xf32> to vector<1x32xf32>
    %28 = vector.broadcast %27 : vector<1x32xf32> to vector<64x32xf32>
    %29 = arith.addf %26, %28 : vector<64x32xf32>
    %c0_10 = arith.constant 0 : index
    %c0_11 = arith.constant 0 : index
    %30 = vector.load %arg2[%c0_10, %c0_11] : memref<32x32xbf16, #tpu.memory_space<vmem>>, vector<32x32xbf16>
    %31 = arith.truncf %29 : vector<64x32xf32> to vector<64x32xbf16>
    %cst_12 = arith.constant dense<0.000000e+00> : vector<64x32xf32>
    %32 = tpu.matmul %31, %30, %cst_12 {dimension_numbers = #tpu.dot_dimension_numbers<[1], [0], [0], [1], [0, 0, 1, 1], [], []>} : vector<64x32xbf16>, vector<32x32xbf16>, vector<64x32xf32> -> vector<64x32xf32>
    %c0_13 = arith.constant 0 : index
    %c0_14 = arith.constant 0 : index
    %33 = vector.load %arg3[%c0_13, %c0_14] : memref<1x32xf32, #tpu.memory_space<vmem>>, vector<1x32xf32>
    %34 = vector.shape_cast %33 : vector<1x32xf32> to vector<32xf32>
    %35 = vector.shape_cast %34 : vector<32xf32> to vector<1x32xf32>
    %36 = vector.broadcast %35 : vector<1x32xf32> to vector<64x32xf32>
    %37 = arith.addf %32, %36 : vector<64x32xf32>
    %c0_15 = arith.constant 0 : index
    %c0_16 = arith.constant 0 : index
    %38 = vector.load %arg4[%c0_15, %c0_16] : memref<32x32xbf16, #tpu.memory_space<vmem>>, vector<32x32xbf16>
    %39 = arith.truncf %29 : vector<64x32xf32> to vector<64x32xbf16>
    %cst_17 = arith.constant dense<0.000000e+00> : vector<64x32xf32>
    %40 = tpu.matmul %39, %38, %cst_17 {dimension_numbers = #tpu.dot_dimension_numbers<[1], [0], [0], [1], [0, 0, 1, 1], [], []>} : vector<64x32xbf16>, vector<32x32xbf16>, vector<64x32xf32> -> vector<64x32xf32>
    %c0_18 = arith.constant 0 : index
    %c0_19 = arith.constant 0 : index
    %41 = vector.load %arg5[%c0_18, %c0_19] : memref<1x32xf32, #tpu.memory_space<vmem>>, vector<1x32xf32>
    %42 = vector.shape_cast %41 : vector<1x32xf32> to vector<32xf32>
    %43 = vector.shape_cast %42 : vector<32xf32> to vector<1x32xf32>
    %44 = vector.broadcast %43 : vector<1x32xf32> to vector<64x32xf32>
    %45 = arith.addf %40, %44 : vector<64x32xf32>
    %c0_20 = arith.constant 0 : index
    %c0_21 = arith.constant 0 : index
    %46 = vector.load %arg6[%c0_20, %c0_21] : memref<32x32xbf16, #tpu.memory_space<vmem>>, vector<32x32xbf16>
    %47 = arith.truncf %29 : vector<64x32xf32> to vector<64x32xbf16>
    %cst_22 = arith.constant dense<0.000000e+00> : vector<64x32xf32>
    %48 = tpu.matmul %47, %46, %cst_22 {dimension_numbers = #tpu.dot_dimension_numbers<[1], [0], [0], [1], [0, 0, 1, 1], [], []>} : vector<64x32xbf16>, vector<32x32xbf16>, vector<64x32xf32> -> vector<64x32xf32>
    %c0_23 = arith.constant 0 : index
    %c0_24 = arith.constant 0 : index
    %49 = vector.load %arg7[%c0_23, %c0_24] : memref<1x32xf32, #tpu.memory_space<vmem>>, vector<1x32xf32>
    %50 = vector.shape_cast %49 : vector<1x32xf32> to vector<32xf32>
    %51 = vector.shape_cast %50 : vector<32xf32> to vector<1x32xf32>
    %52 = vector.broadcast %51 : vector<1x32xf32> to vector<64x32xf32>
    %53 = arith.addf %48, %52 : vector<64x32xf32>
    %54 = tpu.iota {dimensions = array<i32: 0>} : vector<64x1xi32>
    %c8_i32 = arith.constant 8 : i32
    %c0_i32 = arith.constant 0 : i32
    %55 = arith.cmpi eq, %c8_i32, %c0_i32 : i32
    %c1_i32 = arith.constant 1 : i32
    %56 = arith.select %55, %c1_i32, %c8_i32 : i32
    %57 = vector.broadcast %56 : i32 to vector<64x1xi32>
    %58 = arith.remsi %54, %57 : vector<64x1xi32>
    %c0_i32_25 = arith.constant 0 : i32
    %59 = vector.broadcast %c0_i32_25 : i32 to vector<64x1xi32>
    %60 = arith.cmpi ne, %58, %59 : vector<64x1xi32>
    %c0_i32_26 = arith.constant 0 : i32
    %61 = vector.broadcast %c0_i32_26 : i32 to vector<64x1xi32>
    %62 = arith.cmpi slt, %58, %61 : vector<64x1xi32>
    %c0_i32_27 = arith.constant 0 : i32
    %63 = arith.cmpi slt, %56, %c0_i32_27 : i32
    %64 = vector.broadcast %63 : i1 to vector<64x1xi1>
    %65 = vector.broadcast %64 : vector<64x1xi1> to vector<64x1xi1>
    %66 = arith.xori %62, %65 : vector<64x1xi1>
    %67 = arith.andi %66, %60 : vector<64x1xi1>
    %68 = vector.broadcast %56 : i32 to vector<64x1xi32>
    %69 = arith.addi %58, %68 : vector<64x1xi32>
    %70 = arith.select %67, %69, %58 : vector<64x1xi1>, vector<64x1xi32>
    %71 = tpu.iota {dimensions = array<i32: 1>} : vector<1x64xi32>
    %c8_i32_28 = arith.constant 8 : i32
    %c0_i32_29 = arith.constant 0 : i32
    %72 = arith.cmpi eq, %c8_i32_28, %c0_i32_29 : i32
    %c1_i32_30 = arith.constant 1 : i32
    %73 = arith.select %72, %c1_i32_30, %c8_i32_28 : i32
    %74 = vector.broadcast %73 : i32 to vector<1x64xi32>
    %75 = arith.remsi %71, %74 : vector<1x64xi32>
    %c0_i32_31 = arith.constant 0 : i32
    %76 = vector.broadcast %c0_i32_31 : i32 to vector<1x64xi32>
    %77 = arith.cmpi ne, %75, %76 : vector<1x64xi32>
    %c0_i32_32 = arith.constant 0 : i32
    %78 = vector.broadcast %c0_i32_32 : i32 to vector<1x64xi32>
    %79 = arith.cmpi slt, %75, %78 : vector<1x64xi32>
    %c0_i32_33 = arith.constant 0 : i32
    %80 = arith.cmpi slt, %73, %c0_i32_33 : i32
    %81 = vector.broadcast %80 : i1 to vector<1x64xi1>
    %82 = vector.broadcast %81 : vector<1x64xi1> to vector<1x64xi1>
    %83 = arith.xori %79, %82 : vector<1x64xi1>
    %84 = arith.andi %83, %77 : vector<1x64xi1>
    %85 = vector.broadcast %73 : i32 to vector<1x64xi32>
    %86 = arith.addi %75, %85 : vector<1x64xi32>
    %87 = arith.select %84, %86, %75 : vector<1x64xi1>, vector<1x64xi32>
    %88 = vector.broadcast %70 : vector<64x1xi32> to vector<64x64xi32>
    %89 = vector.broadcast %87 : vector<1x64xi32> to vector<64x64xi32>
    %90 = arith.cmpi eq, %88, %89 : vector<64x64xi32>
    %cst_34 = arith.constant 0.000000e+00 : f32
    %91 = vector.broadcast %cst_34 : f32 to vector<64x32xf32>
    %92 = vector.extract_strided_slice %37 {offsets = [0, 0], sizes = [64, 8], strides = [1, 1]} : vector<64x32xf32> to vector<64x8xf32>
    %93 = vector.extract_strided_slice %45 {offsets = [0, 0], sizes = [64, 8], strides = [1, 1]} : vector<64x32xf32> to vector<64x8xf32>
    %94 = vector.extract_strided_slice %53 {offsets = [0, 0], sizes = [64, 8], strides = [1, 1]} : vector<64x32xf32> to vector<64x8xf32>
    %95 = arith.truncf %92 : vector<64x8xf32> to vector<64x8xbf16>
    %96 = arith.truncf %93 : vector<64x8xf32> to vector<64x8xbf16>
    %cst_35 = arith.constant dense<0.000000e+00> : vector<64x64xf32>
    %97 = tpu.matmul %95, %96, %cst_35 {dimension_numbers = #tpu.dot_dimension_numbers<[1], [1], [0], [0], [0, 0, 1, 0], [], []>} : vector<64x8xbf16>, vector<64x8xbf16>, vector<64x64xf32> -> vector<64x64xf32>
    %cst_36 = arith.constant 0xFF800000 : f32
    %98 = vector.broadcast %cst_36 : f32 to vector<64x64xf32>
    %99 = arith.select %90, %97, %98 : vector<64x64xi1>, vector<64x64xf32>
    %cst_37 = arith.constant dense<0xFF800000> : vector<64xf32>
    %100 = vector.multi_reduction <maximumf>, %99, %cst_37 [1] : vector<64x64xf32> to vector<64xf32>
    %101 = vector.shape_cast %100 : vector<64xf32> to vector<64x1xf32>
    %102 = vector.broadcast %101 : vector<64x1xf32> to vector<64x64xf32>
    %103 = arith.subf %99, %102 : vector<64x64xf32>
    %104 = math.exp %103 : vector<64x64xf32>
    %cst_38 = arith.constant dense<0.000000e+00> : vector<64xf32>
    %105 = vector.multi_reduction <add>, %104, %cst_38 [1] : vector<64x64xf32> to vector<64xf32>
    %106 = vector.shape_cast %105 : vector<64xf32> to vector<64x1xf32>
    %107 = tpu.reciprocal %106 {approx = true} : vector<64x1xf32> -> vector<64x1xf32>
    %108 = vector.broadcast %107 : vector<64x1xf32> to vector<64x64xf32>
    %109 = arith.mulf %104, %108 : vector<64x64xf32>
    %110 = arith.truncf %109 : vector<64x64xf32> to vector<64x64xbf16>
    %111 = arith.truncf %94 : vector<64x8xf32> to vector<64x8xbf16>
    %cst_39 = arith.constant dense<0.000000e+00> : vector<64x8xf32>
    %112 = tpu.matmul %110, %111, %cst_39 {dimension_numbers = #tpu.dot_dimension_numbers<[1], [0], [0], [1], [0, 0, 1, 1], [], []>} : vector<64x64xbf16>, vector<64x8xbf16>, vector<64x8xf32> -> vector<64x8xf32>
    %c0_40 = arith.constant 0 : index
    %c0_41 = arith.constant 0 : index
    %c0_42 = arith.constant 0 : index
    %113 = vector.load %arg8[%c0_40, %c0_41, %c0_42] : memref<4x8x32xbf16, #tpu.memory_space<vmem>>, vector<1x8x32xbf16>
    %114 = vector.shape_cast %113 : vector<1x8x32xbf16> to vector<8x32xbf16>
    %115 = arith.truncf %112 : vector<64x8xf32> to vector<64x8xbf16>
    %cst_43 = arith.constant dense<0.000000e+00> : vector<64x32xf32>
    %116 = tpu.matmul %115, %114, %cst_43 {dimension_numbers = #tpu.dot_dimension_numbers<[1], [0], [0], [1], [0, 0, 1, 1], [], []>} : vector<64x8xbf16>, vector<8x32xbf16>, vector<64x32xf32> -> vector<64x32xf32>
    %117 = arith.addf %91, %116 : vector<64x32xf32>
    %118 = vector.extract_strided_slice %37 {offsets = [0, 8], sizes = [64, 8], strides = [1, 1]} : vector<64x32xf32> to vector<64x8xf32>
    %119 = vector.extract_strided_slice %45 {offsets = [0, 8], sizes = [64, 8], strides = [1, 1]} : vector<64x32xf32> to vector<64x8xf32>
    %120 = vector.extract_strided_slice %53 {offsets = [0, 8], sizes = [64, 8], strides = [1, 1]} : vector<64x32xf32> to vector<64x8xf32>
    %121 = arith.truncf %118 : vector<64x8xf32> to vector<64x8xbf16>
    %122 = arith.truncf %119 : vector<64x8xf32> to vector<64x8xbf16>
    %cst_44 = arith.constant dense<0.000000e+00> : vector<64x64xf32>
    %123 = tpu.matmul %121, %122, %cst_44 {dimension_numbers = #tpu.dot_dimension_numbers<[1], [1], [0], [0], [0, 0, 1, 0], [], []>} : vector<64x8xbf16>, vector<64x8xbf16>, vector<64x64xf32> -> vector<64x64xf32>
    %cst_45 = arith.constant 0xFF800000 : f32
    %124 = vector.broadcast %cst_45 : f32 to vector<64x64xf32>
    %125 = arith.select %90, %123, %124 : vector<64x64xi1>, vector<64x64xf32>
    %cst_46 = arith.constant dense<0xFF800000> : vector<64xf32>
    %126 = vector.multi_reduction <maximumf>, %125, %cst_46 [1] : vector<64x64xf32> to vector<64xf32>
    %127 = vector.shape_cast %126 : vector<64xf32> to vector<64x1xf32>
    %128 = vector.broadcast %127 : vector<64x1xf32> to vector<64x64xf32>
    %129 = arith.subf %125, %128 : vector<64x64xf32>
    %130 = math.exp %129 : vector<64x64xf32>
    %cst_47 = arith.constant dense<0.000000e+00> : vector<64xf32>
    %131 = vector.multi_reduction <add>, %130, %cst_47 [1] : vector<64x64xf32> to vector<64xf32>
    %132 = vector.shape_cast %131 : vector<64xf32> to vector<64x1xf32>
    %133 = tpu.reciprocal %132 {approx = true} : vector<64x1xf32> -> vector<64x1xf32>
    %134 = vector.broadcast %133 : vector<64x1xf32> to vector<64x64xf32>
    %135 = arith.mulf %130, %134 : vector<64x64xf32>
    %136 = arith.truncf %135 : vector<64x64xf32> to vector<64x64xbf16>
    %137 = arith.truncf %120 : vector<64x8xf32> to vector<64x8xbf16>
    %cst_48 = arith.constant dense<0.000000e+00> : vector<64x8xf32>
    %138 = tpu.matmul %136, %137, %cst_48 {dimension_numbers = #tpu.dot_dimension_numbers<[1], [0], [0], [1], [0, 0, 1, 1], [], []>} : vector<64x64xbf16>, vector<64x8xbf16>, vector<64x8xf32> -> vector<64x8xf32>
    %c1 = arith.constant 1 : index
    %c0_49 = arith.constant 0 : index
    %c0_50 = arith.constant 0 : index
    %139 = vector.load %arg8[%c1, %c0_49, %c0_50] : memref<4x8x32xbf16, #tpu.memory_space<vmem>>, vector<1x8x32xbf16>
    %140 = vector.shape_cast %139 : vector<1x8x32xbf16> to vector<8x32xbf16>
    %141 = arith.truncf %138 : vector<64x8xf32> to vector<64x8xbf16>
    %cst_51 = arith.constant dense<0.000000e+00> : vector<64x32xf32>
    %142 = tpu.matmul %141, %140, %cst_51 {dimension_numbers = #tpu.dot_dimension_numbers<[1], [0], [0], [1], [0, 0, 1, 1], [], []>} : vector<64x8xbf16>, vector<8x32xbf16>, vector<64x32xf32> -> vector<64x32xf32>
    %143 = arith.addf %117, %142 : vector<64x32xf32>
    %144 = vector.extract_strided_slice %37 {offsets = [0, 16], sizes = [64, 8], strides = [1, 1]} : vector<64x32xf32> to vector<64x8xf32>
    %145 = vector.extract_strided_slice %45 {offsets = [0, 16], sizes = [64, 8], strides = [1, 1]} : vector<64x32xf32> to vector<64x8xf32>
    %146 = vector.extract_strided_slice %53 {offsets = [0, 16], sizes = [64, 8], strides = [1, 1]} : vector<64x32xf32> to vector<64x8xf32>
    %147 = arith.truncf %144 : vector<64x8xf32> to vector<64x8xbf16>
    %148 = arith.truncf %145 : vector<64x8xf32> to vector<64x8xbf16>
    %cst_52 = arith.constant dense<0.000000e+00> : vector<64x64xf32>
    %149 = tpu.matmul %147, %148, %cst_52 {dimension_numbers = #tpu.dot_dimension_numbers<[1], [1], [0], [0], [0, 0, 1, 0], [], []>} : vector<64x8xbf16>, vector<64x8xbf16>, vector<64x64xf32> -> vector<64x64xf32>
    %cst_53 = arith.constant 0xFF800000 : f32
    %150 = vector.broadcast %cst_53 : f32 to vector<64x64xf32>
    %151 = arith.select %90, %149, %150 : vector<64x64xi1>, vector<64x64xf32>
    %cst_54 = arith.constant dense<0xFF800000> : vector<64xf32>
    %152 = vector.multi_reduction <maximumf>, %151, %cst_54 [1] : vector<64x64xf32> to vector<64xf32>
    %153 = vector.shape_cast %152 : vector<64xf32> to vector<64x1xf32>
    %154 = vector.broadcast %153 : vector<64x1xf32> to vector<64x64xf32>
    %155 = arith.subf %151, %154 : vector<64x64xf32>
    %156 = math.exp %155 : vector<64x64xf32>
    %cst_55 = arith.constant dense<0.000000e+00> : vector<64xf32>
    %157 = vector.multi_reduction <add>, %156, %cst_55 [1] : vector<64x64xf32> to vector<64xf32>
    %158 = vector.shape_cast %157 : vector<64xf32> to vector<64x1xf32>
    %159 = tpu.reciprocal %158 {approx = true} : vector<64x1xf32> -> vector<64x1xf32>
    %160 = vector.broadcast %159 : vector<64x1xf32> to vector<64x64xf32>
    %161 = arith.mulf %156, %160 : vector<64x64xf32>
    %162 = arith.truncf %161 : vector<64x64xf32> to vector<64x64xbf16>
    %163 = arith.truncf %146 : vector<64x8xf32> to vector<64x8xbf16>
    %cst_56 = arith.constant dense<0.000000e+00> : vector<64x8xf32>
    %164 = tpu.matmul %162, %163, %cst_56 {dimension_numbers = #tpu.dot_dimension_numbers<[1], [0], [0], [1], [0, 0, 1, 1], [], []>} : vector<64x64xbf16>, vector<64x8xbf16>, vector<64x8xf32> -> vector<64x8xf32>
    %c2 = arith.constant 2 : index
    %c0_57 = arith.constant 0 : index
    %c0_58 = arith.constant 0 : index
    %165 = vector.load %arg8[%c2, %c0_57, %c0_58] : memref<4x8x32xbf16, #tpu.memory_space<vmem>>, vector<1x8x32xbf16>
    %166 = vector.shape_cast %165 : vector<1x8x32xbf16> to vector<8x32xbf16>
    %167 = arith.truncf %164 : vector<64x8xf32> to vector<64x8xbf16>
    %cst_59 = arith.constant dense<0.000000e+00> : vector<64x32xf32>
    %168 = tpu.matmul %167, %166, %cst_59 {dimension_numbers = #tpu.dot_dimension_numbers<[1], [0], [0], [1], [0, 0, 1, 1], [], []>} : vector<64x8xbf16>, vector<8x32xbf16>, vector<64x32xf32> -> vector<64x32xf32>
    %169 = arith.addf %143, %168 : vector<64x32xf32>
    %170 = vector.extract_strided_slice %37 {offsets = [0, 24], sizes = [64, 8], strides = [1, 1]} : vector<64x32xf32> to vector<64x8xf32>
    %171 = vector.extract_strided_slice %45 {offsets = [0, 24], sizes = [64, 8], strides = [1, 1]} : vector<64x32xf32> to vector<64x8xf32>
    %172 = vector.extract_strided_slice %53 {offsets = [0, 24], sizes = [64, 8], strides = [1, 1]} : vector<64x32xf32> to vector<64x8xf32>
    %173 = arith.truncf %170 : vector<64x8xf32> to vector<64x8xbf16>
    %174 = arith.truncf %171 : vector<64x8xf32> to vector<64x8xbf16>
    %cst_60 = arith.constant dense<0.000000e+00> : vector<64x64xf32>
    %175 = tpu.matmul %173, %174, %cst_60 {dimension_numbers = #tpu.dot_dimension_numbers<[1], [1], [0], [0], [0, 0, 1, 0], [], []>} : vector<64x8xbf16>, vector<64x8xbf16>, vector<64x64xf32> -> vector<64x64xf32>
    %cst_61 = arith.constant 0xFF800000 : f32
    %176 = vector.broadcast %cst_61 : f32 to vector<64x64xf32>
    %177 = arith.select %90, %175, %176 : vector<64x64xi1>, vector<64x64xf32>
    %cst_62 = arith.constant dense<0xFF800000> : vector<64xf32>
    %178 = vector.multi_reduction <maximumf>, %177, %cst_62 [1] : vector<64x64xf32> to vector<64xf32>
    %179 = vector.shape_cast %178 : vector<64xf32> to vector<64x1xf32>
    %180 = vector.broadcast %179 : vector<64x1xf32> to vector<64x64xf32>
    %181 = arith.subf %177, %180 : vector<64x64xf32>
    %182 = math.exp %181 : vector<64x64xf32>
    %cst_63 = arith.constant dense<0.000000e+00> : vector<64xf32>
    %183 = vector.multi_reduction <add>, %182, %cst_63 [1] : vector<64x64xf32> to vector<64xf32>
    %184 = vector.shape_cast %183 : vector<64xf32> to vector<64x1xf32>
    %185 = tpu.reciprocal %184 {approx = true} : vector<64x1xf32> -> vector<64x1xf32>
    %186 = vector.broadcast %185 : vector<64x1xf32> to vector<64x64xf32>
    %187 = arith.mulf %182, %186 : vector<64x64xf32>
    %188 = arith.truncf %187 : vector<64x64xf32> to vector<64x64xbf16>
    %189 = arith.truncf %172 : vector<64x8xf32> to vector<64x8xbf16>
    %cst_64 = arith.constant dense<0.000000e+00> : vector<64x8xf32>
    %190 = tpu.matmul %188, %189, %cst_64 {dimension_numbers = #tpu.dot_dimension_numbers<[1], [0], [0], [1], [0, 0, 1, 1], [], []>} : vector<64x64xbf16>, vector<64x8xbf16>, vector<64x8xf32> -> vector<64x8xf32>
    %c3 = arith.constant 3 : index
    %c0_65 = arith.constant 0 : index
    %c0_66 = arith.constant 0 : index
    %191 = vector.load %arg8[%c3, %c0_65, %c0_66] : memref<4x8x32xbf16, #tpu.memory_space<vmem>>, vector<1x8x32xbf16>
    %192 = vector.shape_cast %191 : vector<1x8x32xbf16> to vector<8x32xbf16>
    %193 = arith.truncf %190 : vector<64x8xf32> to vector<64x8xbf16>
    %cst_67 = arith.constant dense<0.000000e+00> : vector<64x32xf32>
    %194 = tpu.matmul %193, %192, %cst_67 {dimension_numbers = #tpu.dot_dimension_numbers<[1], [0], [0], [1], [0, 0, 1, 1], [], []>} : vector<64x8xbf16>, vector<8x32xbf16>, vector<64x32xf32> -> vector<64x32xf32>
    %195 = arith.addf %169, %194 : vector<64x32xf32>
    %196 = arith.addf %1, %195 : vector<64x32xf32>
    %c0_68 = arith.constant 0 : index
    %c0_69 = arith.constant 0 : index
    %197 = vector.load %arg9[%c0_68, %c0_69] : memref<1x32xf32, #tpu.memory_space<vmem>>, vector<1x32xf32>
    %198 = vector.shape_cast %197 : vector<1x32xf32> to vector<32xf32>
    %199 = vector.shape_cast %198 : vector<32xf32> to vector<1x32xf32>
    %200 = vector.broadcast %199 : vector<1x32xf32> to vector<64x32xf32>
    %201 = arith.addf %196, %200 : vector<64x32xf32>
    %c0_70 = arith.constant 0 : index
    %c0_71 = arith.constant 0 : index
    %202 = vector.load %arg12[%c0_70, %c0_71] : memref<1x32xf32, #tpu.memory_space<vmem>>, vector<1x32xf32>
    %203 = vector.shape_cast %202 : vector<1x32xf32> to vector<32xf32>
    %c0_72 = arith.constant 0 : index
    %c0_73 = arith.constant 0 : index
    %204 = vector.load %arg13[%c0_72, %c0_73] : memref<1x32xf32, #tpu.memory_space<vmem>>, vector<1x32xf32>
    %205 = vector.shape_cast %204 : vector<1x32xf32> to vector<32xf32>
    %cst_74 = arith.constant dense<0.000000e+00> : vector<64xf32>
    %206 = vector.multi_reduction <add>, %201, %cst_74 [1] : vector<64x32xf32> to vector<64xf32>
    %207 = vector.shape_cast %206 : vector<64xf32> to vector<64x1xf32>
    %cst_75 = arith.constant 3.200000e+01 : f32
    %208 = vector.broadcast %cst_75 : f32 to vector<64x1xf32>
    %209 = arith.divf %207, %208 : vector<64x1xf32>
    %210 = vector.broadcast %209 : vector<64x1xf32> to vector<64x32xf32>
    %211 = arith.subf %201, %210 : vector<64x32xf32>
    %212 = arith.mulf %211, %211 : vector<64x32xf32>
    %cst_76 = arith.constant dense<0.000000e+00> : vector<64xf32>
    %213 = vector.multi_reduction <add>, %212, %cst_76 [1] : vector<64x32xf32> to vector<64xf32>
    %214 = vector.shape_cast %213 : vector<64xf32> to vector<64x1xf32>
    %cst_77 = arith.constant 3.200000e+01 : f32
    %215 = vector.broadcast %cst_77 : f32 to vector<64x1xf32>
    %216 = arith.divf %214, %215 : vector<64x1xf32>
    %217 = vector.broadcast %209 : vector<64x1xf32> to vector<64x32xf32>
    %218 = arith.subf %201, %217 : vector<64x32xf32>
    %cst_78 = arith.constant 9.99999974E-6 : f32
    %219 = vector.broadcast %cst_78 : f32 to vector<64x1xf32>
    %220 = arith.addf %216, %219 : vector<64x1xf32>
    %221 = math.rsqrt %220 : vector<64x1xf32>
    %222 = vector.broadcast %221 : vector<64x1xf32> to vector<64x32xf32>
    %223 = arith.mulf %218, %222 : vector<64x32xf32>
    %224 = vector.shape_cast %203 : vector<32xf32> to vector<1x32xf32>
    %225 = vector.broadcast %224 : vector<1x32xf32> to vector<64x32xf32>
    %226 = arith.mulf %223, %225 : vector<64x32xf32>
    %227 = vector.shape_cast %205 : vector<32xf32> to vector<1x32xf32>
    %228 = vector.broadcast %227 : vector<1x32xf32> to vector<64x32xf32>
    %229 = arith.addf %226, %228 : vector<64x32xf32>
    %c0_79 = arith.constant 0 : index
    %c0_80 = arith.constant 0 : index
    %230 = vector.load %arg14[%c0_79, %c0_80] : memref<32x64xbf16, #tpu.memory_space<vmem>>, vector<32x64xbf16>
    %231 = arith.truncf %229 : vector<64x32xf32> to vector<64x32xbf16>
    %cst_81 = arith.constant dense<0.000000e+00> : vector<64x64xf32>
    %232 = tpu.matmul %231, %230, %cst_81 {dimension_numbers = #tpu.dot_dimension_numbers<[1], [0], [0], [1], [0, 0, 1, 1], [], []>} : vector<64x32xbf16>, vector<32x64xbf16>, vector<64x64xf32> -> vector<64x64xf32>
    %c0_82 = arith.constant 0 : index
    %c0_83 = arith.constant 0 : index
    %233 = vector.load %arg15[%c0_82, %c0_83] : memref<1x64xf32, #tpu.memory_space<vmem>>, vector<1x64xf32>
    %234 = vector.shape_cast %233 : vector<1x64xf32> to vector<64xf32>
    %235 = vector.shape_cast %234 : vector<64xf32> to vector<1x64xf32>
    %236 = vector.broadcast %235 : vector<1x64xf32> to vector<64x64xf32>
    %237 = arith.addf %232, %236 : vector<64x64xf32>
    %cst_84 = arith.constant 0.000000e+00 : f32
    %238 = vector.broadcast %cst_84 : f32 to vector<64x64xf32>
    %239 = arith.maximumf %237, %238 : vector<64x64xf32>
    %c0_85 = arith.constant 0 : index
    %c0_86 = arith.constant 0 : index
    %240 = vector.load %arg16[%c0_85, %c0_86] : memref<64x32xbf16, #tpu.memory_space<vmem>>, vector<64x32xbf16>
    %241 = arith.truncf %239 : vector<64x64xf32> to vector<64x64xbf16>
    %cst_87 = arith.constant dense<0.000000e+00> : vector<64x32xf32>
    %242 = tpu.matmul %241, %240, %cst_87 {dimension_numbers = #tpu.dot_dimension_numbers<[1], [0], [0], [1], [0, 0, 1, 1], [], []>} : vector<64x64xbf16>, vector<64x32xbf16>, vector<64x32xf32> -> vector<64x32xf32>
    %243 = arith.addf %201, %242 : vector<64x32xf32>
    %c0_88 = arith.constant 0 : index
    %c0_89 = arith.constant 0 : index
    %244 = vector.load %arg17[%c0_88, %c0_89] : memref<1x32xf32, #tpu.memory_space<vmem>>, vector<1x32xf32>
    %245 = vector.shape_cast %244 : vector<1x32xf32> to vector<32xf32>
    %246 = vector.shape_cast %245 : vector<32xf32> to vector<1x32xf32>
    %247 = vector.broadcast %246 : vector<1x32xf32> to vector<64x32xf32>
    %248 = arith.addf %243, %247 : vector<64x32xf32>
    %249 = vector.shape_cast %248 : vector<64x32xf32> to vector<8x8x32xf32>
    %c0_90 = arith.constant 0 : index
    %c0_91 = arith.constant 0 : index
    %c0_92 = arith.constant 0 : index
    %250 = vector.load %arg18[%c0_90, %c0_91, %c0_92] : memref<8x8x32xf32, #tpu.memory_space<vmem>>, vector<8x8x32xf32>
    tpu.vector_store %arg18[%c0_90, %c0_91, %c0_92], %249 {strides = array<i32>} : memref<8x8x32xf32, #tpu.memory_space<vmem>>, vector<8x8x32xf32>,
    return
  }
  func.func @transform_0(%arg0: i32) -> (i32, i32, i32) {
    %c0_i32 = arith.constant 0 : i32
    %c0_i32_0 = arith.constant 0 : i32
    %c0_i32_1 = arith.constant 0 : i32
    return %c0_i32, %arg0, %c0_i32_0 : i32, i32, i32
  }
  func.func @transform_1(%arg0: i32) -> (i32, i32) {
    %c0_i32 = arith.constant 0 : i32
    %c0_i32_0 = arith.constant 0 : i32
    %c0_i32_1 = arith.constant 0 : i32
    return %c0_i32, %c0_i32_0 : i32, i32
  }
  func.func @transform_2(%arg0: i32) -> (i32, i32) {
    %c0_i32 = arith.constant 0 : i32
    %c0_i32_0 = arith.constant 0 : i32
    %c0_i32_1 = arith.constant 0 : i32
    return %c0_i32, %c0_i32_0 : i32, i32
  }
  func.func @transform_3(%arg0: i32) -> (i32, i32) {
    %c0_i32 = arith.constant 0 : i32
    %c0_i32_0 = arith.constant 0 : i32
    %c0_i32_1 = arith.constant 0 : i32
    return %c0_i32, %c0_i32_0 : i32, i32
  }
  func.func @transform_4(%arg0: i32) -> (i32, i32) {
    %c0_i32 = arith.constant 0 : i32
    %c0_i32_0 = arith.constant 0 : i32
    %c0_i32_1 = arith.constant 0 : i32
    return %c0_i32, %c0_i32_0 : i32, i32
  }
  func.func @transform_5(%arg0: i32) -> (i32, i32) {
    %c0_i32 = arith.constant 0 : i32
    %c0_i32_0 = arith.constant 0 : i32
    %c0_i32_1 = arith.constant 0 : i32
    return %c0_i32, %c0_i32_0 : i32, i32
  }
  func.func @transform_6(%arg0: i32) -> (i32, i32) {
    %c0_i32 = arith.constant 0 : i32
    %c0_i32_0 = arith.constant 0 : i32
    %c0_i32_1 = arith.constant 0 : i32
    return %c0_i32, %c0_i32_0 : i32, i32
  }
  func.func @transform_7(%arg0: i32) -> (i32, i32, i32) {
    %c0_i32 = arith.constant 0 : i32
    %c0_i32_0 = arith.constant 0 : i32
    %c0_i32_1 = arith.constant 0 : i32
    %c0_i32_2 = arith.constant 0 : i32
    return %c0_i32, %c0_i32_0, %c0_i32_1 : i32, i32, i32
  }
  func.func @transform_8(%arg0: i32) -> (i32, i32) {
    %c0_i32 = arith.constant 0 : i32
    %c0_i32_0 = arith.constant 0 : i32
    %c0_i32_1 = arith.constant 0 : i32
    return %c0_i32, %c0_i32_0 : i32, i32
  }
  func.func @transform_9(%arg0: i32) -> (i32, i32) {
    %c0_i32 = arith.constant 0 : i32
    %c0_i32_0 = arith.constant 0 : i32
    %c0_i32_1 = arith.constant 0 : i32
    return %c0_i32, %c0_i32_0 : i32, i32
  }
  func.func @transform_10(%arg0: i32) -> (i32, i32) {
    %c0_i32 = arith.constant 0 : i32
    %c0_i32_0 = arith.constant 0 : i32
    %c0_i32_1 = arith.constant 0 : i32
    return %c0_i32, %c0_i32_0 : i32, i32
  }
  func.func @transform_11(%arg0: i32) -> (i32, i32) {
    %c0_i32 = arith.constant 0 : i32
    %c0_i32_0 = arith.constant 0 : i32
    %c0_i32_1 = arith.constant 0 : i32
    return %c0_i32, %c0_i32_0 : i32, i32
  }
  func.func @transform_12(%arg0: i32) -> (i32, i32) {
    %c0_i32 = arith.constant 0 : i32
    %c0_i32_0 = arith.constant 0 : i32
    %c0_i32_1 = arith.constant 0 : i32
    return %c0_i32, %c0_i32_0 : i32, i32
  }
  func.func @transform_13(%arg0: i32) -> (i32, i32) {
    %c0_i32 = arith.constant 0 : i32
    %c0_i32_0 = arith.constant 0 : i32
    %c0_i32_1 = arith.constant 0 : i32
    return %c0_i32, %c0_i32_0 : i32, i32
  }
  func.func @transform_14(%arg0: i32) -> (i32, i32) {
    %c0_i32 = arith.constant 0 : i32
    %c0_i32_0 = arith.constant 0 : i32
    %c0_i32_1 = arith.constant 0 : i32
    return %c0_i32, %c0_i32_0 : i32, i32
  }
  func.func @transform_15(%arg0: i32) -> (i32, i32) {
    %c0_i32 = arith.constant 0 : i32
    %c0_i32_0 = arith.constant 0 : i32
    %c0_i32_1 = arith.constant 0 : i32
    return %c0_i32, %c0_i32_0 : i32, i32
  }
  func.func @transform_16(%arg0: i32) -> (i32, i32) {
    %c0_i32 = arith.constant 0 : i32
    %c0_i32_0 = arith.constant 0 : i32
    %c0_i32_1 = arith.constant 0 : i32
    return %c0_i32, %c0_i32_0 : i32, i32
  }
  func.func @transform_17(%arg0: i32) -> (i32, i32, i32) {
    %c0_i32 = arith.constant 0 : i32
    %c0_i32_0 = arith.constant 0 : i32
    %c0_i32_1 = arith.constant 0 : i32
    return %c0_i32, %arg0, %c0_i32_0 : i32, i32, i32
  }
}

</mosaic_0001>

<bundles_post_ra>
// kernel: tpu_custom_call.1
= control target key start
LH: loop header
LB: loop body
LE: loop exit
PB: predicated region body
PF: predicated region fallthrough
CT: control target
= control target key end

     0   :  { %s5522_s0 = inlined_call_operand.hbm [shape: f32[8,16,32], index: 0, kind: input, shape index: {}]   ;;  %s5523_s1 = inlined_call_operand.vmem [shape: bf16[32,32], index: 1, kind: input, shape index: {}]   ;;  %s5524_s2 = inlined_call_operand.hbm [shape: f32[1,32], index: 2, kind: input, shape index: {}]   ;;  %s5525_s3 = inlined_call_operand.vmem [shape: bf16[32,32], index: 3, kind: input, shape index: {}]   ;;  %s5526_s4 = inlined_call_operand.hbm [shape: f32[1,32], index: 4, kind: input, shape index: {}]   ;;  %s5527_s5 = inlined_call_operand.vmem [shape: bf16[32,32], index: 5, kind: input, shape index: {}]   ;;  %s5528_s6 = inlined_call_operand.hbm [shape: f32[1,32], index: 6, kind: input, shape index: {}]   ;;  %s5529_s7 = inlined_call_operand.hbm [shape: bf16[4,8,32], index: 7, kind: input, shape index: {}]   ;;  %s5530_s8 = inlined_call_operand.hbm [shape: f32[1,32], index: 8, kind: input, shape index: {}]   ;;  %s5531_s9 = inlined_call_operand.hbm [shape: f32[1,32], index: 9, kind: input, shape index: {}]   ;;  %s5532_s10 = inlined_call_operand.vmem [shape: f32[1,32], index: 10, kind: input, shape index: {}]   ;;  %s5533_s11 = inlined_call_operand.vmem [shape: f32[1,32], index: 11, kind: input, shape index: {}]   ;;  %s5534_s12 = inlined_call_operand.vmem [shape: f32[1,32], index: 12, kind: input, shape index: {}]   ;;  %s5535_s13 = inlined_call_operand.vmem [shape: bf16[32,64], index: 13, kind: input, shape index: {}]   ;;  %s5536_s14 = inlined_call_operand.vmem [shape: f32[1,64], index: 14, kind: input, shape index: {}]   ;;  %s5537_s15 = inlined_call_operand.vmem [shape: bf16[64,32], index: 15, kind: input, shape index: {}]   ;;  %s5538_s16 = inlined_call_operand.vmem [shape: f32[1,32], index: 16, kind: input, shape index: {}]   ;;  %s5539_s17 = inlined_call_operand.hbm [shape: f32[8,16,32], index: 17, kind: output, shape index: {}]  }
   0x1   :  { %5548 = sst [smem:[#allocation22_spill]] %s5522_s0 }
   0x2   :  { %5549 = sst [smem:[#allocation23_spill]] %s5523_s1 }
   0x3   :  { %5550 = sst [smem:[#allocation24_spill]] %s5524_s2 }
   0x4   :  { %5551 = sst [smem:[#allocation25_spill]] %s5526_s4 }
   0x5   :  { %5552 = sst [smem:[#allocation26_spill]] %s5528_s6 }
   0x6   :  { %5553 = sst [smem:[#allocation27_spill]] %s5529_s7 }
   0x7   :  { %5554 = sst [smem:[#allocation28_spill]] %s5530_s8 }
   0x8   :  { %5555 = sst [smem:[#allocation29_spill]] %s5531_s9 }
   0x9   :  { %5556 = sst [smem:[#allocation30_spill]] %s5538_s16 }
   0xa   :  { %5557 = sst [smem:[#allocation31_spill]] %s5539_s17 }
   0xb   :  { %22 = vsyncpa [#allocation3], 0 }
   0xc   :  { %24 = vsyncpa [#allocation3 + $0x1], 0 }
   0xd   :  { %25 = vsyncpa [#allocation6], 0 }
   0xe   :  { %26 = vsyncpa [#allocation9], 0 }
   0xf   :  { %27 = vsyncpa [#allocation12], 0 }
  0x10   :  { %28 = vsyncpa [#allocation4], 0 }
  0x11   :  { %30 = vsyncpa [#allocation4 + $0x1], 0  ;;  %s4440_s24 = smov 0   ;;  %s4442_s25 = smov 0  }
  0x12   :  { %s4444_s26 = smov 0   ;;  %s4446_s27 = smov 0  }
  0x13 LB: > { %5558 = sst [smem:[#allocation20_spill]] %s4325_s26  ;;  %s4331_s28 = smov [#allocation5]   ;;  %s4329_s27 = sphi %s4446_s27, %s5610_s27   ;;  %s4325_s26 = sphi %s4444_s26, %s5607_s26   ;;  %s4321_s25 = sphi %s4442_s25, %s5609_s25   ;;  %s4317_s24 = sphi %s4440_s24, %s5608_s24  }
  0x14   : > { %s445_s29 = sshll.u32 %s4331_s28, 4  ;;  %s4461_s0 = sadd.s32 4294967295, %s4329_s27   ;;  %s446_s29 = int_to_ptr.vmem [resolvable:$true] %s445_s29 }
  0x15   : > { %p3286_p0 = scmp.ge.s32.totalorder %s4329_s27, 1  ;;  %p5543_p1 = scmp.eq.s32.totalorder %s4461_s0, 0 }
  0x16   : > { %p429_p2 = scmp.lt.s32.totalorder %s4329_s27, 3  ;;  %s4332_s18 = smov [#allocation8]  }
  0x17   : > { %s473_s19 = sshll.u32 %s4332_s18, 4  ;;  %s4333_s1 = smov [#allocation11]   ;;  %s4473_s19 = int_to_ptr.vmem [resolvable:$true] %s473_s19 }
  0x18   : > { %p4466_p3 = pnand %p3286_p0, %p429_p2  ;;  %s497_s20 = sshll.u32 %s4333_s1, 4  ;;  %s4481_s20 = int_to_ptr.vmem [resolvable:$true] %s497_s20 }
  0x19   : > { %s4334_s22 = smov [#allocation7]   ;;  %s4080_s18 = scalar_lea.vmem %s446_s29, 16 }
  0x1a   : > { %s5559_s30 = scalar_select %p4466_p3, 1, 0 }
  0x1b   : > { %p3799_p5 = pneg %p4466_p3  ;;  %s4483_s23 = sshll.u32 %s4334_s22, 4  ;;  %s460_s23 = int_to_ptr.vmem [resolvable:$true] %s4483_s23 }
  0x1c   : > { %p4081_p8 = scmp.ne.s32.totalorder %s446_s29, %s4080_s18  ;;  %s4087_s1 = scalar_lea.vmem %s446_s29, 32 }
  0x1d   : > { %p4477_p6 = pnand %p3799_p5, %p5543_p1  ;;  %p4088_p11 = scmp.lt.s32.totalorder %s446_s29, %s446_s29 }
  0x1e   : > { %p4089_p12 = scmp.lt.s32.totalorder %s4087_s1, %s4080_s18 }
  0x1f   : > { %p4487_p7 = pneg %p4477_p6 }
  0x20   : > { %p4090_p13 = por %p4089_p12, %p4088_p11 }
  0x21   : > { %p4083_p9 = pnand %p4081_p8, %p4487_p7 }
  0x23   : > { %p4084_p10 = pneg %p4083_p9 }
  0x25   : > { %p4091_p0 = pnand %p4090_p13, %p4084_p10 }
  0x27   : > { %4094 = shalt.err (!%p4091_p0)
}
  0x28   : > { %s5562_s2 = sld [smem:[#allocation24_spill]]  ;;  %s4106_s16 = scalar_lea.vmem %s4473_s19, 16 }
  0x29   : > { %p4107_p2 = scmp.ne.s32.totalorder %s4473_s19, %s4106_s16  ;;  %s4113_s18 = scalar_lea.vmem %s4473_s19, 32 }
  0x2a   : > { %p4114_p9 = scmp.lt.s32.totalorder %s4473_s19, %s4473_s19  ;;  %p4115_p10 = scmp.lt.s32.totalorder %s4113_s18, %s4106_s16 }
  0x2b   : > { %p4109_p5 = pnand %p4107_p2, %p4487_p7 }
  0x2c   : > { %p4116_p11 = por %p4115_p10, %p4114_p9 }
  0x2d   : > { %p4110_p8 = pneg %p4109_p5 }
  0x2e   : > { %3802 = dma.hbm_to_vmem [thread:$0]  (!%p4477_p6), %s5562_s2, 16, %s446_s29, [#allocation6]  }
  0x2f   : > { %p4117_p12 = pnand %p4116_p11, %p4110_p8 }
  0x31   : > { %4120 = shalt.err (!%p4117_p12)
}
  0x32   : > { %s5563_s6 = sld [smem:[#allocation26_spill]]  ;;  %s4132_s29 = scalar_lea.vmem %s4481_s20, 16 }
  0x33   : > { %p4133_p13 = scmp.ne.s32.totalorder %s4481_s20, %s4132_s29  ;;  %s4139_s16 = scalar_lea.vmem %s4481_s20, 32 }
  0x34   : > { %p4140_p5 = scmp.lt.s32.totalorder %s4481_s20, %s4481_s20  ;;  %p4141_p8 = scmp.lt.s32.totalorder %s4139_s16, %s4132_s29 }
  0x35   : > { %p4135_p0 = pnand %p4133_p13, %p4487_p7 }
  0x36   : > { %p4142_p9 = por %p4141_p8, %p4140_p5 }
  0x37   : > { %p4136_p2 = pneg %p4135_p0 }
  0x38   : > { %3808 = dma.hbm_to_vmem [thread:$0]  (!%p4477_p6), %s5563_s6, 16, %s4473_s19, [#allocation9]  }
  0x39   : > { %p4143_p10 = pnand %p4142_p9, %p4136_p2 }
  0x3b   : > { %4146 = shalt.err (!%p4143_p10)
}
  0x3c   : > { %s5564_s8 = sld [smem:[#allocation28_spill]]  ;;  %s4335_s19 = smov [#allocation10]  }
  0x3d   : > { %s483_s17 = sshll.u32 %s4335_s19, 4  ;;  %s4158_s1 = scalar_lea.vmem %s460_s23, 16  ;;  %s484_s17 = int_to_ptr.vmem [resolvable:$true] %s483_s17 }
  0x3e   : > { %p4159_p11 = scmp.ne.s32.totalorder %s460_s23, %s4158_s1  ;;  %s4165_s29 = scalar_lea.vmem %s460_s23, 32 }
  0x3f   : > { %p4166_p0 = scmp.lt.s32.totalorder %s460_s23, %s460_s23  ;;  %p4167_p2 = scmp.lt.s32.totalorder %s4165_s29, %s4158_s1 }
  0x40   : > { %p4161_p12 = pnand %p4159_p11, %p4487_p7 }
  0x41   : > { %p4168_p5 = por %p4167_p2, %p4166_p0 }
  0x42   : > { %3814 = dma.hbm_to_vmem [thread:$0]  (!%p4477_p6), %s5564_s8, 16, %s4481_s20, [#allocation12]  }
  0x43   : > { %p4162_p13 = pneg %p4161_p12 }
  0x45   : > { %p4169_p8 = pnand %p4168_p5, %p4162_p13 }
  0x47   : > { %4172 = shalt.err (!%p4169_p8)
}
  0x48   : > { %s5565_s4 = sld [smem:[#allocation25_spill]]  ;;  %s4184_s20 = scalar_lea.vmem %s484_s17, 256 }
  0x49   : > { %p4185_p9 = scmp.ne.s32.totalorder %s484_s17, %s4184_s20  ;;  %p4192_p12 = scmp.lt.s32.totalorder %s484_s17, %s484_s17 }
  0x4a   : > { %p4193_p4 = scmp.lt.s32.totalorder %s4184_s20, %s4184_s20 }
  0x4b   : > { %p4187_p10 = pnand %p4185_p9, %p4487_p7 }
  0x4c   : > { %p4194_p1 = por %p4193_p4, %p4192_p12 }
  0x4d   : > { %p4188_p11 = pneg %p4187_p10 }
  0x4e   : > { %3805 = dma.hbm_to_vmem [thread:$0]  (!%p4477_p6), %s5565_s4, 16, %s460_s23, [#allocation6]  }
  0x4f   : > { %p4195_p3 = pnand %p4194_p1, %p4188_p11 }
  0x51   : > { %4198 = shalt.err (!%p4195_p3)
}
  0x52   : > { %s4336_s18 = smov 64   ;;  %s4337_s19 = smov 4  }
  0x53   : > { %s5566_s7 = sld [smem:[#allocation27_spill]]  ;;  %s4338_s23 = smov [#allocation13]  }
  0x54   : > { %s508_s16 = sshll.u32 %s4338_s23, 4  ;;  %s509_s16 = int_to_ptr.vmem [resolvable:$true] %s508_s16 }
  0x55   : > { %s4210_s22 = scalar_lea.vmem %s509_s16, 16  ;;  %s4217_s20 = scalar_lea.vmem %s509_s16, 32 }
  0x56   : > { %p4211_p13 = scmp.ne.s32.totalorder %s509_s16, %s4210_s22  ;;  %p4218_p1 = scmp.lt.s32.totalorder %s509_s16, %s509_s16 }
  0x57   : > { %p4219_p3 = scmp.lt.s32.totalorder %s4217_s20, %s4210_s22 }
  0x58   : > { %p4213_p0 = pnand %p4211_p13, %p4487_p7 }
  0x59   : > { %3811 = dma.hbm_to_vmem [thread:$0]  (!%p4477_p6), %s5566_s7, 256, %s484_s17, [#allocation9], %s4336_s18, %s4336_s18, %s4337_s19  }
  0x5a   : > { %p4214_p2 = pneg %p4213_p0  ;;  %p4220_p4 = por %p4219_p3, %p4218_p1 }
  0x5c   : > { %p4221_p5 = pnand %p4220_p4, %p4214_p2 }
  0x5e   : > { %4224 = shalt.err (!%p4221_p5)
}
  0x5f   : > { %s5567_s9 = sld [smem:[#allocation29_spill]]  ;;  %s3285_s28 = sadd.s32 4294967294, %s4329_s27  }
  0x60   : > { %s4548_s21 = sadd.s32 1, %s4329_s27   ;;  %s43_s4 = sadd.s32 1, %s4325_s26 }
  0x61   : > { %s40_s2 = ssub.s32 %s4329_s27, %s4548_s21  ;;  %p50_p8 = scmp.ne.s32.totalorder %s4325_s26, %s4321_s25 }
  0x62   : > { %p41_p7 = scmp.eq.s32.totalorder %s40_s2, 0  ;;  %p51_p9 = scmp.eq.s32.totalorder %s4329_s27, 0 }
  0x63   : > { %p56_p10 = scmp.ne.s32.totalorder %s4321_s25, %s4317_s24  ;;  %p5570_p12 = scmp.eq.s32.totalorder %s4461_s0, 0 }
  0x64   : > { %s4559_s17 = scalar_select %p41_p7, %s4325_s26, %s43_s4  }
  0x65   : > { %3817 = dma.hbm_to_vmem [thread:$0]  (!%p4477_p6), %s5567_s9, 16, %s509_s16, [#allocation12]  }
  0x66   : > { %5568 = sst [smem:[#allocation21_spill]] %s4559_s17  ;;  %p4561_p11 = por %p51_p9, %p50_p8 }
  0x67   : > { %p4567_p6 = por %p5570_p12, %p56_p10  ;;  %p416_p13 = scmp.eq.s32.totalorder %s4461_s0, 1 }
  0x68   : > { %p422_p0 = scmp.eq.s32.totalorder %s3285_s28, 1  ;;  %p3832_p2 = scmp.lt.s32.totalorder %s4329_s27, 2 }
  0x69   : > { %s5571_s19 = scalar_select %p4567_p6, 1, 0 }
  0x6a   : > { %s540_s1 = sand.u32 1, %s4325_s26   ;;  %p4574_p1 = por %p416_p13, %p50_p8 }
  0x6b   : > { %p4578_p3 = por %p422_p0, %p56_p10  ;;  %s3294_s16 = sshll.u32 %s540_s1, 6 }
  0x6c   : > { %s5572_s29 = scalar_select %p4574_p1, 1, 0 }
  0x6d   : > { %s5573_s23 = scalar_select %p4578_p3, 1, 0 }
  0x6e   : > { %s3295_s22 = sshll.u32 %s4329_s27, 7  ;;  %s5574_s4 = sld [smem:[#allocation22_spill]] }
  0x6f   : > { %s544_s28 = scalar_lea.vmem [#allocation2], %s3294_s16  ;;  %p4592_p4 = pnand %p3832_p2, %p4561_p11 }
  0x70   : > { %s550_s7 = sshll.u32 %s544_s28, 4  ;;  %s4596_s9 = scalar_lea.sflag [#allocation3], %s540_s1  ;;  %s4588_s7 = int_to_ptr.vmem [resolvable:$true] %s550_s7 }
  0x71   : > { %p4227_p7 = pneg %p4592_p4 }
  0x74   : > { %s4586_s6 = scalar_lea.hbm %s5574_s4, %s3295_s22  ;;  %s4230_s16 = scalar_lea.hbm %s5574_s4, 2048 }
  0x75   : > { %s4225_s17 = scalar_lea.hbm %s4586_s6, 1024  ;;  %p4231_p10 = scmp.lt.s32.totalorder %s4586_s6, %s5574_s4 }
  0x76   : > { %p4226_p5 = scmp.ne.s32.totalorder %s4586_s6, %s4225_s17  ;;  %p4232_p11 = scmp.lt.s32.totalorder %s4230_s16, %s4225_s17 }
  0x78   : > { %p4228_p8 = pnand %p4227_p7, %p4226_p5  ;;  %p4233_p12 = por %p4232_p11, %p4231_p10 }
  0x7a   : > { %p4229_p9 = pneg %p4228_p8 }
  0x7c   : > { %p4234_p13 = pnand %p4233_p12, %p4229_p9 }
  0x7e   : > { %4237 = shalt.err (!%p4234_p13)
}
  0x7f   : > { %s4238_s18 = scalar_lea.vmem %s4588_s7, 1024  ;;  %s4339_s1 = smov [#allocation2]  }
  0x80   : > { %p4239_p0 = scmp.ne.s32.totalorder %s4588_s7, %s4238_s18  ;;  %s4243_s26 = sshll.u32 %s4339_s1, 4  ;;  %s4244_s26 = int_to_ptr.vmem [resolvable:$false] %s4243_s26 }
  0x81   : > { %s4245_s22 = scalar_lea.vmem %s4244_s26, 2048  ;;  %p4246_p8 = scmp.lt.s32.totalorder %s4588_s7, %s4244_s26 }
  0x82   : > { %p4241_p2 = pnand %p4239_p0, %p4227_p7  ;;  %p4247_p3 = scmp.lt.s32.totalorder %s4245_s22, %s4238_s18 }
  0x84   : > { %p4242_p5 = pneg %p4241_p2  ;;  %p4248_p1 = por %p4247_p3, %p4246_p8 }
  0x86   : > { %p4249_p6 = pnand %p4248_p1, %p4242_p5 }
  0x88   : > { %4252 = shalt.err (!%p4249_p6)
}
  0x89   : > { %s4340_s17 = smov 256   ;;  %s4341_s20 = smov 128  }
  0x8a   : > { %s4342_s16 = smov 8   ;;  %p5576_p7 = scmp.ne.s32.totalorder %s5559_s30, 0 }
  0x8b   : > { %3821 = dma.hbm_to_vmem [thread:$0]  (!%p4592_p4), %s4586_s6, 1024, %s4588_s7, %s4596_s9, %s4340_s17, %s4341_s20, %s4342_s16  }
  0x8c   : > { %562 = sbr.rel (%p5576_p7) target bundleno = 4073 (0xfe9), region = 88  ;;  %s4620_s2 = sand.u32 (!%p5576_p7), 1, %s4321_s25  }
  0x8d   : > { %s3297_s26 = sshll.u32 (!%p5576_p7), %s4620_s2, 6  ;;  %s565_s28 = scalar_lea.sflag (!%p5576_p7), [#allocation3], %s4620_s2 }
  0x8e   : > { %s4626_s18 = scalar_lea.vmem (!%p5576_p7), [#allocation2], %s3297_s26  ;;  %p5577_p6 = scmp.ne.s32.totalorder (!%p5576_p7), %s5571_s19, 0 }
  0x91   : > { %4296 = dma.done.wait (%p5577_p6), %s565_s28, 1024  }
  0x92   : > { %4298 = vsyncadd (%p5577_p6), %s565_s28, 4294966272  ;;  %p5578_p1 = scmp.eq.s32.totalorder %s4461_s0, 0 }
  0x94   : > { %4300 = dma.done.wait (%p5578_p1), [#allocation6], 32   ;;  %p5579_p3 = pmov %p5578_p1 }
  0x95   : > { %p5580_p4 = pmov %p5578_p1 }
  0x96   : > { %4302 = vsyncadd (%p5579_p3), [#allocation6], 4294967264 }
  0x97   : > { %4304 = dma.done.wait (%p5580_p4), [#allocation9], 272   ;;  %p5581_p9 = pmov %p5578_p1 }
  0x98   : > { %p5582_p10 = pmov %p5578_p1 }
  0x99   : > { %4306 = vsyncadd (%p5581_p9), [#allocation9], 4294967024 }
  0x9a   : > { %4308 = dma.done.wait (%p5582_p10), [#allocation12], 32   ;;  %p5583_p11 = pmov %p5578_p1 }
  0x9b   : > { %vm654_vm0 = vcmask 261120   ;;  %v648_v0 = vld [vmem:[%s4626_s18 + $0x20] sm:$0xff]  ;;  %v650_v1 = vld [vmem:[%s4626_s18 + $0x30] sm:$0xff]  ;;  %v649_v2 = vld [vmem:[%s4626_s18 + $0x28] sm:$0xff]  ;;  %s5584_s8 = sld [smem:[#allocation23_spill]]  ;;  %vm1203_vm1 = vcmask 64512  }
  0x9c   : > { %4310 = vsyncadd (%p5583_p11), [#allocation12], 4294967264  ;;  %v667_v3 = vsel %vm654_vm0, %v648_v0, 0.0  ;;  %v673_v4 = vsel %vm654_vm0, %v650_v1, 0.0  ;;  %v651_v5 = vld [vmem:[%s4626_s18 + $0x38] sm:$0xff]  ;;  %v644_v6 = vld [vmem:[%s4626_s18] sm:$0xff] }
  0x9d   : > { %v645_v7 = vld [vmem:[%s4626_s18 + $0x8] sm:$0xff]  ;;  %668 = vadd.xlane.f32.xlu0 %v667_v3  ;;  %674 = vadd.xlane.f32.xlu1 %v673_v4  ;;  %v670_v8 = vsel %vm654_vm0, %v649_v2, 0.0  ;;  %v676_v9 = vsel %vm654_vm0, %v651_v5, 0.0  ;;  %v655_v10 = vsel %vm654_vm0, %v644_v6, 0.0  ;;  %v646_v12 = vld [vmem:[%s4626_s18 + $0x10] sm:$0xff]  ;;  %v647_v13 = vld [vmem:[%s4626_s18 + $0x18] sm:$0xff] }
  0x9e   : > { %v658_v11 = vsel %vm654_vm0, %v645_v7, 0.0  ;;  %v661_v14 = vsel %vm654_vm0, %v646_v12, 0.0  ;;  %v664_v15 = vsel %vm654_vm0, %v647_v13, 0.0  ;;  %v4709_v58 = vld [vmem:[%s5525_s3 + $0x8] sm:$0xff]   ;;  %vm1301_vm4 = vcmask 523264   ;;  %s4343_s30 = smov 120  }
  0x9f   : > { %v4715_v59 = vld [vmem:[%s5527_s5 + $0x8] sm:$0xff]   ;;  %vm1804_vm11 = vcmask 1043456   ;;  %s4344_s19 = smov 112   ;;  %s4345_s1 = smov 104  }
  0xa0   : > { %s5601_s9 = sld [smem:[#allocation30_spill]]  ;;  %p5603_p13 = scmp.ne.s32.totalorder %s5572_s29, 0 }
  0xa1   : > { %671 = vadd.xlane.f32.xlu0 %v670_v8  ;;  %677 = vadd.xlane.f32.xlu1 %v676_v9  ;;  %v3889_v56 = vld [vmem:[%s5584_s8 + $0x8] sm:$0xff]   ;;  %v3890_v57 = vld [vmem:[%s5584_s8] sm:$0xff]   ;;  %s5602_s22 = sld [smem:[#allocation31_spill]]  ;;  %s4346_s16 = smov [#allocation14]  }
  0xa2   : > { %3747 = vmatprep.subr.bf16.mxu1 %v3889_v56  ;;  %3515 = vmatprep.subr.bf16.mxu0 %v3889_v56  ;;  %s4257_s28 = sshll.u32 %s4346_s16, 4  ;;  %s4258_s28 = int_to_ptr.vmem [resolvable:$false] %s4257_s28 }
  0xa3   : > { %3749 = vmatpush3.bf16.msra.mxu1 %v3889_v56  ;;  %3516 = vmatpush3.bf16.msra.mxu0 %v3889_v56  ;;  %s4259_s6 = scalar_lea.vmem %s4258_s28, 2048 }
  0xa4   : > { %3748 = vmatprep.subr.bf16.mxu1 %v3890_v57  ;;  %3517 = vmatprep.subr.bf16.mxu0 %v3890_v57 }
  0xa5   : > { %656 = vadd.xlane.f32.xlu0 %v655_v10  ;;  %659 = vadd.xlane.f32.xlu1 %v658_v11 }
  0xa7   : > { %3750 = vmatpush3.bf16.msra.mxu1 %v3890_v57  ;;  %3518 = vmatpush3.bf16.msra.mxu0 %v3890_v57 }
  0xa8   : > { %3527 = vmatprep.subr.bf16.mxu1 %v4709_v58  ;;  %3539 = vmatprep.subr.bf16.mxu0 %v4715_v59 }
  0xa9   : > { %662 = vadd.xlane.f32.xlu0 %v661_v14  ;;  %665 = vadd.xlane.f32.xlu1 %v664_v15 }
 0x126   : > { %v669_v16 = vpop.xlane.xlu0 %668  ;;  %v675_v17 = vpop.xlane.xlu1 %674 }
 0x127   : > { %v684_v18 = vmul.f32 0.03125, %v669_v16  ;;  %v686_v19 = vmul.f32 0.03125, %v675_v17 }
 0x129   : > { %v4660_v20 = vsub.f32 %v648_v0, %v684_v18  ;;  %v4662_v21 = vsub.f32 %v650_v1, %v686_v19 }
 0x12a   : > { %v672_v22 = vpop.xlane.xlu0 %671  ;;  %v678_v23 = vpop.xlane.xlu1 %677 }
 0x12b   : > { %v685_v24 = vmul.f32 0.03125, %v672_v22  ;;  %v687_v25 = vmul.f32 0.03125, %v678_v23  ;;  %v700_v26 = vmul.f32 %v4660_v20, %v4660_v20  ;;  %v702_v27 = vmul.f32 %v4662_v21, %v4662_v21 }
 0x12d   : > { %v4668_v28 = vsub.f32 %v649_v2, %v685_v24  ;;  %v4670_v29 = vsub.f32 %v651_v5, %v687_v25  ;;  %v716_v30 = vsel %vm654_vm0, %v700_v26, 0.0  ;;  %v722_v33 = vsel %vm654_vm0, %v702_v27, 0.0  ;;  %v3305_v24 = vld [vmem:[#allocation13] ss:$0 sm:$0xff] }
 0x12e   : > { %717 = vadd.xlane.f32.xlu0 %v716_v30  ;;  %v657_v31 = vpop.xlane.xlu0 %656  ;;  %v660_v32 = vpop.xlane.xlu1 %659 }
 0x12f   : > { %v680_v34 = vmul.f32 0.03125, %v657_v31  ;;  %v701_v35 = vmul.f32 %v4668_v28, %v4668_v28  ;;  %v681_v36 = vmul.f32 0.03125, %v660_v32  ;;  %v703_v37 = vmul.f32 %v4670_v29, %v4670_v29  ;;  %v3306_v31 = vld [vmem:[%s5532_s10] ss:$0 sm:$0xff] }
 0x131   : > { %v4678_v38 = vsub.f32 %v644_v6, %v680_v34  ;;  %v719_v39 = vsel %vm654_vm0, %v701_v35, 0.0  ;;  %v4681_v40 = vsub.f32 %v645_v7, %v681_v36  ;;  %v725_v42 = vsel %vm654_vm0, %v703_v37, 0.0 }
 0x132   : > { %720 = vadd.xlane.f32.xlu1 %v719_v39  ;;  %723 = vadd.xlane.f32.xlu0 %v722_v33  ;;  %v663_v41 = vpop.xlane.xlu0 %662  ;;  %v666_v43 = vpop.xlane.xlu1 %665 }
 0x133   : > { %v682_v44 = vmul.f32 0.03125, %v663_v41  ;;  %v683_v45 = vmul.f32 0.03125, %v666_v43  ;;  %v696_v46 = vmul.f32 %v4678_v38, %v4678_v38  ;;  %v697_v47 = vmul.f32 %v4681_v40, %v4681_v40 }
 0x135   : > { %v4688_v48 = vsub.f32 %v646_v12, %v682_v44  ;;  %v4690_v49 = vsub.f32 %v647_v13, %v683_v45  ;;  %v704_v50 = vsel %vm654_vm0, %v696_v46, 0.0  ;;  %v707_v51 = vsel %vm654_vm0, %v697_v47, 0.0 }
 0x136   : > { %726 = vadd.xlane.f32.xlu1 %v725_v42  ;;  %705 = vadd.xlane.f32.xlu0 %v704_v50 }
 0x137   : > { %v698_v52 = vmul.f32 %v4688_v48, %v4688_v48  ;;  %v699_v53 = vmul.f32 %v4690_v49, %v4690_v49 }
 0x139   : > { %v710_v54 = vsel %vm654_vm0, %v698_v52, 0.0  ;;  %v713_v55 = vsel %vm654_vm0, %v699_v53, 0.0 }
 0x13a   : > { %708 = vadd.xlane.f32.xlu1 %v707_v51  ;;  %711 = vadd.xlane.f32.xlu0 %v710_v54 }
 0x13e   : > { %714 = vadd.xlane.f32.xlu1 %v713_v55 }
 0x1b7   : > { %v718_v60 = vpop.xlane.xlu0 %717 }
 0x1b8   : > { %v732_v61 = vmul.f32 0.03125, %v718_v60 }
 0x1ba   : > { %v740_v62 = vadd.f32 1e-05, %v732_v61 }
 0x1bb   : > { %v721_v63 = vpop.xlane.xlu1 %720  ;;  %v724_v0 = vpop.xlane.xlu0 %723 }
 0x1bc   : > { %3901 = vrsqrt.f32 %v740_v62  ;;  %v733_v1 = vmul.f32 0.03125, %v721_v63  ;;  %v734_v2 = vmul.f32 0.03125, %v724_v0  ;;  %v3894_v62 = vld [vmem:[%s5527_s5] sm:$0xff]  }
 0x1be   : > { %v741_v3 = vadd.f32 1e-05, %v733_v1  ;;  %v742_v4 = vadd.f32 1e-05, %v734_v2 }
 0x1bf   : > { %v727_v5 = vpop.xlane.xlu1 %726  ;;  %v706_v6 = vpop.xlane.xlu0 %705 }
 0x1c0   : > { %3903 = vrsqrt.f32 %v741_v3  ;;  %v735_v7 = vmul.f32 0.03125, %v727_v5  ;;  %v728_v8 = vmul.f32 0.03125, %v706_v6  ;;  %v4761_v6 = vld [vmem:[#allocation5] ss:$0 sm:$0xff] }
 0x1c1   : > { %3905 = vrsqrt.f32 %v742_v4 }
 0x1c2   : > { %v743_v9 = vadd.f32 1e-05, %v735_v7  ;;  %v736_v10 = vadd.f32 1e-05, %v728_v8 }
 0x1c3   : > { %v709_v11 = vpop.xlane.xlu1 %708  ;;  %v712_v12 = vpop.xlane.xlu0 %711 }
 0x1c4   : > { %3907 = vrsqrt.f32 %v743_v9  ;;  %v729_v13 = vmul.f32 0.03125, %v709_v11  ;;  %v730_v14 = vmul.f32 0.03125, %v712_v12 }
 0x1c5   : > { %3909 = vrsqrt.f32 %v736_v10 }
 0x1c6   : > { %v737_v15 = vadd.f32 1e-05, %v729_v13  ;;  %v738_v16 = vadd.f32 1e-05, %v730_v14 }
 0x1c7   : > { %v715_v17 = vpop.xlane.xlu1 %714 }
 0x1c8   : > { %3911 = vrsqrt.f32 %v737_v15  ;;  %v731_v18 = vmul.f32 0.03125, %v715_v17 }
 0x1c9   : > { %v3902_v19 = vpop.eup %3901  ;;  %3913 = vrsqrt.f32 %v738_v16  ;;  %v3314_v16 = vld [vmem:[#allocation7] ss:$0 sm:$0xff] }
 0x1ca   : > { %v739_v22 = vadd.f32 1e-05, %v731_v18  ;;  %v756_v23 = vmul.f32 %v3902_v19, %v4660_v20 }
 0x1cc   : > { %3915 = vrsqrt.f32 %v739_v22  ;;  %v770_v30 = vmul.f32 %v3305_v24, %v756_v23 }
 0x1cd   : > { %v3904_v25 = vpop.eup %3903 }
 0x1ce   : > { %v3906_v26 = vpop.eup %3905  ;;  %v757_v27 = vmul.f32 %v3904_v25, %v4668_v28  ;;  %v784_v36 = vadd.f32 %v3306_v31, %v770_v30 }
 0x1cf   : > { %v758_v32 = vmul.f32 %v3906_v26, %v4662_v21 }
 0x1d0   : > { %v771_v33 = vmul.f32 %v3305_v24, %v757_v27 }
 0x1d1   : > { %v3908_v34 = vpop.eup %3907  ;;  %v772_v39 = vmul.f32 %v3305_v24, %v758_v32 }
 0x1d2   : > { %v3910_v35 = vpop.eup %3909  ;;  %v785_v37 = vadd.f32 %v3306_v31, %v771_v33  ;;  %v759_v20 = vmul.f32 %v3908_v34, %v4670_v29  ;;  %v3892_v29 = vld [vmem:[%s5525_s3] sm:$0xff]  }
 0x1d3   : > { %v752_v41 = vmul.f32 %v3910_v35, %v4678_v38  ;;  %v786_v45 = vadd.f32 %v3306_v31, %v772_v39  ;;  %v3321_v34 = vld [vmem:[#allocation8] ss:$0 sm:$0xff] }
 0x1d4   : > { %v794_v42 = vpack.c.bf16 %v785_v37, %v784_v36  ;;  %v773_v43 = vmul.f32 %v3305_v24, %v759_v20 }
 0x1d5   : > { %v3912_v28 = vpop.eup %3911  ;;  %v766_v47 = vmul.f32 %v3305_v24, %v752_v41 }
 0x1d6   : > { %v3914_v44 = vpop.eup %3913  ;;  %3523 = vmatprep.mubr.msk.bf16.mxu1 %vm654_vm0, %v794_v42  ;;  %v787_v46 = vadd.f32 %v3306_v31, %v773_v43  ;;  %v753_v21 = vmul.f32 %v3912_v28, %v4681_v40 }
 0x1d7   : > { %v754_v50 = vmul.f32 %v3914_v44, %v4688_v48  ;;  %v780_v53 = vadd.f32 %v3306_v31, %v766_v47 }
 0x1d8   : > { %v795_v51 = vpack.c.bf16 %v787_v46, %v786_v45  ;;  %v767_v52 = vmul.f32 %v3305_v24, %v753_v21 }
 0x1d9   : > { %v3916_v38 = vpop.eup %3915  ;;  %v768_v56 = vmul.f32 %v3305_v24, %v754_v50 }
 0x1da   : > { %3524 = vmatmul.mubr.msk.bf16.vlgmr.msra.gmra.mxu1 %vm654_vm0, %v795_v51  ;;  %v781_v54 = vadd.f32 %v3306_v31, %v767_v52  ;;  %v755_v55 = vmul.f32 %v3916_v38, %v4690_v49 }
 0x1db   : > { %3528 = vmatpush3.bf16.msra.mxu1 %v4709_v58  ;;  %v782_v48 = vadd.f32 %v3306_v31, %v768_v56 }
 0x1dc   : > { %v792_v40 = vpack.c.bf16 %v781_v54, %v780_v53  ;;  %3529 = vmatprep.subr.bf16.mxu1 %v3892_v29  ;;  %v769_v57 = vmul.f32 %v3305_v24, %v755_v55 }
 0x1de   : > { %3519 = vmatprep.mubr.msk.bf16.mxu0 %vm654_vm0, %v792_v40  ;;  %3531 = vmatprep.mubr.msk.bf16.mxu1 %vm654_vm0, %v792_v40  ;;  %v783_v60 = vadd.f32 %v3306_v31, %v769_v57 }
 0x1df   : > { %3530 = vmatpush3.bf16.msra.mxu1 %v3892_v29 }
 0x1e0   : > { %v793_v61 = vpack.c.bf16 %v783_v60, %v782_v48 }
 0x1e2   : > { %3520 = vmatmul.mubr.msk.bf16.vlgmr.msra.gmra.mxu0 %vm654_vm0, %v793_v61  ;;  %3532 = vmatmul.mubr.msk.bf16.vlgmr.msra.gmra.mxu1 %vm654_vm0, %v793_v61 }
 0x1e3   : > { %3535 = vmatprep.mubr.msk.bf16.mxu1 %vm654_vm0, %v794_v42  ;;  %3540 = vmatpush3.bf16.msra.mxu0 %v4715_v59 }
 0x1e4   : > { %3543 = vmatprep.mubr.msk.bf16.mxu0 %vm654_vm0, %v792_v40  ;;  %3541 = vmatprep.subr.bf16.mxu0 %v3894_v62 }
 0x1e7   : > { %3542 = vmatpush3.bf16.msra.mxu0 %v3894_v62 }
 0x1ea   : > { %3536 = vmatmul.mubr.msk.bf16.gmra.mxu1 %vm654_vm0, %v795_v51  ;;  %3544 = vmatmul.mubr.msk.bf16.vlgmr.msra.gmra.mxu0 %vm654_vm0, %v793_v61 }
 0x1eb   : > { %3547 = vmatprep.mubr.msk.bf16.mxu0 %vm654_vm0, %v794_v42 }
 0x1f2   : > { %3548 = vmatmul.mubr.msk.bf16.gmra.mxu0 %vm654_vm0, %v795_v51 }
 0x29a   : > { %v4749_v49 = vpop.f32.mrf.mxu1 }
 0x29c   : > { %v4751_v58 = vpop.f32.mrf.mxu1 }
 0x29d   : > { %v878_v60 = vadd.f32 %v4761_v6, %v4751_v58  ;;  %v1068_v58 = vlaneseq }
 0x29e   : > { %v4753_v63 = vpop.f32.mrf.mxu1 }
 0x2a0   : > { %v4755_v0 = vpop.f32.mrf.mxu1 }
 0x2a1   : > { %v881_v57 = vadd.f32 %v4761_v6, %v4755_v0  ;;  %v886_v0 = vadd.f32 %v4749_v49, %v4761_v6 }
 0x2a2   : > { %v4757_v59 = vpop.f32.mrf.mxu0  ;;  %v3533_v1 = vpop.f32.mrf.mxu1 }
 0x2a3   : > { %v958_v41 = vadd.f32 %v3533_v1, %v3314_v16  ;;  %v870_v48 = vadd.f32 %v4757_v59, %v4761_v6  ;;  %v4819_v62 = vpack.c.bf16 %v881_v57, %v878_v60  ;;  %v889_v1 = vadd.f32 %v4753_v63, %v4761_v6 }
 0x2a4   : > { %v861_v2 = vpop.f32.mrf.mxu0  ;;  %v949_v3 = vpop.f32.mrf.mxu1 }
 0x2a5   : > { %v862_v9 = vadd.f32 %v4761_v6, %v861_v2  ;;  %v950_v29 = vadd.f32 %v3314_v16, %v949_v3  ;;  %v4829_v59 = vpack.c.bf16 %v889_v1, %v886_v0  ;;  %v1069_v2 = vshrl.u32 %v1068_v58, 7 }
 0x2a6   : > { %v4759_v4 = vpop.f32.mrf.mxu0  ;;  %v3534_v5 = vpop.f32.mrf.mxu1 }
 0x2a7   : > { %v961_v36 = vadd.f32 %v3534_v5, %v3314_v16  ;;  %v873_v40 = vadd.f32 %v4759_v4, %v4761_v6  ;;  %v1071_v3 = vadd.s32 16, %v1069_v2  ;;  %v1174_v4 = vand.u32 127, %v1068_v58 }
 0x2a8   : > { %v864_v7 = vpop.f32.mrf.mxu0  ;;  %v952_v8 = vpop.f32.mrf.mxu1  ;;  %v1081_v5 = vand.u32 7, %v1069_v2 }
 0x2a9   : > { %v865_v10 = vadd.f32 %v4761_v6, %v864_v7  ;;  %v4781_v44 = vpack.c.bf16 %v961_v36, %v958_v41  ;;  %v953_v50 = vadd.f32 %v3314_v16, %v952_v8  ;;  %v4817_v61 = vpack.c.bf16 %v873_v40, %v870_v48 }
 0x2aa   : > { %v3537_v11 = vpop.f32.mrf.mxu1  ;;  %v3545_v12 = vpop.f32.mrf.mxu0  ;;  %v1070_v7 = vadd.s32 8, %v1069_v2  ;;  %v1095_v8 = vand.u32 7, %v1071_v3  ;;  %v1073_v6 = vadd.s32 32, %v1069_v2 }
 0x2ab   : > { %v4765_v13 = vpack.c.bf16 %v865_v10, %v862_v9  ;;  %v974_v19 = vadd.f32 %v3537_v11, %v3314_v16  ;;  %v1046_v47 = vadd.f32 %v3545_v12, %v3321_v34  ;;  %v4796_v53 = vpack.c.bf16 %v953_v50, %v950_v29 }
 0x2ac   : > { %v965_v14 = vpop.f32.mrf.mxu1  ;;  %v1037_v15 = vpop.f32.mrf.mxu0  ;;  %v1220_v55 = vsel %vm1203_vm1, %v4781_v44, 0  ;;  %v1179_v9 = vand.u32 7, %v1174_v4  ;;  %v1072_v10 = vadd.s32 24, %v1069_v2  ;;  %v1088_v49 = vand.u32 7, %v1070_v7 }
 0x2ad   : > { %3559 = vmatprep.mubr.msk.bf16.mxu1 %vm1203_vm1, %v4765_v13  ;;  %v966_v25 = vadd.f32 %v3314_v16, %v965_v14  ;;  %v1038_v38 = vadd.f32 %v3321_v34, %v1037_v15  ;;  %v1217_v56 = vsel %vm1203_vm1, %v4796_v53, 0 }
 0x2ae   : > { %v3538_v17 = vpop.f32.mrf.mxu1  ;;  %v3546_v18 = vpop.f32.mrf.mxu0  ;;  %vm4833_vm2 = vcmp.eq.s32.totalorder %v1081_v5, %v1179_v9  ;;  %vm4837_vm3 = vcmp.eq.s32.totalorder %v1095_v8, %v1179_v9  ;;  %v1102_v15 = vand.u32 7, %v1072_v10  ;;  %vm4844_vm5 = vcmp.eq.s32.totalorder %v1088_v49, %v1179_v9 }
 0x2af   : > { %v977_v22 = vadd.f32 %v3538_v17, %v3314_v16  ;;  %v1049_v45 = vadd.f32 %v3546_v18, %v3321_v34 }
 0x2b0   : > { %v968_v23 = vpop.f32.mrf.mxu1  ;;  %v1040_v24 = vpop.f32.mrf.mxu0  ;;  %vm4850_vm6 = vcmp.eq.s32.totalorder %v1102_v15, %v1179_v9 }
 0x2b1   : > { %v4769_v26 = vpack.c.bf16 %v977_v22, %v974_v19  ;;  %v969_v27 = vadd.f32 %v3314_v16, %v968_v23  ;;  %v4792_v51 = vpack.c.bf16 %v1049_v45, %v1046_v47  ;;  %v1041_v52 = vadd.f32 %v3321_v34, %v1040_v24 }
 0x2b2   : > { %v3549_v30 = vpop.f32.mrf.mxu0  ;;  %v1075_v16 = vadd.s32 48, %v1069_v2  ;;  %v1109_v23 = vand.u32 7, %v1073_v6  ;;  %v1074_v24 = vadd.s32 40, %v1069_v2 }
 0x2b3   : > { %v4771_v31 = vpack.c.bf16 %v969_v27, %v966_v25  ;;  %3751 = vmatprep.subr.msk.bf16.mxu1 %vm1203_vm1, %v4769_v26  ;;  %v1226_v32 = vsel %vm1203_vm1, %v4769_v26, 0  ;;  %v1062_v37 = vadd.f32 %v3549_v30, %v3321_v34  ;;  %v4798_v54 = vpack.c.bf16 %v1041_v52, %v1038_v38 }
 0x2b4   : > { %v1053_v33 = vpop.f32.mrf.mxu0  ;;  %3552 = vmatpush3.bf16.xpose.msra.mxu1 %v1226_v32  ;;  %v1123_v32 = vand.u32 7, %v1075_v16  ;;  %vm4858_vm7 = vcmp.eq.s32.totalorder %v1109_v23, %v1179_v9 }
 0x2b5   : > { %3752 = vmatprep.subr.msk.bf16.mxu1 %vm1203_vm1, %v4771_v31  ;;  %v1054_v42 = vadd.f32 %v3321_v34, %v1053_v33  ;;  %v1223_v21 = vsel %vm1203_vm1, %v4771_v31, 0  ;;  %v1076_v33 = vadd.s32 56, %v1069_v2 }
 0x2b6   : > { %v3550_v35 = vpop.f32.mrf.mxu0  ;;  %vm4864_vm8 = vcmp.eq.s32.totalorder %v1123_v32, %v1179_v9 }
 0x2b7   : > { %v1065_v20 = vadd.f32 %v3550_v35, %v3321_v34  ;;  %v1130_v45 = vand.u32 7, %v1076_v33 }
 0x2b8   : > { %v1056_v39 = vpop.f32.mrf.mxu0 }
 0x2b9   : > { %v4779_v43 = vpack.c.bf16 %v1065_v20, %v1062_v37  ;;  %v1057_v28 = vadd.f32 %v3321_v34, %v1056_v39  ;;  %v1116_v39 = vand.u32 7, %v1074_v24  ;;  %vm4878_vm10 = vcmp.eq.s32.totalorder %v1130_v45, %v1179_v9 }
 0x2bb   : > { %v4783_v46 = vpack.c.bf16 %v1057_v28, %v1054_v42  ;;  %3567 = vmatprep.subr.bf16.mxu0 %v4779_v43  ;;  %vm4872_vm9 = vcmp.eq.s32.totalorder %v1116_v39, %v1179_v9 }
 0x2bc   : > { %3554 = vmatpush3.bf16.xpose.msra.mxu1 %v1223_v21  ;;  %3568 = vmatpush3.bf16.msra.mxu0 %v4779_v43 }
 0x2bd   : > { %3753 = vmatprep.subr.msk.bf16.mxu1 %vm1203_vm1, %v4781_v44  ;;  %3569 = vmatprep.subr.bf16.mxu0 %v4783_v46 }
 0x2c0   : > { %3570 = vmatpush3.bf16.msra.mxu0 %v4783_v46 }
 0x2c1   : > { %3571 = vmatprep.subr.bf16.mxu0 %v4792_v51 }
 0x2c4   : > { %3556 = vmatpush3.bf16.xpose.msra.mxu1 %v1220_v55  ;;  %3572 = vmatpush3.bf16.msra.mxu0 %v4792_v51 }
 0x2c5   : > { %3754 = vmatprep.subr.msk.bf16.mxu1 %vm1203_vm1, %v4796_v53  ;;  %3573 = vmatprep.subr.bf16.mxu0 %v4798_v54 }
 0x2c8   : > { %3574 = vmatpush3.bf16.msra.mxu0 %v4798_v54 }
 0x2cc   : > { %3558 = vmatpush3.bf16.xpose.msra.mxu1 %v1217_v56 }
 0x2d3   : > { %3560 = vmatmul.mubr.msk.bf16.vlgmr.msra.gmra.mxu1 %vm1203_vm1, %v4817_v61 }
 0x2d4   : > { %3563 = vmatprep.mubr.msk.bf16.mxu1 %vm1203_vm1, %v4819_v62 }
 0x2db   : > { %3564 = vmatmul.mubr.msk.bf16.gmra.mxu1 %vm1203_vm1, %v4829_v59 }
 0x393   : > { %v3561_v11 = vpop.f32.mrf.mxu1 }
 0x394   : > { %v1295_v25 = vsel %vm4837_vm3, %v3561_v11, -inf }
 0x395   : > { %v1262_v14 = vpop.f32.mrf.mxu1  ;;  %v1308_v36 = vsel %vm1301_vm4, %v1295_v25, -inf }
 0x396   : > { %v1293_v17 = vsel %vm4833_vm2, %v1262_v14, -inf }
 0x397   : > { %v3562_v18 = vpop.f32.mrf.mxu1  ;;  %v1302_v19 = vsel %vm1301_vm4, %v1293_v17, -inf }
 0x398   : > { %1303 = vmax.xlane.f32.xlu0 %v1302_v19  ;;  %v1296_v41 = vsel %vm4850_vm6, %v3562_v18, -inf }
 0x399   : > { %v1265_v30 = vpop.f32.mrf.mxu1  ;;  %v1311_v50 = vsel %vm1301_vm4, %v1296_v41, -inf }
 0x39a   : > { %v1294_v34 = vsel %vm4844_vm5, %v1265_v30, -inf }
 0x39b   : > { %v3565_v35 = vpop.f32.mrf.mxu1  ;;  %v1305_v37 = vsel %vm1301_vm4, %v1294_v34, -inf }
 0x39c   : > { %1309 = vmax.xlane.f32.xlu0 %v1308_v36  ;;  %1306 = vmax.xlane.f32.xlu1 %v1305_v37  ;;  %v1299_v38 = vsel %vm4864_vm8, %v3565_v35, -inf }
 0x39d   : > { %v1278_v28 = vpop.f32.mrf.mxu1  ;;  %v1320_v57 = vsel %vm1301_vm4, %v1299_v38, -inf }
 0x39e   : > { %v1297_v21 = vsel %vm4858_vm7, %v1278_v28, -inf }
 0x39f   : > { %v3566_v47 = vpop.f32.mrf.mxu1  ;;  %v1314_v52 = vsel %vm1301_vm4, %v1297_v21, -inf }
 0x3a0   : > { %1312 = vmax.xlane.f32.xlu1 %v1311_v50  ;;  %1315 = vmax.xlane.f32.xlu0 %v1314_v52  ;;  %v1300_v60 = vsel %vm4878_vm10, %v3566_v47, -inf }
 0x3a1   : > { %v1281_v56 = vpop.f32.mrf.mxu1  ;;  %v1323_v1 = vsel %vm1301_vm4, %v1300_v60, -inf }
 0x3a2   : > { %v1298_v40 = vsel %vm4872_vm9, %v1281_v56, -inf }
 0x3a3   : > { %v1317_v48 = vsel %vm1301_vm4, %v1298_v40, -inf }
 0x3a4   : > { %1321 = vmax.xlane.f32.xlu0 %v1320_v57  ;;  %1318 = vmax.xlane.f32.xlu1 %v1317_v48 }
 0x3a8   : > { %1324 = vmax.xlane.f32.xlu1 %v1323_v1 }
 0x421   : > { %v1304_v0 = vpop.xlane.xlu0 %1303 }
 0x422   : > { %v1326_v58 = vsub.f32 %v1293_v17, %v1304_v0 }
 0x424   : > { %v1334_v5 = vmul.f32 1.442695, %v1326_v58 }
 0x425   : > { %v1310_v2 = vpop.xlane.xlu0 %1309  ;;  %v1307_v3 = vpop.xlane.xlu1 %1306 }
 0x426   : > { %v1328_v4 = vsub.f32 %v1295_v25, %v1310_v2  ;;  %v1327_v8 = vsub.f32 %v1294_v34, %v1307_v3 }
 0x428   : > { %v1338_v7 = vmul.f32 1.442695, %v1328_v4  ;;  %v1336_v49 = vmul.f32 1.442695, %v1327_v8 }
 0x429   : > { %v1313_v9 = vpop.xlane.xlu1 %1312  ;;  %v1316_v10 = vpop.xlane.xlu0 %1315 }
 0x42a   : > { %3917 = vpow2.f32 %v1338_v7  ;;  %v1329_v11 = vsub.f32 %v1296_v41, %v1313_v9  ;;  %v1330_v14 = vsub.f32 %v1297_v21, %v1316_v10 }
 0x42b   : > { %3919 = vpow2.f32 %v1334_v5 }
 0x42c   : > { %v1340_v6 = vmul.f32 1.442695, %v1329_v11  ;;  %v1342_v18 = vmul.f32 1.442695, %v1330_v14 }
 0x42d   : > { %v1322_v15 = vpop.xlane.xlu0 %1321  ;;  %v1319_v41 = vpop.xlane.xlu1 %1318 }
 0x42e   : > { %3921 = vpow2.f32 %v1340_v6  ;;  %v1332_v16 = vsub.f32 %v1299_v38, %v1322_v15  ;;  %v1331_v21 = vsub.f32 %v1298_v40, %v1319_v41 }
 0x42f   : > { %3923 = vpow2.f32 %v1336_v49 }
 0x430   : > { %v1346_v17 = vmul.f32 1.442695, %v1332_v16  ;;  %v1344_v50 = vmul.f32 1.442695, %v1331_v21 }
 0x431   : > { %v1325_v28 = vpop.xlane.xlu1 %1324 }
 0x432   : > { %3925 = vpow2.f32 %v1346_v17  ;;  %v1333_v45 = vsub.f32 %v1300_v60, %v1325_v28 }
 0x433   : > { %3927 = vpow2.f32 %v1342_v18 }
 0x434   : > { %v1348_v47 = vmul.f32 1.442695, %v1333_v45 }
 0x436   : > { %3929 = vpow2.f32 %v1348_v47 }
 0x437   : > { %v3918_v19 = vpop.eup %3917  ;;  %3931 = vpow2.f32 %v1344_v50 }
 0x438   : > { %v1356_v23 = vsel %vm1301_vm4, %v3918_v19, 0.0  ;;  %v3920_v24 = vpop.eup %3919 }
 0x439   : > { %1357 = vadd.xlane.f32.xlu0 %v1356_v23  ;;  %v1350_v30 = vsel %vm1301_vm4, %v3920_v24, 0.0 }
 0x43b   : > { %v3922_v25 = vpop.eup %3921 }
 0x43c   : > { %v1359_v32 = vsel %vm1301_vm4, %v3922_v25, 0.0  ;;  %v3924_v33 = vpop.eup %3923 }
 0x43d   : > { %1351 = vadd.xlane.f32.xlu0 %v1350_v30  ;;  %1360 = vadd.xlane.f32.xlu1 %v1359_v32  ;;  %v1353_v36 = vsel %vm1301_vm4, %v3924_v33, 0.0 }
 0x43f   : > { %v4892_v34 = vpop.eup %3925 }
 0x440   : > { %v1368_v35 = vsel %vm1301_vm4, %v4892_v34, 0.0  ;;  %v4897_v37 = vpop.eup %3927 }
 0x441   : > { %1369 = vadd.xlane.f32.xlu0 %v1368_v35  ;;  %1354 = vadd.xlane.f32.xlu1 %v1353_v36  ;;  %v1362_v39 = vsel %vm1301_vm4, %v4897_v37, 0.0 }
 0x443   : > { %v3930_v52 = vpop.eup %3929 }
 0x444   : > { %v1371_v38 = vsel %vm1301_vm4, %v3930_v52, 0.0  ;;  %v3932_v56 = vpop.eup %3931 }
 0x445   : > { %1363 = vadd.xlane.f32.xlu0 %v1362_v39  ;;  %v1365_v57 = vsel %vm1301_vm4, %v3932_v56, 0.0 }
 0x452   : > { %1500 = vrot.lane.b32.xlu1 %v4771_v31, %s4343_s30 }
 0x456   : > { %1498 = vrot.lane.b32.xlu1 %v4781_v44, %s4343_s30 }
 0x45b   : > { %1502 = vrot.lane.b32.xlu0 %v4769_v26, %s4343_s30 }
 0x45f   : > { %1484 = vrot.lane.b32.xlu0 %v4765_v13, %s4343_s30 }
 0x463   : > { %1488 = vrot.lane.b32.xlu0 %v4819_v62, %s4343_s30 }
 0x47a   : > { %1372 = vadd.xlane.f32.xlu1 %v1371_v38 }
 0x47e   : > { %1366 = vadd.xlane.f32.xlu1 %v1365_v57 }
 0x48f   : > { %1496 = vrot.lane.b32.xlu1 %v4796_v53, %s4343_s30 }
 0x493   : > { %1486 = vrot.lane.b32.xlu1 %v4817_v61, %s4343_s30 }
 0x497   : > { %1490 = vrot.lane.b32.xlu1 %v4829_v59, %s4343_s30 }
 0x4c2   : > { %v1358_v40 = vpop.xlane.xlu0 %1357 }
 0x4c6   : > { %v1352_v48 = vpop.xlane.xlu0 %1351  ;;  %v1361_v60 = vpop.xlane.xlu1 %1360 }
 0x4c7   : > { %3933 = vrcp.f32 %v1361_v60 }
 0x4c8   : > { %3935 = vrcp.f32 %v1352_v48 }
 0x4c9   : > { %3937 = vrcp.f32 %v1358_v40 }
 0x4ca   : > { %v1370_v1 = vpop.xlane.xlu0 %1369  ;;  %v1355_v0 = vpop.xlane.xlu1 %1354 }
 0x4cb   : > { %3939 = vrcp.f32 %v1355_v0 }
 0x4ce   : > { %v1364_v58 = vpop.xlane.xlu0 %1363  ;;  %v1501_v15 = vpop.permute.xlu1 %1500 }
 0x4cf   : > { %v1523_v16 = vsel %vm1203_vm1, %v1501_v15, 0 }
 0x4d2   : > { %v1503_v2 = vpop.permute.xlu0 %1502  ;;  %v1499_v18 = vpop.permute.xlu1 %1498 }
 0x4d3   : > { %3755 = vmatprep.subr.msk.bf16.mxu0 %vm1203_vm1, %v1503_v2  ;;  %v1526_v14 = vsel %vm1203_vm1, %v1503_v2, 0  ;;  %v1520_v17 = vsel %vm1203_vm1, %v1499_v18, 0 }
 0x4d4   : > { %v3934_v3 = vpop.eup %3933 }
 0x4d5   : > { %v3936_v4 = vpop.eup %3935  ;;  %v1385_v8 = vmul.f32 %v3934_v3, %v3922_v25 }
 0x4d6   : > { %v3938_v5 = vpop.eup %3937  ;;  %v1382_v9 = vmul.f32 %v3936_v4, %v3920_v24  ;;  %v1485_v47 = vpop.permute.xlu0 %1484 }
 0x4d7   : > { %v1384_v11 = vmul.f32 %v3938_v5, %v3918_v19 }
 0x4d8   : > { %v3940_v7 = vpop.eup %3939 }
 0x4d9   : > { %v1383_v10 = vmul.f32 %v3940_v7, %v3924_v33  ;;  %v1391_v6 = vpack.c.bf16 %v1385_v8, %v1384_v11 }
 0x4da   : > { %v1489_v38 = vpop.permute.xlu0 %1488 }
 0x4db   : > { %v1390_v49 = vpack.c.bf16 %v1383_v10, %v1382_v9 }
 0x4dd   : > { %3575 = vmatprep.mubr.msk.bf16.mxu0 %vm1301_vm4, %v1390_v49 }
 0x4de   : > { %3576 = vmatmul.mubr.msk.bf16.vlgmr.msra.gmra.mxu0 %vm1301_vm4, %v1391_v6 }
 0x4df   : > { %3584 = vmatpush3.bf16.xpose.msra.mxu0 %v1526_v14 }
 0x4e0   : > { %3756 = vmatprep.subr.msk.bf16.mxu0 %vm1203_vm1, %v1501_v15 }
 0x4e7   : > { %3586 = vmatpush3.bf16.xpose.msra.mxu0 %v1523_v16 }
 0x4e8   : > { %3757 = vmatprep.subr.msk.bf16.mxu0 %vm1203_vm1, %v1499_v18 }
 0x4ef   : > { %3588 = vmatpush3.bf16.xpose.msra.mxu0 %v1520_v17 }
 0x503   : > { %v1373_v19 = vpop.xlane.xlu1 %1372 }
 0x504   : > { %3941 = vrcp.f32 %v1373_v19 }
 0x505   : > { %3943 = vrcp.f32 %v1364_v58 }
 0x506   : > { %3945 = vrcp.f32 %v1370_v1 }
 0x507   : > { %v1367_v23 = vpop.xlane.xlu1 %1366 }
 0x508   : > { %3947 = vrcp.f32 %v1367_v23 }
 0x50b   : > { %v1497_v24 = vpop.permute.xlu1 %1496 }
 0x50c   : > { %v1517_v25 = vsel %vm1203_vm1, %v1497_v24, 0  ;;  %3758 = vmatprep.subr.msk.bf16.mxu0 %vm1203_vm1, %v1497_v24 }
 0x50d   : > { %3590 = vmatpush3.bf16.xpose.msra.mxu0 %v1517_v25 }
 0x50f   : > { %v1487_v50 = vpop.permute.xlu1 %1486 }
 0x511   : > { %v3942_v30 = vpop.eup %3941 }
 0x512   : > { %v3944_v32 = vpop.eup %3943  ;;  %v1389_v36 = vmul.f32 %v3942_v30, %v3930_v52  ;;  %v1475_v52 = vld [vmem:[#allocation10] sm:$0xf] }
 0x513   : > { %v3946_v33 = vpop.eup %3945  ;;  %v1386_v39 = vmul.f32 %v3944_v32, %v4897_v37  ;;  %3760 = vmatprep.subr.msk.bf16.mxu0 %vm1804_vm11, %v1475_v52  ;;  %v1491_v37 = vpop.permute.xlu1 %1490 }
 0x514   : > { %v1388_v28 = vmul.f32 %v3946_v33, %v4892_v34  ;;  %v1886_v34 = vsel %vm1804_vm11, %v1475_v52, 0 }
 0x515   : > { %v3948_v35 = vpop.eup %3947 }
 0x516   : > { %v1387_v41 = vmul.f32 %v3948_v35, %v3932_v56  ;;  %v1393_v21 = vpack.c.bf16 %v1389_v36, %v1388_v28 }
 0x518   : > { %v1392_v45 = vpack.c.bf16 %v1387_v41, %v1386_v39 }
 0x51a   : > { %3579 = vmatprep.mubr.msk.bf16.mxu0 %vm1301_vm4, %v1392_v45 }
 0x51b   : > { %3580 = vmatmul.mubr.msk.bf16.gmra.mxu0 %vm1301_vm4, %v1393_v21 }
 0x51c   : > { %3591 = vmatprep.mubr.msk.bf16.mxu0 %vm1203_vm1, %v1485_v47 }
 0x523   : > { %3592 = vmatmul.mubr.msk.bf16.vlgmr.msra.gmra.mxu0 %vm1203_vm1, %v1487_v50 }
 0x524   : > { %3595 = vmatprep.mubr.msk.bf16.mxu0 %vm1203_vm1, %v1489_v38  ;;  %3626 = vmatpush3.bf16.msra.mxu0 %v1886_v34 }
 0x52b   : > { %3596 = vmatmul.mubr.msk.bf16.gmra.mxu0 %vm1203_vm1, %v1491_v37 }
 0x59e   : > { %v3577_v56 = vpop.f32.mrf.mxu0 }
 0x5a0   : > { %v1444_v57 = vpop.f32.mrf.mxu0 }
 0x5a2   : > { %v3578_v40 = vpop.f32.mrf.mxu0 }
 0x5a3   : > { %v1477_v1 = vpack.c.bf16 %v3578_v40, %v3577_v56 }
 0x5a4   : > { %v1447_v48 = vpop.f32.mrf.mxu0 }
 0x5a5   : > { %v1476_v60 = vpack.c.bf16 %v1447_v48, %v1444_v57 }
 0x5a7   : > { %3627 = vmatprep.mubr.msk.bf16.mxu0 %vm1203_vm1, %v1476_v60 }
 0x5a8   : > { %3628 = vmatmul.mubr.msk.bf16.vlgmr.msra.gmra.mxu0 %vm1203_vm1, %v1477_v1 }
 0x5db   : > { %v3581_v0 = vpop.f32.mrf.mxu0 }
 0x5dd   : > { %v1460_v58 = vpop.f32.mrf.mxu0 }
 0x5df   : > { %v3582_v2 = vpop.f32.mrf.mxu0 }
 0x5e0   : > { %v1479_v5 = vpack.c.bf16 %v3582_v2, %v3581_v0 }
 0x5e1   : > { %v1463_v3 = vpop.f32.mrf.mxu0 }
 0x5e2   : > { %v1478_v4 = vpack.c.bf16 %v1463_v3, %v1460_v58 }
 0x5e3   : > { %v3593_v7 = vpop.f32.mrf.mxu0 }
 0x5e4   : > { %3631 = vmatprep.mubr.msk.bf16.mxu0 %vm1203_vm1, %v1478_v4  ;;  %v1595_v49 = vsel %vm4837_vm3, %v3593_v7, -inf }
 0x5e5   : > { %v1562_v8 = vpop.f32.mrf.mxu0  ;;  %3632 = vmatmul.mubr.msk.bf16.gmra.mxu0 %vm1203_vm1, %v1479_v5  ;;  %v1607_v16 = vsel %vm1301_vm4, %v1595_v49, -inf }
 0x5e6   : > { %v1593_v9 = vsel %vm4833_vm2, %v1562_v8, -inf }
 0x5e7   : > { %v3594_v10 = vpop.f32.mrf.mxu0  ;;  %v1601_v11 = vsel %vm1301_vm4, %v1593_v9, -inf }
 0x5e8   : > { %1602 = vmax.xlane.f32.xlu0 %v1601_v11  ;;  %v1596_v17 = vsel %vm4850_vm6, %v3594_v10, -inf }
 0x5e9   : > { %v1565_v6 = vpop.f32.mrf.mxu0  ;;  %v1610_v24 = vsel %vm1301_vm4, %v1596_v17, -inf }
 0x5ea   : > { %v1594_v14 = vsel %vm4844_vm5, %v1565_v6, -inf }
 0x5eb   : > { %v3597_v15 = vpop.f32.mrf.mxu0  ;;  %v1604_v18 = vsel %vm1301_vm4, %v1594_v14, -inf }
 0x5ec   : > { %1608 = vmax.xlane.f32.xlu0 %v1607_v16  ;;  %1605 = vmax.xlane.f32.xlu1 %v1604_v18  ;;  %v1599_v25 = vsel %vm4864_vm8, %v3597_v15, -inf }
 0x5ed   : > { %v1578_v19 = vpop.f32.mrf.mxu0  ;;  %v1619_v36 = vsel %vm1301_vm4, %v1599_v25, -inf }
 0x5ee   : > { %v1597_v39 = vsel %vm4858_vm7, %v1578_v19, -inf }
 0x5ef   : > { %v3598_v23 = vpop.f32.mrf.mxu0  ;;  %v1613_v28 = vsel %vm1301_vm4, %v1597_v39, -inf }
 0x5f0   : > { %v1600_v30 = vsel %vm4878_vm10, %v3598_v23, -inf  ;;  %1611 = vmax.xlane.f32.xlu0 %v1610_v24 }
 0x5f1   : > { %v1581_v32 = vpop.f32.mrf.mxu0  ;;  %v1622_v33 = vsel %vm1301_vm4, %v1600_v30, -inf }
 0x5f2   : > { %v1598_v35 = vsel %vm4872_vm9, %v1581_v32, -inf  ;;  %1623 = vmax.xlane.f32.xlu1 %v1622_v33 }
 0x5f3   : > { %v1616_v41 = vsel %vm1301_vm4, %v1598_v35, -inf }
 0x5f4   : > { %1620 = vmax.xlane.f32.xlu0 %v1619_v36 }
 0x5f6   : > { %1617 = vmax.xlane.f32.xlu1 %v1616_v41 }
 0x5f8   : > { %1614 = vmax.xlane.f32.xlu0 %v1613_v28 }
 0x607   : > { %1701 = vrot.lane.b32.xlu1 %v4783_v46, %s4343_s30 }
 0x60e   : > { %1703 = vrot.lane.b32.xlu0 %v4779_v43, %s4343_s30 }
 0x671   : > { %v1603_v45 = vpop.xlane.xlu0 %1602 }
 0x672   : > { %v1625_v21 = vsub.f32 %v1593_v9, %v1603_v45 }
 0x674   : > { %v1633_v52 = vmul.f32 1.442695, %v1625_v21 }
 0x675   : > { %v1609_v47 = vpop.xlane.xlu0 %1608  ;;  %v1606_v50 = vpop.xlane.xlu1 %1605 }
 0x676   : > { %v1627_v38 = vsub.f32 %v1595_v49, %v1609_v47  ;;  %v1626_v37 = vsub.f32 %v1594_v14, %v1606_v50 }
 0x678   : > { %v1637_v34 = vmul.f32 1.442695, %v1627_v38  ;;  %v1635_v48 = vmul.f32 1.442695, %v1626_v37 }
 0x679   : > { %v1612_v56 = vpop.xlane.xlu0 %1611 }
 0x67a   : > { %3949 = vpow2.f32 %v1637_v34  ;;  %v1628_v57 = vsub.f32 %v1596_v17, %v1612_v56  ;;  %v1787_v56 = vld [vmem:[#allocation10 + $0x4] sm:$0xf] }
 0x67b   : > { %v1624_v40 = vpop.xlane.xlu1 %1623  ;;  %3951 = vpow2.f32 %v1633_v52 }
 0x67c   : > { %v1639_v60 = vmul.f32 1.442695, %v1628_v57  ;;  %v1632_v7 = vsub.f32 %v1600_v30, %v1624_v40 }
 0x67d   : > { %v1621_v1 = vpop.xlane.xlu0 %1620 }
 0x67e   : > { %3953 = vpow2.f32 %v1639_v60  ;;  %v1631_v58 = vsub.f32 %v1599_v25, %v1621_v1  ;;  %v1647_v6 = vmul.f32 1.442695, %v1632_v7  ;;  %v1806_v1 = vsel %vm1804_vm11, %v1787_v56, 0 }
 0x67f   : > { %v1618_v0 = vpop.xlane.xlu1 %1617  ;;  %3955 = vpow2.f32 %v1635_v48 }
 0x680   : > { %v1630_v2 = vsub.f32 %v1598_v35, %v1618_v0  ;;  %v1645_v8 = vmul.f32 1.442695, %v1631_v58 }
 0x681   : > { %v1615_v3 = vpop.xlane.xlu0 %1614 }
 0x682   : > { %v1643_v4 = vmul.f32 1.442695, %v1630_v2  ;;  %v1629_v5 = vsub.f32 %v1597_v39, %v1615_v3 }
 0x683   : > { %v1702_v49 = vpop.permute.xlu1 %1701 }
 0x684   : > { %3957 = vpow2.f32 %v1643_v4  ;;  %v1641_v9 = vmul.f32 1.442695, %v1629_v5 }
 0x685   : > { %v1704_v10 = vpop.permute.xlu0 %1703 }
 0x686   : > { %3959 = vpow2.f32 %v1641_v9  ;;  %3599 = vmatprep.subr.bf16.mxu1 %v1704_v10 }
 0x687   : > { %v4971_v11 = vpop.eup %3949  ;;  %3600 = vmatpush3.bf16.msra.mxu1 %v1704_v10  ;;  %3961 = vpow2.f32 %v1645_v8 }
 0x688   : > { %3601 = vmatprep.subr.bf16.mxu1 %v1702_v49  ;;  %v1655_v14 = vsel %vm1301_vm4, %v4971_v11, 0.0  ;;  %v4975_v15 = vpop.eup %3951  ;;  %3963 = vpow2.f32 %v1647_v6 }
 0x689   : > { %1656 = vadd.xlane.f32.xlu0 %v1655_v14  ;;  %v1649_v18 = vsel %vm1301_vm4, %v4975_v15, 0.0 }
 0x68b   : > { %v4977_v16 = vpop.eup %3953  ;;  %3602 = vmatpush3.bf16.msra.mxu1 %v1702_v49 }
 0x68c   : > { %v1658_v17 = vsel %vm1301_vm4, %v4977_v16, 0.0  ;;  %v3956_v19 = vpop.eup %3955 }
 0x68d   : > { %1650 = vadd.xlane.f32.xlu0 %v1649_v18  ;;  %1659 = vadd.xlane.f32.xlu1 %v1658_v17  ;;  %v1652_v23 = vsel %vm1301_vm4, %v3956_v19, 0.0 }
 0x691   : > { %v4984_v24 = vpop.eup %3957  ;;  %1653 = vadd.xlane.f32.xlu1 %v1652_v23 }
 0x692   : > { %v1664_v25 = vsel %vm1301_vm4, %v4984_v24, 0.0 }
 0x693   : > { %v4988_v30 = vpop.eup %3959  ;;  %1665 = vadd.xlane.f32.xlu0 %v1664_v25 }
 0x694   : > { %v1661_v32 = vsel %vm1301_vm4, %v4988_v30, 0.0  ;;  %v4992_v33 = vpop.eup %3961 }
 0x695   : > { %1662 = vadd.xlane.f32.xlu1 %v1661_v32  ;;  %v1667_v35 = vsel %vm1301_vm4, %v4992_v33, 0.0  ;;  %v4996_v36 = vpop.eup %3963 }
 0x696   : > { %v1670_v39 = vsel %vm1301_vm4, %v4996_v36, 0.0 }
 0x699   : > { %1668 = vadd.xlane.f32.xlu1 %v1667_v35 }
 0x69d   : > { %1671 = vadd.xlane.f32.xlu1 %v1670_v39 }
 0x6a9   : > { %1699 = vrot.lane.b32.xlu0 %v4792_v51, %s4343_s30 }
 0x6ad   : > { %1967 = vrot.lane.b32.xlu0 %v4769_v26, %s4344_s19 }
 0x6ae   : > { %1697 = vrot.lane.b32.xlu1 %v4798_v54, %s4343_s30  ;;  %s642_s30 = scalar_lea.vmem [#allocation14], %s3297_s26 }
 0x6af   : > { %s3155_s26 = sshll.u32 %s642_s30, 4  ;;  %s5470_s26 = int_to_ptr.vmem [resolvable:$true] %s3155_s26 }
 0x6b0   : > { %s4253_s20 = scalar_lea.vmem %s5470_s26, 1024  ;;  %p4260_p5 = scmp.lt.s32.totalorder %s5470_s26, %s4258_s28 }
 0x6b1   : > { %1963 = vrot.lane.b32.xlu0 %v4781_v44, %s4344_s19  ;;  %p4254_p12 = scmp.ne.s32.totalorder %s5470_s26, %s4253_s20  ;;  %p4261_p8 = scmp.lt.s32.totalorder %s4259_s6, %s4253_s20 }
 0x6b2   : > { %1965 = vrot.lane.b32.xlu1 %v4771_v31, %s4344_s19 }
 0x6b3   : > { %p4255_p0 = pnand %p4254_p12, %p5603_p13  ;;  %p4262_p7 = por %p4261_p8, %p4260_p5 }
 0x6b5   : > { %1953 = vrot.lane.b32.xlu0 %v4765_v13, %s4344_s19  ;;  %p4256_p2 = pneg %p4255_p0 }
 0x6b6   : > { %1961 = vrot.lane.b32.xlu1 %v4796_v53, %s4344_s19 }
 0x6b7   : > { %p4263_p6 = pnand %p4262_p7, %p4256_p2 }
 0x6b9   : > { %1957 = vrot.lane.b32.xlu0 %v4819_v62, %s4344_s19 }
 0x6ba   : > { %1955 = vrot.lane.b32.xlu1 %v4817_v61, %s4344_s19 }
 0x6bd   : > { %2355 = vrot.lane.b32.xlu0 %v4769_v26, %s4345_s1 }
 0x6be   : > { %1959 = vrot.lane.b32.xlu1 %v4829_v59, %s4344_s19 }
 0x6c1   : > { %2351 = vrot.lane.b32.xlu0 %v4781_v44, %s4345_s1 }
 0x6c2   : > { %2353 = vrot.lane.b32.xlu1 %v4771_v31, %s4345_s1 }
 0x6c5   : > { %2341 = vrot.lane.b32.xlu0 %v4765_v13, %s4345_s1 }
 0x6c6   : > { %2349 = vrot.lane.b32.xlu1 %v4796_v53, %s4345_s1 }
 0x6c9   : > { %2345 = vrot.lane.b32.xlu0 %v4819_v62, %s4345_s1 }
 0x6ca   : > { %2343 = vrot.lane.b32.xlu1 %v4817_v61, %s4345_s1 }
 0x6ce   : > { %2347 = vrot.lane.b32.xlu1 %v4829_v59, %s4345_s1 }
 0x712   : > { %v1657_v26 = vpop.xlane.xlu0 %1656 }
 0x716   : > { %v1651_v44 = vpop.xlane.xlu0 %1650  ;;  %v1660_v41 = vpop.xlane.xlu1 %1659 }
 0x717   : > { %3965 = vrcp.f32 %v1651_v44 }
 0x718   : > { %3967 = vrcp.f32 %v1660_v41 }
 0x719   : > { %3969 = vrcp.f32 %v1657_v26 }
 0x71a   : > { %v1654_v31 = vpop.xlane.xlu1 %1653 }
 0x71b   : > { %3971 = vrcp.f32 %v1654_v31 }
 0x71c   : > { %v1666_v13 = vpop.xlane.xlu0 %1665 }
 0x71d   : > { %3973 = vrcp.f32 %v1666_v13 }
 0x71e   : > { %v1663_v53 = vpop.xlane.xlu1 %1662 }
 0x71f   : > { %3975 = vrcp.f32 %v1663_v53 }
 0x720   : > { %v1700_v28 = vpop.permute.xlu0 %1699 }
 0x721   : > { %3603 = vmatprep.subr.bf16.mxu1 %v1700_v28 }
 0x722   : > { %3604 = vmatpush3.bf16.msra.mxu1 %v1700_v28  ;;  %v1669_v62 = vpop.xlane.xlu1 %1668 }
 0x723   : > { %3977 = vrcp.f32 %v1669_v62 }
 0x724   : > { %v3966_v61 = vpop.eup %3965  ;;  %v1968_v3 = vpop.permute.xlu0 %1967 }
 0x725   : > { %v3968_v45 = vpop.eup %3967  ;;  %v1681_v38 = vmul.f32 %v3966_v61, %v4975_v15 }
 0x726   : > { %v1672_v59 = vpop.xlane.xlu1 %1671  ;;  %v3970_v21 = vpop.eup %3969  ;;  %v1684_v50 = vmul.f32 %v3968_v45, %v4977_v16  ;;  %v1991_v16 = vsel %vm1203_vm1, %v1968_v3, 0 }
 0x727   : > { %3979 = vrcp.f32 %v1672_v59  ;;  %v1683_v57 = vmul.f32 %v3970_v21, %v4971_v11 }
 0x728   : > { %v3972_v47 = vpop.eup %3971  ;;  %v1964_v23 = vpop.permute.xlu0 %1963 }
 0x729   : > { %v1682_v52 = vmul.f32 %v3972_v47, %v3956_v19  ;;  %v1690_v60 = vpack.c.bf16 %v1684_v50, %v1683_v57  ;;  %v1985_v39 = vsel %vm1203_vm1, %v1964_v23, 0 }
 0x72a   : > { %v3974_v34 = vpop.eup %3973  ;;  %v1698_v37 = vpop.permute.xlu1 %1697 }
 0x72b   : > { %3605 = vmatprep.subr.bf16.mxu1 %v1698_v37  ;;  %v1689_v40 = vpack.c.bf16 %v1682_v52, %v1681_v38  ;;  %v1686_v58 = vmul.f32 %v3974_v34, %v4984_v24 }
 0x72c   : > { %v3976_v48 = vpop.eup %3975  ;;  %3606 = vmatpush3.bf16.msra.mxu1 %v1698_v37  ;;  %v1954_v35 = vpop.permute.xlu0 %1953 }
 0x72d   : > { %3607 = vmatprep.mubr.msk.bf16.mxu1 %vm1301_vm4, %v1689_v40  ;;  %3759 = vmatprep.subr.msk.bf16.mxu1 %vm1804_vm11, %v1787_v56  ;;  %v1685_v0 = vmul.f32 %v3976_v48, %v4988_v30 }
 0x72e   : > { %v1966_v17 = vpop.permute.xlu1 %1965 }
 0x72f   : > { %3608 = vmatmul.mubr.msk.bf16.vlgmr.msra.gmra.mxu1 %vm1301_vm4, %v1690_v60  ;;  %v1691_v2 = vpack.c.bf16 %v1686_v58, %v1685_v0  ;;  %v1988_v32 = vsel %vm1203_vm1, %v1966_v17, 0 }
 0x730   : > { %3616 = vmatpush3.bf16.msra.mxu1 %v1806_v1  ;;  %v3978_v4 = vpop.eup %3977  ;;  %v1958_v26 = vpop.permute.xlu0 %1957 }
 0x731   : > { %3611 = vmatprep.mubr.msk.bf16.mxu1 %vm1301_vm4, %v1691_v2  ;;  %3761 = vmatprep.subr.msk.bf16.mxu1 %vm1203_vm1, %v1968_v3  ;;  %v1687_v7 = vmul.f32 %v3978_v4, %v4992_v33 }
 0x734   : > { %v3980_v5 = vpop.eup %3979  ;;  %v2356_v31 = vpop.permute.xlu0 %2355 }
 0x735   : > { %v1688_v8 = vmul.f32 %v3980_v5, %v4996_v36  ;;  %v1962_v36 = vpop.permute.xlu1 %1961  ;;  %v2379_v53 = vsel %vm1203_vm1, %v2356_v31, 0 }
 0x736   : > { %v1982_v41 = vsel %vm1203_vm1, %v1962_v36, 0 }
 0x737   : > { %v1692_v9 = vpack.c.bf16 %v1688_v8, %v1687_v7 }
 0x738   : > { %v2352_v62 = vpop.permute.xlu0 %2351 }
 0x739   : > { %3612 = vmatmul.mubr.msk.bf16.gmra.mxu1 %vm1301_vm4, %v1692_v9  ;;  %v1956_v44 = vpop.permute.xlu1 %1955  ;;  %v2373_v59 = vsel %vm1203_vm1, %v2352_v62, 0 }
 0x73c   : > { %v2342_v61 = vpop.permute.xlu0 %2341 }
 0x73d   : > { %v1960_v13 = vpop.permute.xlu1 %1959 }
 0x740   : > { %v2346_v38 = vpop.permute.xlu0 %2345 }
 0x741   : > { %v2354_v28 = vpop.permute.xlu1 %2353 }
 0x742   : > { %v2376_v45 = vsel %vm1203_vm1, %v2354_v28, 0 }
 0x745   : > { %v2350_v21 = vpop.permute.xlu1 %2349 }
 0x746   : > { %v2370_v47 = vsel %vm1203_vm1, %v2350_v21, 0 }
 0x749   : > { %v2344_v50 = vpop.permute.xlu1 %2343 }
 0x74d   : > { %v2348_v52 = vpop.permute.xlu1 %2347 }
 0x7ef   : > { %v3609_v10 = vpop.f32.mrf.mxu1 }
 0x7f1   : > { %v1755_v11 = vpop.f32.mrf.mxu1 }
 0x7f3   : > { %v3610_v49 = vpop.f32.mrf.mxu1 }
 0x7f4   : > { %v1789_v15 = vpack.c.bf16 %v3610_v49, %v3609_v10 }
 0x7f5   : > { %v1758_v6 = vpop.f32.mrf.mxu1 }
 0x7f6   : > { %v1788_v14 = vpack.c.bf16 %v1758_v6, %v1755_v11 }
 0x7f8   : > { %3617 = vmatprep.mubr.msk.bf16.mxu1 %vm1203_vm1, %v1788_v14 }
 0x7f9   : > { %v3613_v18 = vpop.f32.mrf.mxu1  ;;  %3618 = vmatmul.mubr.msk.bf16.vlgmr.msra.gmra.mxu1 %vm1203_vm1, %v1789_v15 }
 0x7fa   : > { %3636 = vmatpush3.bf16.xpose.msra.mxu1 %v1991_v16 }
 0x7fb   : > { %3762 = vmatprep.subr.msk.bf16.mxu1 %vm1203_vm1, %v1966_v17  ;;  %v1771_v19 = vpop.f32.mrf.mxu1 }
 0x7fd   : > { %v3614_v24 = vpop.f32.mrf.mxu1 }
 0x7fe   : > { %v1791_v33 = vpack.c.bf16 %v3614_v24, %v3613_v18 }
 0x7ff   : > { %v1774_v25 = vpop.f32.mrf.mxu1 }
 0x800   : > { %v1790_v30 = vpack.c.bf16 %v1774_v25, %v1771_v19 }
 0x802   : > { %3638 = vmatpush3.bf16.xpose.msra.mxu1 %v1988_v32  ;;  %3621 = vmatprep.mubr.msk.bf16.mxu1 %vm1203_vm1, %v1790_v30 }
 0x803   : > { %3763 = vmatprep.subr.msk.bf16.mxu1 %vm1203_vm1, %v1964_v23  ;;  %3622 = vmatmul.mubr.msk.bf16.gmra.mxu1 %vm1203_vm1, %v1791_v33 }
 0x804   : > { %3643 = vmatprep.mubr.msk.bf16.mxu1 %vm1203_vm1, %v1954_v35 }
 0x80a   : > { %3640 = vmatpush3.bf16.xpose.msra.mxu1 %v1985_v39 }
 0x80b   : > { %3764 = vmatprep.subr.msk.bf16.mxu1 %vm1203_vm1, %v1962_v36 }
 0x812   : > { %3642 = vmatpush3.bf16.xpose.msra.mxu1 %v1982_v41 }
 0x813   : > { %3766 = vmatprep.subr.msk.bf16.mxu1 %vm1203_vm1, %v2356_v31 }
 0x819   : > { %3644 = vmatmul.mubr.msk.bf16.vlgmr.msra.gmra.mxu1 %vm1203_vm1, %v1956_v44 }
 0x81a   : > { %3647 = vmatprep.mubr.msk.bf16.mxu1 %vm1203_vm1, %v1958_v26  ;;  %3678 = vmatpush3.bf16.xpose.msra.mxu1 %v2379_v53 }
 0x81b   : > { %3767 = vmatprep.subr.msk.bf16.mxu1 %vm1203_vm1, %v2354_v28 }
 0x821   : > { %3648 = vmatmul.mubr.msk.bf16.gmra.mxu1 %vm1203_vm1, %v1960_v13 }
 0x822   : > { %3680 = vmatpush3.bf16.xpose.msra.mxu1 %v2376_v45  ;;  %3685 = vmatprep.mubr.msk.bf16.mxu1 %vm1203_vm1, %v2342_v61 }
 0x823   : > { %3768 = vmatprep.subr.msk.bf16.mxu1 %vm1203_vm1, %v2352_v62 }
 0x82a   : > { %3682 = vmatpush3.bf16.xpose.msra.mxu1 %v2373_v59 }
 0x82b   : > { %3769 = vmatprep.subr.msk.bf16.mxu1 %vm1203_vm1, %v2350_v21 }
 0x832   : > { %3684 = vmatpush3.bf16.xpose.msra.mxu1 %v2370_v47 }
 0x839   : > { %3686 = vmatmul.mubr.msk.bf16.vlgmr.msra.gmra.mxu1 %vm1203_vm1, %v2344_v50 }
 0x83a   : > { %3689 = vmatprep.mubr.msk.bf16.mxu1 %vm1203_vm1, %v2346_v38 }
 0x841   : > { %3690 = vmatmul.mubr.msk.bf16.gmra.mxu1 %vm1203_vm1, %v2348_v52 }
 0x8b9   : > { %v5077_v34 = vpop.f32.mrf.mxu1 }
 0x8bb   : > { %v5079_v37 = vpop.f32.mrf.mxu1 }
 0x8bd   : > { %v5081_v56 = vpop.f32.mrf.mxu1 }
 0x8bf   : > { %v5083_v57 = vpop.f32.mrf.mxu1 }
 0x8c3   : > { %v5085_v40 = vpop.f32.mrf.mxu1 }
 0x8c5   : > { %v5087_v48 = vpop.f32.mrf.mxu1 }
 0x8c7   : > { %v5089_v60 = vpop.f32.mrf.mxu1 }
 0x8c9   : > { %v5091_v1 = vpop.f32.mrf.mxu1 }
 0x8d9   : > { %v3645_v0 = vpop.f32.mrf.mxu1 }
 0x8da   : > { %v2060_v5 = vsel %vm4837_vm3, %v3645_v0, -inf }
 0x8db   : > { %v2027_v58 = vpop.f32.mrf.mxu1  ;;  %v2072_v10 = vsel %vm1301_vm4, %v2060_v5, -inf }
 0x8dc   : > { %v2058_v2 = vsel %vm4833_vm2, %v2027_v58, -inf }
 0x8dd   : > { %v3646_v3 = vpop.f32.mrf.mxu1  ;;  %v2066_v4 = vsel %vm1301_vm4, %v2058_v2, -inf }
 0x8de   : > { %2067 = vmax.xlane.f32.xlu0 %v2066_v4  ;;  %v2061_v49 = vsel %vm4850_vm6, %v3646_v3, -inf }
 0x8df   : > { %v2030_v7 = vpop.f32.mrf.mxu1  ;;  %v2075_v15 = vsel %vm1301_vm4, %v2061_v49, -inf }
 0x8e0   : > { %v2059_v8 = vsel %vm4844_vm5, %v2030_v7, -inf }
 0x8e1   : > { %v3649_v9 = vpop.f32.mrf.mxu1  ;;  %v2069_v11 = vsel %vm1301_vm4, %v2059_v8, -inf }
 0x8e2   : > { %2073 = vmax.xlane.f32.xlu0 %v2072_v10  ;;  %2070 = vmax.xlane.f32.xlu1 %v2069_v11  ;;  %v2064_v24 = vsel %vm4864_vm8, %v3649_v9, -inf }
 0x8e3   : > { %v2043_v6 = vpop.f32.mrf.mxu1  ;;  %v2084_v30 = vsel %vm1301_vm4, %v2064_v24, -inf }
 0x8e4   : > { %v2062_v16 = vsel %vm4858_vm7, %v2043_v6, -inf }
 0x8e5   : > { %v3650_v14 = vpop.f32.mrf.mxu1  ;;  %v2078_v19 = vsel %vm1301_vm4, %v2062_v16, -inf }
 0x8e6   : > { %2076 = vmax.xlane.f32.xlu0 %v2075_v15  ;;  %v2065_v25 = vsel %vm4878_vm10, %v3650_v14, -inf }
 0x8e7   : > { %v2046_v18 = vpop.f32.mrf.mxu1  ;;  %v2087_v32 = vsel %vm1301_vm4, %v2065_v25, -inf }
 0x8e8   : > { %v2063_v17 = vsel %vm4872_vm9, %v2046_v18, -inf }
 0x8e9   : > { %v2081_v23 = vsel %vm1301_vm4, %v2063_v17, -inf }
 0x8ea   : > { %2079 = vmax.xlane.f32.xlu0 %v2078_v19  ;;  %2082 = vmax.xlane.f32.xlu1 %v2081_v23 }
 0x8ee   : > { %2085 = vmax.xlane.f32.xlu0 %v2084_v30  ;;  %2088 = vmax.xlane.f32.xlu1 %v2087_v32 }
 0x8f9   : > { %v3687_v18 = vpop.f32.mrf.mxu1 }
 0x8fb   : > { %v2415_v19 = vpop.f32.mrf.mxu1 }
 0x967   : > { %v2068_v33 = vpop.xlane.xlu0 %2067 }
 0x968   : > { %v2090_v35 = vsub.f32 %v2058_v2, %v2068_v33  ;;  %v5155_v33 = vsel %vm4833_vm2, %v2415_v19, -inf }
 0x96a   : > { %v2098_v44 = vmul.f32 1.442695, %v2090_v35 }
 0x96b   : > { %v2074_v36 = vpop.xlane.xlu0 %2073  ;;  %v2071_v39 = vpop.xlane.xlu1 %2070 }
 0x96c   : > { %v2092_v26 = vsub.f32 %v2060_v5, %v2074_v36  ;;  %v2091_v31 = vsub.f32 %v2059_v8, %v2071_v39  ;;  %v5163_v36 = vsel %vm4837_vm3, %v3687_v18, -inf }
 0x96d   : > { %v2460_v63 = vsel %vm1301_vm4, %v5163_v36, -inf }
 0x96e   : > { %v2102_v41 = vmul.f32 1.442695, %v2092_v26  ;;  %v2100_v28 = vmul.f32 1.442695, %v2091_v31 }
 0x96f   : > { %v2077_v13 = vpop.xlane.xlu0 %2076 }
 0x970   : > { %3981 = vpow2.f32 %v2102_v41  ;;  %v2093_v53 = vsub.f32 %v2061_v49, %v2077_v13 }
 0x971   : > { %3983 = vpow2.f32 %v2098_v44 }
 0x972   : > { %v2104_v62 = vmul.f32 1.442695, %v2093_v53 }
 0x973   : > { %v2080_v61 = vpop.xlane.xlu0 %2079  ;;  %v2083_v11 = vpop.xlane.xlu1 %2082 }
 0x974   : > { %3985 = vpow2.f32 %v2104_v62  ;;  %v2094_v45 = vsub.f32 %v2062_v16, %v2080_v61  ;;  %v2095_v14 = vsub.f32 %v2063_v17, %v2083_v11 }
 0x975   : > { %3987 = vpow2.f32 %v2100_v28 }
 0x976   : > { %v2106_v47 = vmul.f32 1.442695, %v2094_v45  ;;  %v2108_v16 = vmul.f32 1.442695, %v2095_v14 }
 0x977   : > { %v2086_v59 = vpop.xlane.xlu0 %2085  ;;  %v2089_v49 = vpop.xlane.xlu1 %2088 }
 0x978   : > { %v2096_v21 = vsub.f32 %v2064_v24, %v2086_v59  ;;  %v2097_v6 = vsub.f32 %v2065_v25, %v2089_v49  ;;  %v3688_v24 = vpop.f32.mrf.mxu1  ;;  %v2454_v25 = vsel %vm1301_vm4, %v5155_v33, -inf }
 0x979   : > { %v5169_v26 = vsel %vm4850_vm6, %v3688_v24, -inf }
 0x97a   : > { %v2110_v50 = vmul.f32 1.442695, %v2096_v21  ;;  %v2112_v15 = vmul.f32 1.442695, %v2097_v6  ;;  %v2418_v17 = vpop.f32.mrf.mxu1  ;;  %v2463_v41 = vsel %vm1301_vm4, %v5169_v26, -inf }
 0x97b   : > { %v5189_v20 = vsel %vm4844_vm5, %v2418_v17, -inf }
 0x97c   : > { %3989 = vpow2.f32 %v2110_v50  ;;  %v3691_v39 = vpop.f32.mrf.mxu1  ;;  %v2457_v62 = vsel %vm1301_vm4, %v5189_v20, -inf }
 0x97d   : > { %v5117_v38 = vpop.eup %3981  ;;  %3991 = vpow2.f32 %v2106_v47  ;;  %v5181_v13 = vsel %vm4864_vm8, %v3691_v39, -inf }
 0x97e   : > { %v2120_v52 = vsel %vm1301_vm4, %v5117_v38, 0.0  ;;  %v5121_v0 = vpop.eup %3983  ;;  %3993 = vpow2.f32 %v2112_v15  ;;  %v2431_v44 = vpop.f32.mrf.mxu1  ;;  %v2472_v27 = vsel %vm1301_vm4, %v5181_v13, -inf }
 0x97f   : > { %2121 = vadd.xlane.f32.xlu0 %v2120_v52  ;;  %v2114_v2 = vsel %vm1301_vm4, %v5121_v0, 0.0  ;;  %3995 = vpow2.f32 %v2108_v16  ;;  %v5175_v12 = vsel %vm4858_vm7, %v2431_v44, -inf }
 0x980   : > { %v2466_v31 = vsel %vm1301_vm4, %v5175_v12, -inf  ;;  %v3692_v53 = vpop.f32.mrf.mxu1 }
 0x981   : > { %v5123_v58 = vpop.eup %3985  ;;  %v5201_v45 = vsel %vm4878_vm10, %v3692_v53, -inf }
 0x982   : > { %v2123_v3 = vsel %vm1301_vm4, %v5123_v58, 0.0  ;;  %v5129_v4 = vpop.eup %3987  ;;  %v2434_v28 = vpop.f32.mrf.mxu1  ;;  %v2475_v22 = vsel %vm1301_vm4, %v5201_v45, -inf }
 0x983   : > { %2115 = vadd.xlane.f32.xlu0 %v2114_v2  ;;  %2124 = vadd.xlane.f32.xlu1 %v2123_v3  ;;  %v2117_v5 = vsel %vm1301_vm4, %v5129_v4, 0.0  ;;  %v5195_v42 = vsel %vm4872_vm9, %v2434_v28, -inf }
 0x984   : > { %v2469_v61 = vsel %vm1301_vm4, %v5195_v42, -inf }
 0x987   : > { %2118 = vadd.xlane.f32.xlu1 %v2117_v5 }
 0x989   : > { %v5133_v7 = vpop.eup %3989 }
 0x98a   : > { %v2132_v8 = vsel %vm1301_vm4, %v5133_v7, 0.0  ;;  %v5137_v9 = vpop.eup %3991 }
 0x98b   : > { %2133 = vadd.xlane.f32.xlu0 %v2132_v8  ;;  %v2126_v10 = vsel %vm1301_vm4, %v5137_v9, 0.0  ;;  %v5147_v23 = vpop.eup %3993 }
 0x98c   : > { %v2135_v30 = vsel %vm1301_vm4, %v5147_v23, 0.0  ;;  %v5151_v32 = vpop.eup %3995 }
 0x98d   : > { %v2129_v35 = vsel %vm1301_vm4, %v5151_v32, 0.0 }
 0x98f   : > { %2127 = vadd.xlane.f32.xlu0 %v2126_v10 }
 0x998   : > { %2162 = vrot.lane.b32.xlu1 %v4783_v46, %s4344_s19 }
 0x99c   : > { %2160 = vrot.lane.b32.xlu1 %v4792_v51, %s4344_s19 }
 0x9a5   : > { %2164 = vrot.lane.b32.xlu0 %v4779_v43, %s4344_s19 }
 0x9c0   : > { %2136 = vadd.xlane.f32.xlu1 %v2135_v30 }
 0x9c4   : > { %2455 = vmax.xlane.f32.xlu0 %v2454_v25  ;;  %2130 = vadd.xlane.f32.xlu1 %v2129_v35 }
 0x9c8   : > { %2461 = vmax.xlane.f32.xlu0 %v2460_v63 }
 0x9cc   : > { %2464 = vmax.xlane.f32.xlu0 %v2463_v41 }
 0x9d0   : > { %2467 = vmax.xlane.f32.xlu0 %v2466_v31 }
 0x9d4   : > { %2473 = vmax.xlane.f32.xlu0 %v2472_v27 }
 0x9d5   : > { %2158 = vrot.lane.b32.xlu1 %v4798_v54, %s4344_s19  ;;  %s3396_s19 = sshll.u32 %s4461_s0, 7  ;;  %s3143_s0 = scalar_lea.sflag [#allocation4], %s4620_s2 }
 0x9d6   : > { %s5477_s17 = scalar_lea.hbm %s5602_s22, %s3396_s19 }
 0x9f9   : > { %2458 = vmax.xlane.f32.xlu1 %v2457_v62 }
 0x9fd   : > { %2470 = vmax.xlane.f32.xlu1 %v2469_v61 }
 0xa01   : > { %2476 = vmax.xlane.f32.xlu1 %v2475_v22 }
 0xa08   : > { %v2122_v59 = vpop.xlane.xlu0 %2121 }
 0xa0c   : > { %v2116_v21 = vpop.xlane.xlu0 %2115  ;;  %v2125_v47 = vpop.xlane.xlu1 %2124 }
 0xa0d   : > { %3997 = vrcp.f32 %v2116_v21 }
 0xa10   : > { %v2119_v29 = vpop.xlane.xlu1 %2118 }
 0xa11   : > { %3999 = vrcp.f32 %v2119_v29 }
 0xa12   : > { %4001 = vrcp.f32 %v2125_v47 }
 0xa13   : > { %4003 = vrcp.f32 %v2122_v59 }
 0xa14   : > { %v2134_v50 = vpop.xlane.xlu0 %2133  ;;  %v2163_v3 = vpop.permute.xlu1 %2162 }
 0xa18   : > { %v2128_v52 = vpop.xlane.xlu0 %2127  ;;  %v2161_v49 = vpop.permute.xlu1 %2160 }
 0xa1a   : > { %v3998_v2 = vpop.eup %3997 }
 0xa1b   : > { %v2146_v8 = vmul.f32 %v3998_v2, %v5121_v0 }
 0xa1c   : > { %v2165_v5 = vpop.permute.xlu0 %2164 }
 0xa1d   : > { %3651 = vmatprep.subr.bf16.mxu0 %v2165_v5 }
 0xa1e   : > { %v4000_v55 = vpop.eup %3999  ;;  %3652 = vmatpush3.bf16.msra.mxu0 %v2165_v5  ;;  %v2248_v5 = vld [vmem:[#allocation10 + $0x8] sm:$0xf] }
 0xa1f   : > { %3653 = vmatprep.subr.bf16.mxu0 %v2163_v3  ;;  %v2147_v10 = vmul.f32 %v4000_v55, %v5129_v4  ;;  %v4002_v14 = vpop.eup %4001 }
 0xa20   : > { %v4004_v0 = vpop.eup %4003  ;;  %v2149_v4 = vmul.f32 %v4002_v14, %v5123_v58 }
 0xa21   : > { %v2154_v11 = vpack.c.bf16 %v2147_v10, %v2146_v8  ;;  %v2148_v30 = vmul.f32 %v4004_v0, %v5117_v38  ;;  %v2266_v8 = vsel %vm1804_vm11, %v2248_v5, 0 }
 0xa22   : > { %3654 = vmatpush3.bf16.msra.mxu0 %v2163_v3 }
 0xa23   : > { %3655 = vmatprep.subr.bf16.mxu0 %v2161_v49  ;;  %3659 = vmatprep.mubr.msk.bf16.mxu0 %vm1301_vm4, %v2154_v11  ;;  %v2155_v25 = vpack.c.bf16 %v2149_v4, %v2148_v30 }
 0xa26   : > { %3656 = vmatpush3.bf16.msra.mxu0 %v2161_v49 }
 0xa49   : > { %v2137_v6 = vpop.xlane.xlu1 %2136 }
 0xa4a   : > { %4005 = vrcp.f32 %v2137_v6 }
 0xa4b   : > { %4007 = vrcp.f32 %v2128_v52 }
 0xa4c   : > { %4009 = vrcp.f32 %v2134_v50 }
 0xa4d   : > { %v2456_v15 = vpop.xlane.xlu0 %2455  ;;  %v2131_v16 = vpop.xlane.xlu1 %2130 }
 0xa4e   : > { %4011 = vrcp.f32 %v2131_v16  ;;  %v2478_v18 = vsub.f32 %v5155_v33, %v2456_v15 }
 0xa50   : > { %v2486_v35 = vmul.f32 1.442695, %v2478_v18 }
 0xa51   : > { %v2462_v19 = vpop.xlane.xlu0 %2461  ;;  %v2159_v24 = vpop.permute.xlu1 %2158 }
 0xa52   : > { %v2480_v17 = vsub.f32 %v5163_v36, %v2462_v19  ;;  %3657 = vmatprep.subr.bf16.mxu0 %v2159_v24 }
 0xa53   : > { %3658 = vmatpush3.bf16.msra.mxu0 %v2159_v24 }
 0xa54   : > { %v2490_v39 = vmul.f32 1.442695, %v2480_v17  ;;  %3765 = vmatprep.subr.msk.bf16.mxu0 %vm1804_vm11, %v2248_v5 }
 0xa55   : > { %v2465_v63 = vpop.xlane.xlu0 %2464 }
 0xa56   : > { %4013 = vpow2.f32 %v2490_v39  ;;  %v2481_v44 = vsub.f32 %v5169_v26, %v2465_v63  ;;  %3660 = vmatmul.mubr.msk.bf16.vlgmr.msra.gmra.mxu0 %vm1301_vm4, %v2155_v25 }
 0xa57   : > { %v4006_v58 = vpop.eup %4005  ;;  %4015 = vpow2.f32 %v2486_v35  ;;  %3668 = vmatpush3.bf16.msra.mxu0 %v2266_v8 }
 0xa58   : > { %v2492_v33 = vmul.f32 1.442695, %v2481_v44  ;;  %v4008_v41 = vpop.eup %4007  ;;  %v2153_v36 = vmul.f32 %v4006_v58, %v5147_v23 }
 0xa59   : > { %v2468_v31 = vpop.xlane.xlu0 %2467  ;;  %v4010_v27 = vpop.eup %4009  ;;  %v2150_v28 = vmul.f32 %v4008_v41, %v5137_v9 }
 0xa5a   : > { %4017 = vpow2.f32 %v2492_v33  ;;  %v2482_v53 = vsub.f32 %v5175_v12, %v2468_v31  ;;  %v2152_v26 = vmul.f32 %v4010_v27, %v5133_v7 }
 0xa5b   : > { %v4012_v38 = vpop.eup %4011 }
 0xa5c   : > { %v2151_v62 = vmul.f32 %v4012_v38, %v5151_v32  ;;  %v2157_v21 = vpack.c.bf16 %v2153_v36, %v2152_v26  ;;  %v2494_v47 = vmul.f32 1.442695, %v2482_v53 }
 0xa5d   : > { %v2474_v61 = vpop.xlane.xlu0 %2473 }
 0xa5e   : > { %v2484_v22 = vsub.f32 %v5181_v13, %v2474_v61  ;;  %v2156_v59 = vpack.c.bf16 %v2151_v62, %v2150_v28 }
 0xa60   : > { %v2498_v29 = vmul.f32 1.442695, %v2484_v22  ;;  %3663 = vmatprep.mubr.msk.bf16.mxu0 %vm1301_vm4, %v2156_v59 }
 0xa61   : > { %3664 = vmatmul.mubr.msk.bf16.gmra.mxu0 %vm1301_vm4, %v2157_v21 }
 0xa62   : > { %4019 = vpow2.f32 %v2498_v29 }
 0xa63   : > { %v5222_v23 = vpop.eup %4013  ;;  %4021 = vpow2.f32 %v2494_v47 }
 0xa64   : > { %v2508_v9 = vsel %vm1301_vm4, %v5222_v23, 0.0  ;;  %v5226_v32 = vpop.eup %4015 }
 0xa65   : > { %2509 = vadd.xlane.f32.xlu0 %v2508_v9  ;;  %v2502_v12 = vsel %vm1301_vm4, %v5226_v32, 0.0 }
 0xa67   : > { %v5228_v7 = vpop.eup %4017 }
 0xa68   : > { %v2511_v13 = vsel %vm1301_vm4, %v5228_v7, 0.0 }
 0xa69   : > { %2503 = vadd.xlane.f32.xlu0 %v2502_v12  ;;  %2512 = vadd.xlane.f32.xlu1 %v2511_v13 }
 0xa6f   : > { %v5234_v50 = vpop.eup %4019 }
 0xa70   : > { %v2520_v52 = vsel %vm1301_vm4, %v5234_v50, 0.0  ;;  %v5238_v2 = vpop.eup %4021 }
 0xa71   : > { %2521 = vadd.xlane.f32.xlu0 %v2520_v52  ;;  %v2514_v3 = vsel %vm1301_vm4, %v5238_v2, 0.0 }
 0xa75   : > { %2515 = vadd.xlane.f32.xlu0 %v2514_v3 }
 0xa82   : > { %v2459_v55 = vpop.xlane.xlu1 %2458 }
 0xa83   : > { %v2479_v10 = vsub.f32 %v5189_v20, %v2459_v55 }
 0xa85   : > { %v2488_v11 = vmul.f32 1.442695, %v2479_v10 }
 0xa86   : > { %v2471_v14 = vpop.xlane.xlu1 %2470 }
 0xa87   : > { %4023 = vpow2.f32 %v2488_v11  ;;  %v2483_v16 = vsub.f32 %v5195_v42, %v2471_v14 }
 0xa8a   : > { %v2477_v20 = vpop.xlane.xlu1 %2476 }
 0xa8b   : > { %2552 = vrot.lane.b32.xlu0 %v4779_v43, %s4345_s1  ;;  %v2485_v15 = vsub.f32 %v5201_v45, %v2477_v20  ;;  %v2496_v43 = vmul.f32 1.442695, %v2483_v16  ;;  %v5267_v45 = vpop.f32.mrf.mxu0 }
 0xa8d   : > { %v2500_v0 = vmul.f32 1.442695, %v2485_v15  ;;  %v5269_v30 = vpop.f32.mrf.mxu0 }
 0xa8f   : > { %4025 = vpow2.f32 %v2500_v0  ;;  %v5271_v25 = vpop.f32.mrf.mxu0 }
 0xa90   : > { %4027 = vpow2.f32 %v2496_v43 }
 0xa91   : > { %v5273_v39 = vpop.f32.mrf.mxu0 }
 0xa93   : > { %v5275_v63 = vpop.f32.mrf.mxu0 }
 0xa94   : > { %v5247_v49 = vpop.eup %4023 }
 0xa95   : > { %v2505_v6 = vsel %vm1301_vm4, %v5247_v49, 0.0  ;;  %v5277_v44 = vpop.f32.mrf.mxu0 }
 0xa96   : > { %2506 = vadd.xlane.f32.xlu1 %v2505_v6 }
 0xa97   : > { %v5279_v58 = vpop.f32.mrf.mxu0 }
 0xa9c   : > { %v5257_v4 = vpop.eup %4025 }
 0xa9d   : > { %v2523_v18 = vsel %vm1301_vm4, %v5257_v4, 0.0  ;;  %v5261_v19 = vpop.eup %4027 }
 0xaa7   : > { %2550 = vrot.lane.b32.xlu1 %v4783_v46, %s4345_s1  ;;  %v2517_v46 = vsel %vm1301_vm4, %v5261_v19, 0.0 }
 0xaab   : > { %2548 = vrot.lane.b32.xlu1 %v4792_v51, %s4345_s1 }
 0xacf   : > { %2524 = vadd.xlane.f32.xlu1 %v2523_v18 }
 0xad3   : > { %2518 = vadd.xlane.f32.xlu1 %v2517_v46 }
 0xae4   : > { %2546 = vrot.lane.b32.xlu1 %v4798_v54, %s4345_s1  ;;  %v5281_v54 = vpop.f32.mrf.mxu0 }
 0xaee   : > { %v2510_v51 = vpop.xlane.xlu0 %2509 }
 0xaf2   : > { %v2504_v42 = vpop.xlane.xlu0 %2503  ;;  %v2513_v27 = vpop.xlane.xlu1 %2512 }
 0xaf3   : > { %4029 = vrcp.f32 %v2504_v42 }
 0xafa   : > { %v2522_v24 = vpop.xlane.xlu0 %2521 }
 0xafe   : > { %v2516_v17 = vpop.xlane.xlu0 %2515 }
 0xb00   : > { %v4030_v9 = vpop.eup %4029 }
 0xb01   : > { %v2534_v13 = vmul.f32 %v4030_v9, %v5226_v32 }
 0xb02   : > { %v2553_v35 = vpop.permute.xlu0 %2552 }
 0xb03   : > { %3693 = vmatprep.subr.bf16.mxu0 %v2553_v35 }
 0xb16   : > { %v3661_v33 = vpop.f32.mrf.mxu0 }
 0xb18   : > { %v2216_v41 = vpop.f32.mrf.mxu0 }
 0xb1a   : > { %v3662_v31 = vpop.f32.mrf.mxu0 }
 0xb1b   : > { %v2250_v53 = vpack.c.bf16 %v3662_v31, %v3661_v33 }
 0xb1c   : > { %v2219_v38 = vpop.f32.mrf.mxu0 }
 0xb1d   : > { %v2249_v36 = vpack.c.bf16 %v2219_v38, %v2216_v41  ;;  %v1926_v41 = vadd.f32 %v5273_v39, %v5083_v57  ;;  %v1942_v57 = vadd.f32 %v5281_v54, %v5091_v1 }
 0xb1f   : > { %3669 = vmatprep.mubr.msk.bf16.mxu0 %vm1203_vm1, %v2249_v36  ;;  %v2507_v28 = vpop.xlane.xlu1 %2506 }
 0xb20   : > { %4031 = vrcp.f32 %v2507_v28  ;;  %3670 = vmatmul.mubr.msk.bf16.vlgmr.msra.gmra.mxu0 %vm1203_vm1, %v2250_v53 }
 0xb21   : > { %3694 = vmatpush3.bf16.msra.mxu0 %v2553_v35  ;;  %v3665_v62 = vpop.f32.mrf.mxu0  ;;  %4033 = vrcp.f32 %v2513_v27 }
 0xb22   : > { %4035 = vrcp.f32 %v2510_v51 }
 0xb23   : > { %v2232_v61 = vpop.f32.mrf.mxu0  ;;  %v2551_v26 = vpop.permute.xlu1 %2550 }
 0xb24   : > { %3695 = vmatprep.subr.bf16.mxu0 %v2551_v26 }
 0xb25   : > { %v3666_v22 = vpop.f32.mrf.mxu0  ;;  %3696 = vmatpush3.bf16.msra.mxu0 %v2551_v26 }
 0xb26   : > { %v2252_v29 = vpack.c.bf16 %v3666_v22, %v3665_v62 }
 0xb27   : > { %v2235_v59 = vpop.f32.mrf.mxu0  ;;  %v2549_v21 = vpop.permute.xlu1 %2548 }
 0xb28   : > { %v2251_v47 = vpack.c.bf16 %v2235_v59, %v2232_v61  ;;  %3697 = vmatprep.subr.bf16.mxu0 %v2549_v21 }
 0xb29   : > { %3698 = vmatpush3.bf16.msra.mxu0 %v2549_v21 }
 0xb2a   : > { %3673 = vmatprep.mubr.msk.bf16.mxu0 %vm1203_vm1, %v2251_v47 }
 0xb2b   : > { %3674 = vmatmul.mubr.msk.bf16.gmra.mxu0 %vm1203_vm1, %v2252_v29 }
 0xb2d   : > { %v4032_v12 = vpop.eup %4031 }
 0xb2e   : > { %v2535_v52 = vmul.f32 %v4032_v12, %v5247_v49  ;;  %v4034_v55 = vpop.eup %4033 }
 0xb2f   : > { %v4036_v10 = vpop.eup %4035  ;;  %v2537_v11 = vmul.f32 %v4034_v55, %v5228_v7 }
 0xb30   : > { %v2542_v3 = vpack.c.bf16 %v2535_v52, %v2534_v13  ;;  %v2536_v32 = vmul.f32 %v4036_v10, %v5222_v23  ;;  %v2636_v23 = vld [vmem:[#allocation10 + $0xc] sm:$0xf] }
 0xb31   : > { %v2654_v42 = vsel %vm1804_vm11, %v2636_v23, 0  ;;  %v4061_v13 = vld [vmem:[%s4626_s18 + $0x10] sm:$0xff] }
 0xb32   : > { %3701 = vmatprep.mubr.msk.bf16.mxu0 %vm1301_vm4, %v2542_v3  ;;  %v2543_v49 = vpack.c.bf16 %v2537_v11, %v2536_v32  ;;  %v4062_v3 = vld [vmem:[%s4626_s18] sm:$0xff] }
 0xb58   : > { %v2525_v5 = vpop.xlane.xlu1 %2524 }
 0xb59   : > { %4037 = vrcp.f32 %v2525_v5 }
 0xb5a   : > { %4039 = vrcp.f32 %v2516_v17  ;;  %v1934_v17 = vadd.f32 %v5271_v25, %v5081_v56  ;;  %v1950_v56 = vadd.f32 %v5279_v58, %v5089_v60 }
 0xb5b   : > { %4041 = vrcp.f32 %v2522_v24 }
 0xb5c   : > { %v2519_v8 = vpop.xlane.xlu1 %2518 }
 0xb5d   : > { %4043 = vrcp.f32 %v2519_v8  ;;  %v3376_v8 = vld [vmem:[#allocation11] ss:$0 sm:$0xff] }
 0xb60   : > { %v2547_v6 = vpop.permute.xlu1 %2546 }
 0xb61   : > { %3699 = vmatprep.subr.bf16.mxu0 %v2547_v6 }
 0xb62   : > { %3700 = vmatpush3.bf16.msra.mxu0 %v2547_v6 }
 0xb63   : > { %3770 = vmatprep.subr.msk.bf16.mxu0 %vm1804_vm11, %v2636_v23 }
 0xb65   : > { %3702 = vmatmul.mubr.msk.bf16.vlgmr.msra.gmra.mxu0 %vm1301_vm4, %v2543_v49  ;;  %v4063_v49 = vld [vmem:[%s4626_s18 + $0x18] sm:$0xff] }
 0xb66   : > { %v4038_v14 = vpop.eup %4037  ;;  %3710 = vmatpush3.bf16.msra.mxu0 %v2654_v42 }
 0xb67   : > { %v4040_v20 = vpop.eup %4039  ;;  %v2541_v0 = vmul.f32 %v4038_v14, %v5257_v4  ;;  %v1931_v4 = vadd.f32 %v5267_v45, %v5077_v34  ;;  %v1947_v34 = vadd.f32 %v5275_v63, %v5085_v40 }
 0xb68   : > { %v4042_v15 = vpop.eup %4041  ;;  %v2538_v43 = vmul.f32 %v4040_v20, %v5238_v2  ;;  %v4064_v20 = vld [vmem:[%s4626_s18 + $0x8] sm:$0xff] }
 0xb69   : > { %v2540_v7 = vmul.f32 %v4042_v15, %v5234_v50 }
 0xb6a   : > { %v4044_v16 = vpop.eup %4043 }
 0xb6b   : > { %v2539_v18 = vmul.f32 %v4044_v16, %v5261_v19  ;;  %v2545_v51 = vpack.c.bf16 %v2541_v0, %v2540_v7  ;;  %v1923_v19 = vadd.f32 %v5269_v30, %v5079_v37  ;;  %v1939_v37 = vadd.f32 %v5277_v44, %v5087_v48 }
 0xb6d   : > { %v2544_v46 = vpack.c.bf16 %v2539_v18, %v2538_v43 }
 0xb6f   : > { %3705 = vmatprep.mubr.msk.bf16.mxu0 %vm1301_vm4, %v2544_v46 }
 0xb70   : > { %3706 = vmatmul.mubr.msk.bf16.gmra.mxu0 %vm1301_vm4, %v2545_v51 }
 0xbe0   : > { %v3671_v2 = vpop.f32.mrf.mxu0 }
 0xbe1   : > { %v2335_v50 = vadd.f32 %v3671_v2, %v1931_v4  ;;  %v4065_v2 = vld [vmem:[%s4626_s18 + $0x20] sm:$0xff] }
 0xbe2   : > { %v2302_v24 = vpop.f32.mrf.mxu0 }
 0xbe3   : > { %v2333_v35 = vadd.f32 %v2302_v24, %v1923_v19  ;;  %v4066_v24 = vld [vmem:[%s4626_s18 + $0x30] sm:$0xff] }
 0xbe4   : > { %v3672_v33 = vpop.f32.mrf.mxu0 }
 0xbe5   : > { %v2336_v31 = vadd.f32 %v3672_v33, %v1934_v17 }
 0xbe6   : > { %v2305_v27 = vpop.f32.mrf.mxu0 }
 0xbe7   : > { %v2334_v38 = vadd.f32 %v2305_v27, %v1926_v41  ;;  %v4067_v27 = vld [vmem:[%s4626_s18 + $0x38] sm:$0xff] }
 0xbeb   : > { %v3675_v45 = vpop.f32.mrf.mxu0 }
 0xbec   : > { %v2339_v30 = vadd.f32 %v3675_v45, %v1947_v34  ;;  %v4068_v34 = vld [vmem:[%s4626_s18 + $0x28] sm:$0xff] }
 0xbed   : > { %v2318_v36 = vpop.f32.mrf.mxu0 }
 0xbee   : > { %v2337_v25 = vadd.f32 %v2318_v36, %v1939_v37 }
 0xbef   : > { %v3676_v53 = vpop.f32.mrf.mxu0 }
 0xbf0   : > { %v2340_v39 = vadd.f32 %v3676_v53, %v1950_v56 }
 0xbf1   : > { %v2321_v28 = vpop.f32.mrf.mxu0 }
 0xbf2   : > { %v2338_v62 = vadd.f32 %v2321_v28, %v1942_v57 }
 0xc25   : > { %v3703_v61 = vpop.f32.mrf.mxu0 }
 0xc27   : > { %v2604_v26 = vpop.f32.mrf.mxu0 }
 0xc29   : > { %v3704_v40 = vpop.f32.mrf.mxu0 }
 0xc2a   : > { %v2638_v59 = vpack.c.bf16 %v3704_v40, %v3703_v61 }
 0xc2b   : > { %v2607_v63 = vpop.f32.mrf.mxu0 }
 0xc2c   : > { %v2637_v22 = vpack.c.bf16 %v2607_v63, %v2604_v26 }
 0xc2e   : > { %3711 = vmatprep.mubr.msk.bf16.mxu0 %vm1203_vm1, %v2637_v22 }
 0xc2f   : > { %3712 = vmatmul.mubr.msk.bf16.vlgmr.msra.gmra.mxu0 %vm1203_vm1, %v2638_v59 }
 0xc30   : > { %v3707_v48 = vpop.f32.mrf.mxu0 }
 0xc32   : > { %v2620_v60 = vpop.f32.mrf.mxu0 }
 0xc34   : > { %v3708_v44 = vpop.f32.mrf.mxu0 }
 0xc35   : > { %v2640_v54 = vpack.c.bf16 %v3708_v44, %v3707_v48 }
 0xc36   : > { %v2623_v58 = vpop.f32.mrf.mxu0 }
 0xc37   : > { %v2639_v1 = vpack.c.bf16 %v2623_v58, %v2620_v60 }
 0xc39   : > { %3715 = vmatprep.mubr.msk.bf16.mxu0 %vm1203_vm1, %v2639_v1 }
 0xc3a   : > { %3716 = vmatmul.mubr.msk.bf16.gmra.mxu0 %vm1203_vm1, %v2640_v54 }
 0xcef   : > { %v3713_v21 = vpop.f32.mrf.mxu0 }
 0xcf0   : > { %v2723_v47 = vadd.f32 %v3713_v21, %v2335_v50 }
 0xcf1   : > { %v2690_v29 = vpop.f32.mrf.mxu0 }
 0xcf2   : > { %v2721_v9 = vadd.f32 %v2690_v29, %v2333_v35  ;;  %v2731_v52 = vadd.f32 %v4061_v13, %v2723_v47 }
 0xcf3   : > { %v3714_v12 = vpop.f32.mrf.mxu0 }
 0xcf4   : > { %v2729_v5 = vadd.f32 %v4062_v3, %v2721_v9  ;;  %v2724_v55 = vadd.f32 %v3714_v12, %v2336_v31  ;;  %v5325_v32 = vadd.f32 %v3376_v8, %v2731_v52 }
 0xcf5   : > { %v2693_v10 = vpop.f32.mrf.mxu0 }
 0xcf6   : > { %v5323_v11 = vadd.f32 %v3376_v8, %v2729_v5  ;;  %v2722_v6 = vadd.f32 %v2693_v10, %v2334_v38  ;;  %v2732_v14 = vadd.f32 %v4063_v49, %v2724_v55  ;;  %v2760_v51 = vsel %vm654_vm0, %v5325_v32, 0.0 }
 0xcf8   : > { %v2730_v15 = vadd.f32 %v4064_v20, %v2722_v6  ;;  %v2754_v16 = vsel %vm654_vm0, %v5323_v11, 0.0  ;;  %v5333_v18 = vadd.f32 %v3376_v8, %v2732_v14 }
 0xcf9   : > { %2755 = vadd.xlane.f32.xlu0 %v2754_v16 }
 0xcfa   : > { %v5331_v0 = vadd.f32 %v3376_v8, %v2730_v15  ;;  %v3717_v43 = vpop.f32.mrf.mxu0  ;;  %v2763_v33 = vsel %vm654_vm0, %v5333_v18, 0.0 }
 0xcfb   : > { %v2727_v7 = vadd.f32 %v3717_v43, %v2339_v30 }
 0xcfc   : > { %v2706_v46 = vpop.f32.mrf.mxu0  ;;  %v2757_v23 = vsel %vm654_vm0, %v5331_v0, 0.0 }
 0xcfd   : > { %v2725_v42 = vadd.f32 %v2706_v46, %v2337_v25  ;;  %2761 = vadd.xlane.f32.xlu0 %v2760_v51  ;;  %2758 = vadd.xlane.f32.xlu1 %v2757_v23  ;;  %v2735_v17 = vadd.f32 %v4066_v24, %v2727_v7 }
 0xcfe   : > { %v3718_v4 = vpop.f32.mrf.mxu0 }
 0xcff   : > { %v2733_v19 = vadd.f32 %v4065_v2, %v2725_v42  ;;  %v2728_v50 = vadd.f32 %v3718_v4, %v2340_v39  ;;  %v5349_v30 = vadd.f32 %v3376_v8, %v2735_v17  ;;  %v3895_v2 = vld [vmem:[%s5535_s13 + $0x8] sm:$0xff]  }
 0xd00   : > { %v2709_v35 = vpop.f32.mrf.mxu0  ;;  %3719 = vmatprep.subr.bf16.mxu1 %v3895_v2 }
 0xd01   : > { %v5343_v41 = vadd.f32 %v3376_v8, %v2733_v19  ;;  %v2726_v31 = vadd.f32 %v2709_v35, %v2338_v62  ;;  %2764 = vadd.xlane.f32.xlu0 %v2763_v33  ;;  %v2736_v38 = vadd.f32 %v4067_v27, %v2728_v50  ;;  %v2772_v53 = vsel %vm654_vm0, %v5349_v30, 0.0  ;;  %3720 = vmatpush3.bf16.msra.mxu1 %v3895_v2  ;;  %v3896_v19 = vld [vmem:[%s5535_s13] sm:$0xff]   ;;  %v3897_v50 = vld [vmem:[%s5537_s15 + $0x18] sm:$0xff]  }
 0xd02   : > { %3721 = vmatprep.subr.bf16.mxu1 %v3896_v19  ;;  %3731 = vmatprep.subr.bf16.mxu0 %v3897_v50 }
 0xd03   : > { %v2734_v45 = vadd.f32 %v4068_v34, %v2726_v31  ;;  %v2766_v37 = vsel %vm654_vm0, %v5343_v41, 0.0  ;;  %v5353_v56 = vadd.f32 %v3376_v8, %v2736_v38  ;;  %3732 = vmatpush3.bf16.msra.mxu0 %v3897_v50 }
 0xd05   : > { %v5351_v36 = vadd.f32 %v3376_v8, %v2734_v45  ;;  %2767 = vadd.xlane.f32.xlu0 %v2766_v37  ;;  %v2775_v57 = vsel %vm654_vm0, %v5353_v56, 0.0  ;;  %3722 = vmatpush3.bf16.msra.mxu1 %v3896_v19 }
 0xd07   : > { %v2769_v25 = vsel %vm654_vm0, %v5351_v36, 0.0 }
 0xd08   : > { %2770 = vadd.xlane.f32.xlu1 %v2769_v25 }
 0xd09   : > { %2773 = vadd.xlane.f32.xlu0 %v2772_v53 }
 0xd0c   : > { %2776 = vadd.xlane.f32.xlu1 %v2775_v57 }
 0xd82   : > { %v2756_v39 = vpop.xlane.xlu0 %2755 }
 0xd83   : > { %v2778_v28 = vmul.f32 0.03125, %v2756_v39 }
 0xd85   : > { %v5362_v62 = vsub.f32 %v5323_v11, %v2778_v28 }
 0xd86   : > { %v2762_v61 = vpop.xlane.xlu0 %2761  ;;  %v2759_v26 = vpop.xlane.xlu1 %2758 }
 0xd87   : > { %v2780_v40 = vmul.f32 0.03125, %v2762_v61  ;;  %v2779_v63 = vmul.f32 0.03125, %v2759_v26  ;;  %v2794_v22 = vmul.f32 %v5362_v62, %v5362_v62 }
 0xd89   : > { %v5367_v59 = vsub.f32 %v5325_v32, %v2780_v40  ;;  %v5370_v48 = vsub.f32 %v5331_v0, %v2779_v63  ;;  %v2802_v60 = vsel %vm654_vm0, %v2794_v22, 0.0 }
 0xd8a   : > { %v2765_v44 = vpop.xlane.xlu0 %2764  ;;  %2803 = vadd.xlane.f32.xlu0 %v2802_v60 }
 0xd8b   : > { %v2781_v58 = vmul.f32 0.03125, %v2765_v44  ;;  %v2796_v1 = vmul.f32 %v5367_v59, %v5367_v59  ;;  %v2795_v54 = vmul.f32 %v5370_v48, %v5370_v48 }
 0xd8d   : > { %v5378_v21 = vsub.f32 %v5333_v18, %v2781_v58  ;;  %v2808_v47 = vsel %vm654_vm0, %v2796_v1, 0.0  ;;  %v2805_v29 = vsel %vm654_vm0, %v2795_v54, 0.0 }
 0xd8e   : > { %2809 = vadd.xlane.f32.xlu0 %v2808_v47  ;;  %v2768_v9 = vpop.xlane.xlu0 %2767  ;;  %2806 = vadd.xlane.f32.xlu1 %v2805_v29  ;;  %v3377_v47 = vld [vmem:[%s5533_s11] ss:$0 sm:$0xff] }
 0xd8f   : > { %v2782_v12 = vmul.f32 0.03125, %v2768_v9  ;;  %v2797_v13 = vmul.f32 %v5378_v21, %v5378_v21 }
 0xd91   : > { %v5385_v52 = vsub.f32 %v5343_v41, %v2782_v12  ;;  %v2771_v3 = vpop.xlane.xlu1 %2770  ;;  %v2811_v5 = vsel %vm654_vm0, %v2797_v13, 0.0 }
 0xd92   : > { %v2783_v55 = vmul.f32 0.03125, %v2771_v3  ;;  %v2774_v8 = vpop.xlane.xlu0 %2773  ;;  %2812 = vadd.xlane.f32.xlu1 %v2811_v5 }
 0xd93   : > { %v2784_v10 = vmul.f32 0.03125, %v2774_v8  ;;  %v2798_v6 = vmul.f32 %v5385_v52, %v5385_v52 }
 0xd94   : > { %v5391_v49 = vsub.f32 %v5351_v36, %v2783_v55  ;;  %v3378_v55 = vld [vmem:[%s5534_s12] ss:$0 sm:$0xff] }
 0xd95   : > { %v5394_v14 = vsub.f32 %v5349_v30, %v2784_v10  ;;  %v2777_v20 = vpop.xlane.xlu1 %2776  ;;  %v2814_v15 = vsel %vm654_vm0, %v2798_v6, 0.0 }
 0xd96   : > { %v2785_v16 = vmul.f32 0.03125, %v2777_v20  ;;  %2815 = vadd.xlane.f32.xlu0 %v2814_v15  ;;  %v2799_v43 = vmul.f32 %v5391_v49, %v5391_v49 }
 0xd97   : > { %v2800_v7 = vmul.f32 %v5394_v14, %v5394_v14 }
 0xd98   : > { %v5402_v46 = vsub.f32 %v5353_v56, %v2785_v16  ;;  %v2817_v51 = vsel %vm654_vm0, %v2799_v43, 0.0 }
 0xd99   : > { %2818 = vadd.xlane.f32.xlu1 %v2817_v51  ;;  %v2820_v23 = vsel %vm654_vm0, %v2800_v7, 0.0 }
 0xd9a   : > { %2821 = vadd.xlane.f32.xlu0 %v2820_v23  ;;  %v2801_v42 = vmul.f32 %v5402_v46, %v5402_v46 }
 0xd9c   : > { %v2823_v4 = vsel %vm654_vm0, %v2801_v42, 0.0 }
 0xd9d   : > { %2824 = vadd.xlane.f32.xlu1 %v2823_v4 }
 0xe13   : > { %v2804_v24 = vpop.xlane.xlu0 %2803 }
 0xe14   : > { %v2826_v17 = vmul.f32 0.03125, %v2804_v24 }
 0xe16   : > { %v2834_v35 = vadd.f32 1e-05, %v2826_v17 }
 0xe17   : > { %v2810_v33 = vpop.xlane.xlu0 %2809  ;;  %v2807_v31 = vpop.xlane.xlu1 %2806 }
 0xe18   : > { %4045 = vrsqrt.f32 %v2834_v35  ;;  %v2828_v27 = vmul.f32 0.03125, %v2810_v33  ;;  %v2827_v38 = vmul.f32 0.03125, %v2807_v31 }
 0xe1a   : > { %v2836_v34 = vadd.f32 1e-05, %v2828_v27  ;;  %v2835_v45 = vadd.f32 1e-05, %v2827_v38 }
 0xe1b   : > { %v2813_v37 = vpop.xlane.xlu1 %2812 }
 0xe1c   : > { %4047 = vrsqrt.f32 %v2836_v34  ;;  %v2829_v25 = vmul.f32 0.03125, %v2813_v37 }
 0xe1d   : > { %4049 = vrsqrt.f32 %v2835_v45 }
 0xe1e   : > { %v2837_v53 = vadd.f32 1e-05, %v2829_v25 }
 0xe1f   : > { %v2816_v57 = vpop.xlane.xlu0 %2815 }
 0xe20   : > { %4051 = vrsqrt.f32 %v2837_v53  ;;  %v2830_v39 = vmul.f32 0.03125, %v2816_v57  ;;  %v3379_v53 = vld [vmem:[%s5536_s14] ss:$0 sm:$0xff] }
 0xe22   : > { %v2838_v28 = vadd.f32 1e-05, %v2830_v39  ;;  %v2819_v61 = vpop.xlane.xlu1 %2818 }
 0xe23   : > { %v2831_v26 = vmul.f32 0.03125, %v2819_v61  ;;  %v2822_v40 = vpop.xlane.xlu0 %2821 }
 0xe24   : > { %4053 = vrsqrt.f32 %v2838_v28  ;;  %v2832_v63 = vmul.f32 0.03125, %v2822_v40 }
 0xe25   : > { %v4046_v22 = vpop.eup %4045  ;;  %v2839_v60 = vadd.f32 1e-05, %v2831_v26 }
 0xe26   : > { %v2840_v44 = vadd.f32 1e-05, %v2832_v63  ;;  %v2825_v58 = vpop.xlane.xlu1 %2824  ;;  %v2850_v54 = vmul.f32 %v4046_v22, %v5362_v62 }
 0xe27   : > { %4055 = vrsqrt.f32 %v2839_v60  ;;  %v2833_v1 = vmul.f32 0.03125, %v2825_v58 }
 0xe28   : > { %4057 = vrsqrt.f32 %v2840_v44  ;;  %v2864_v5 = vmul.f32 %v3377_v47, %v2850_v54 }
 0xe29   : > { %v4048_v29 = vpop.eup %4047  ;;  %v2841_v9 = vadd.f32 1e-05, %v2833_v1 }
 0xe2a   : > { %v4050_v12 = vpop.eup %4049  ;;  %v2852_v13 = vmul.f32 %v4048_v29, %v5367_v59  ;;  %v2878_v20 = vadd.f32 %v3378_v55, %v2864_v5 }
 0xe2b   : > { %4059 = vrsqrt.f32 %v2841_v9  ;;  %v2851_v3 = vmul.f32 %v4050_v12, %v5370_v48 }
 0xe2c   : > { %v2866_v10 = vmul.f32 %v3377_v47, %v2852_v13 }
 0xe2d   : > { %v4052_v8 = vpop.eup %4051  ;;  %v2865_v62 = vmul.f32 %v3377_v47, %v2851_v3 }
 0xe2e   : > { %v2853_v6 = vmul.f32 %v4052_v8, %v5378_v21  ;;  %v2880_v51 = vadd.f32 %v3378_v55, %v2866_v10 }
 0xe2f   : > { %v2879_v15 = vadd.f32 %v3378_v55, %v2865_v62 }
 0xe30   : > { %v2867_v16 = vmul.f32 %v3377_v47, %v2853_v6 }
 0xe31   : > { %v4054_v43 = vpop.eup %4053  ;;  %v2890_v7 = vpack.c.bf16 %v2879_v15, %v2878_v20 }
 0xe32   : > { %v2881_v59 = vadd.f32 %v3378_v55, %v2867_v16  ;;  %v2854_v23 = vmul.f32 %v4054_v43, %v5385_v52  ;;  %v3394_v16 = vld [vmem:[%s5601_s9] ss:$0 sm:$0xff] }
 0xe33   : > { %3723 = vmatprep.mubr.msk.bf16.mxu1 %vm654_vm0, %v2890_v7 }
 0xe34   : > { %v4056_v48 = vpop.eup %4055  ;;  %v2891_v42 = vpack.c.bf16 %v2881_v59, %v2880_v51  ;;  %v2868_v19 = vmul.f32 %v3377_v47, %v2854_v23 }
 0xe35   : > { %v4058_v4 = vpop.eup %4057  ;;  %v2855_v2 = vmul.f32 %v4056_v48, %v5391_v49  ;;  %v3898_v49 = vld [vmem:[%s5537_s15 + $0x10] sm:$0xff]  }
 0xe36   : > { %3724 = vmatmul.mubr.msk.bf16.vlgmr.msra.gmra.mxu1 %vm654_vm0, %v2891_v42  ;;  %v2856_v21 = vmul.f32 %v4058_v4, %v5394_v14  ;;  %v2882_v17 = vadd.f32 %v3378_v55, %v2868_v19  ;;  %3733 = vmatprep.subr.bf16.mxu0 %v3898_v49  ;;  %v3899_v14 = vld [vmem:[%s5537_s15 + $0x8] sm:$0xff]  }
 0xe37   : > { %v2869_v50 = vmul.f32 %v3377_v47, %v2855_v2  ;;  %3734 = vmatpush3.bf16.msra.mxu0 %v3898_v49 }
 0xe38   : > { %v4060_v24 = vpop.eup %4059  ;;  %v2870_v31 = vmul.f32 %v3377_v47, %v2856_v21  ;;  %3735 = vmatprep.subr.bf16.mxu0 %v3899_v14 }
 0xe39   : > { %v2883_v35 = vadd.f32 %v3378_v55, %v2869_v50  ;;  %v2857_v33 = vmul.f32 %v4060_v24, %v5402_v46  ;;  %v3900_v46 = vld [vmem:[%s5537_s15] sm:$0xff]  }
 0xe3a   : > { %v2884_v38 = vadd.f32 %v3378_v55, %v2870_v31 }
 0xe3b   : > { %v2892_v52 = vpack.c.bf16 %v2883_v35, %v2882_v17  ;;  %v2871_v27 = vmul.f32 %v3377_v47, %v2857_v33  ;;  %3736 = vmatpush3.bf16.msra.mxu0 %v3899_v14 }
 0xe3c   : > { %3737 = vmatprep.subr.bf16.mxu0 %v3900_v46 }
 0xe3d   : > { %3727 = vmatprep.mubr.msk.bf16.mxu1 %vm654_vm0, %v2892_v52  ;;  %v2885_v34 = vadd.f32 %v3378_v55, %v2871_v27 }
 0xe3f   : > { %v2893_v45 = vpack.c.bf16 %v2885_v34, %v2884_v38  ;;  %3738 = vmatpush3.bf16.msra.mxu0 %v3900_v46 }
 0xe41   : > { %3728 = vmatmul.mubr.msk.bf16.gmra.mxu1 %vm654_vm0, %v2893_v45 }
 0xef6   : > { %v3725_v37 = vpop.f32.mrf.mxu1 }
 0xef7   : > { %v2968_v61 = vadd.f32 %v3725_v37, %v3379_v53 }
 0xef8   : > { %v2959_v25 = vpop.f32.mrf.mxu1 }
 0xef9   : > { %v2960_v39 = vadd.f32 %v3379_v53, %v2959_v25  ;;  %v2992_v44 = vmax.f32 %v2968_v61, 0.0 }
 0xefa   : > { %v3726_v57 = vpop.f32.mrf.mxu1 }
 0xefb   : > { %v2971_v28 = vadd.f32 %v3726_v57, %v3379_v53  ;;  %v2990_v22 = vmax.f32 %v2960_v39, 0.0 }
 0xefc   : > { %v2962_v26 = vpop.f32.mrf.mxu1 }
 0xefd   : > { %v2963_v40 = vadd.f32 %v3379_v53, %v2962_v26  ;;  %v2993_v63 = vmax.f32 %v2971_v28, 0.0 }
 0xeff   : > { %v2991_v60 = vmax.f32 %v2963_v40, 0.0  ;;  %v3007_v54 = vpack.c.bf16 %v2993_v63, %v2992_v44 }
 0xf01   : > { %v3006_v58 = vpack.c.bf16 %v2991_v60, %v2990_v22  ;;  %v3729_v1 = vpop.f32.mrf.mxu1 }
 0xf02   : > { %v2984_v13 = vadd.f32 %v3729_v1, %v3379_v53 }
 0xf03   : > { %v2975_v47 = vpop.f32.mrf.mxu1  ;;  %3739 = vmatprep.mubr.msk.bf16.mxu0 %vm1301_vm4, %v3006_v58 }
 0xf04   : > { %3740 = vmatmul.mubr.msk.bf16.vlgmr.msra.gmra.mxu0 %vm1301_vm4, %v3007_v54  ;;  %v2976_v9 = vadd.f32 %v3379_v53, %v2975_v47  ;;  %v2996_v10 = vmax.f32 %v2984_v13, 0.0 }
 0xf05   : > { %v3730_v29 = vpop.f32.mrf.mxu1 }
 0xf06   : > { %v2987_v12 = vadd.f32 %v3730_v29, %v3379_v53  ;;  %v2994_v8 = vmax.f32 %v2976_v9, 0.0 }
 0xf07   : > { %v2978_v3 = vpop.f32.mrf.mxu1 }
 0xf08   : > { %v2979_v5 = vadd.f32 %v3379_v53, %v2978_v3  ;;  %v2997_v55 = vmax.f32 %v2987_v12, 0.0 }
 0xf0a   : > { %v2995_v62 = vmax.f32 %v2979_v5, 0.0  ;;  %v3009_v20 = vpack.c.bf16 %v2997_v55, %v2996_v10 }
 0xf0c   : > { %v3008_v6 = vpack.c.bf16 %v2995_v62, %v2994_v8 }
 0xf0e   : > { %3743 = vmatprep.mubr.msk.bf16.mxu0 %vm1301_vm4, %v3008_v6 }
 0xf0f   : > { %3744 = vmatmul.mubr.msk.bf16.gmra.mxu0 %vm1301_vm4, %v3009_v20 }
 0xfc4   : > { %v3741_v15 = vpop.f32.mrf.mxu0 }
 0xfc5   : > { %v3113_v43 = vadd.f32 %v3741_v15, %v5325_v32 }
 0xfc6   : > { %v3080_v7 = vpop.f32.mrf.mxu0 }
 0xfc7   : > { %v3128_v51 = vadd.f32 %v3394_v16, %v3113_v43  ;;  %v3111_v59 = vadd.f32 %v3080_v7, %v5323_v11 }
 0xfc8   : > { %v3742_v23 = vpop.f32.mrf.mxu0 }
 0xfc9   : > { %3136 = vst.msk [vmem:[%s642_s30 + $0x10] sm:$0xff] %vm654_vm0, %v3128_v51  ;;  %v3126_v48 = vadd.f32 %v3394_v16, %v3111_v59  ;;  %v3114_v42 = vadd.f32 %v3742_v23, %v5333_v18 }
 0xfca   : > { %v3083_v4 = vpop.f32.mrf.mxu0 }
 0xfcb   : > { %3134 = vst.msk [vmem:[%s642_s30] sm:$0xff] %vm654_vm0, %v3126_v48  ;;  %v3129_v2 = vadd.f32 %v3394_v16, %v3114_v42  ;;  %v3112_v19 = vadd.f32 %v3083_v4, %v5331_v0 }
 0xfcd   : > { %3137 = vst.msk [vmem:[%s642_s30 + $0x18] sm:$0xff] %vm654_vm0, %v3129_v2  ;;  %v3127_v32 = vadd.f32 %v3394_v16, %v3112_v19 }
 0xfcf   : > { %3135 = vst.msk [vmem:[%s642_s30 + $0x8] sm:$0xff] %vm654_vm0, %v3127_v32  ;;  %v3745_v11 = vpop.f32.mrf.mxu0 }
 0xfd0   : > { %v3117_v21 = vadd.f32 %v3745_v11, %v5349_v30 }
 0xfd1   : > { %v3096_v50 = vpop.f32.mrf.mxu0 }
 0xfd2   : > { %v3132_v24 = vadd.f32 %v3394_v16, %v3117_v21  ;;  %v3115_v17 = vadd.f32 %v3096_v50, %v5343_v41 }
 0xfd3   : > { %v3746_v18 = vpop.f32.mrf.mxu0 }
 0xfd4   : > { %3140 = vst.msk [vmem:[%s642_s30 + $0x30] sm:$0xff] %vm654_vm0, %v3132_v24  ;;  %v3130_v35 = vadd.f32 %v3394_v16, %v3115_v17  ;;  %v3118_v0 = vadd.f32 %v3746_v18, %v5353_v56 }
 0xfd5   : > { %v3099_v33 = vpop.f32.mrf.mxu0 }
 0xfd6   : > { %3138 = vst.msk [vmem:[%s642_s30 + $0x20] sm:$0xff] %vm654_vm0, %v3130_v35  ;;  %v3133_v30 = vadd.f32 %v3394_v16, %v3118_v0  ;;  %v3116_v41 = vadd.f32 %v3099_v33, %v5351_v36 }
 0xfd8   : > { %3141 = vst.msk [vmem:[%s642_s30 + $0x38] sm:$0xff] %vm654_vm0, %v3133_v30  ;;  %v3131_v56 = vadd.f32 %v3394_v16, %v3116_v41 }
 0xfda   : > { %3139 = vst.msk [vmem:[%s642_s30 + $0x28] sm:$0xff] %vm654_vm0, %v3131_v56 }
 0xfdb   : > { %4266 = shalt.err (!%p4263_p6)
}
 0xfdc   : > { %s4267_s7 = scalar_lea.hbm %s5477_s17, 1024  ;;  %s4271_s19 = scalar_lea.hbm %s5602_s22, 2048 }
 0xfdd   : > { %p4268_p1 = scmp.ne.s32.totalorder %s5477_s17, %s4267_s7  ;;  %p4272_p9 = scmp.lt.s32.totalorder %s5477_s17, %s5602_s22 }
 0xfde   : > { %p4273_p10 = scmp.lt.s32.totalorder %s4271_s19, %s4267_s7 }
 0xfdf   : > { %p4269_p3 = pnand %p4268_p1, %p5603_p13 }
 0xfe0   : > { %p4274_p11 = por %p4273_p10, %p4272_p9 }
 0xfe1   : > { %p4270_p4 = pneg %p4269_p3 }
 0xfe3   : > { %p4275_p12 = pnand %p4274_p11, %p4270_p4 }
 0xfe5   : > { %4278 = shalt.err (!%p4275_p12)
}
 0xfe6   : > { %s4347_s20 = smov 128   ;;  %s4348_s16 = smov 256  }
 0xfe7   : > { %s4349_s28 = smov 8  }
 0xfe8   : > { %3797 = dma.vmem_to_hbm [thread:$0]  (%p5603_p13), %s5470_s26, 1024, %s5477_s17, %s3143_s0, %s4347_s20, %s4348_s16, %s4349_s28  }
 0xfe9 PF: > { %s3170_s6 = sand.u32 1, %s4317_s24   ;;  %p5604_p0 = scmp.ne.s32.totalorder %s5573_s23, 0 }
 0xfea   : > { %p5605_p2 = scmp.ge.s32.totalorder %s4329_s27, 2  ;;  %s3171_s7 = scalar_lea.sflag [#allocation4], %s3170_s6 }
 0xfec   : > { %p3823_p5 = pnand %p5605_p2, %p5604_p0 }
 0xfee   : > { %p3824_p8 = pneg %p3823_p5 }
 0xff0   : > { %4312 = dma.done.wait (%p3824_p8), %s3171_s7, 1024  }
 0xff1   : > { %4314 = vsyncadd (%p3824_p8), %s3171_s7, 4294966272  ;;  %s5606_s9 = sld [smem:[#allocation20_spill]]  ;;  %p33_p7 = scmp.ge.s32.totalorder %s4548_s21, 4  }
 0xff2   : > { %s5607_s26 = sld [smem:[#allocation21_spill]]  ;;  %s5608_s24 = smov %s4321_s25 }
 0xff3   : > { %s5610_s27 = smov %s4548_s21  ;;  %35 = sbr.rel (!%p33_p7) target bundleno = 19 (0x13), region = 160 }
 0xff7   : > { %s5609_s25 = smov %s5606_s9 }
 0xff8   :  { %3176 = vsyncpa [#allocation3], 1 }
 0xff9   :  { %3178 = vsyncpa [#allocation3 + $0x1], 1 }
 0xffa   :  { %3179 = vsyncpa [#allocation6], 1 }
 0xffb   :  { %3180 = vsyncpa [#allocation9], 1 }
 0xffc   :  { %3181 = vsyncpa [#allocation12], 1 }
 0xffd   :  { %3182 = vsyncpa [#allocation4], 1 }
 0xffe   :  { %3184 = vsyncpa [#allocation4 + $0x1], 1 }

</bundles_post_ra>
